<compile_context>
chip_gen: v7x
topology: tpu7x:2x2x1
jax: 0.10.0
libtpu: 0.0.40
codegen_flags: <defaults>
</compile_context>

<pallas_src>
import numpy as np
import jax
import jax.numpy as jnp
from jax import lax
from jax.experimental import pallas as pl
from jax.experimental.pallas import tpu as pltpu


# ----------------------------------------------------------------------------- #
# Geometry constants (LeNet on 3x32x32; fc1 expects 16*5*5 features)
# ----------------------------------------------------------------------------- #
BT = 4                      # batch-tile size (samples per grid step)
RB = 36                     # rows reserved per sample (32 real + 4 pad >= K-1)
G = BT * RB                 # 144 activation rows per tile
K = 5                       # conv kernel size
LANES = 128

CI1, CO1, WI1, WP1 = 3, 6, 32, 14      # conv1: in-ch, out-ch, in width, pooled width
CI2, CO2, WI2, WP2 = 6, 16, 14, 5      # conv2
A_W = CI1 * WI1                        # 96   input lane width (ci*32 + w)

H_ACC1 = G - (K - 1)                   # 140  conv1 output rows per tile
H_R1 = H_ACC1 - 1                      # 139  after H-pool (valid @ 36*b + 2*hp)
H_ACC2 = H_R1 - 2 * (K - 1)            # 131  conv2 output rows (valid @ 36*b + 2*h)
H_R2 = H_ACC2 - 2                      # 129  after H-pool (valid @ 36*b + 4*hp)

FC1_IN = WP2 * LANES                   # 640  banded fc1 contraction (5 blocks x 128)
FCW = 128                              # padded fc width / padded logit lanes


# ----------------------------------------------------------------------------- #
# One-time weight plumbing (pure NumPy, runs ONCE, outside jit)
# ----------------------------------------------------------------------------- #
def _banded_conv_mat(w_hwio, in_w, out_wp, n_in_rows):
    """Banded conv matrices, split in 128-lane column halves: (2*K, n_in_rows, 128).

    Index half*K + kh.  Row r = ci*in_w + wi; lane l = co*out_wp + wp; the output
    column is w = 2*wp + half (folds the 2x2-pool column interleave).
    Entry = w_hwio[kh, wi - w, ci, co] when that tap is in range, else 0.
    """
    w_hwio = np.asarray(w_hwio, np.float32)
    Kh, Kw, CI, CO = w_hwio.shape
    r = np.arange(n_in_rows)
    ci = r // in_w
    wi = r % in_w
    row_valid = r < CI * in_w
    c = np.arange(2 * LANES)
    jp = c // LANES
    cc = c % LANES
    co = cc // out_wp
    wp = cc % out_wp
    col_valid = cc < CO * out_wp
    kw = wi[:, None] - (2 * wp + jp)[None, :]
    valid = row_valid[:, None] & col_valid[None, :] & (kw >= 0) & (kw < Kw)
    kw_c = np.clip(kw, 0, Kw - 1)
    ci_c = np.clip(ci, 0, CI - 1)
    co_c = np.clip(co, 0, CO - 1)
    mat = w_hwio[:, kw_c, ci_c[:, None], co_c[None, :]]            # (K, rows, 256)
    mat = np.where(valid[None, :, :], mat, 0.0).astype(np.float32)
    return np.concatenate([mat[:, :, :LANES], mat[:, :, LANES:]], axis=0)


def _conv_bias_halves(bias, out_wp):
    bias = np.asarray(bias, np.float32)
    CO = bias.shape[0]
    cc = np.arange(LANES)
    co = np.clip(cc // out_wp, 0, CO - 1)
    valid = cc < CO * out_wp
    b = np.where(valid, bias[co], 0.0).astype(np.float32)          # same for both halves
    return np.stack([b, b], axis=0).reshape(2, 1, LANES)


def _fc1_reordered(fc1_w):
    """(400,l1) torch-(C,H,W)-ordered rows -> (640,128); row = hp*128 + (co*5+wp)."""
    fc1_w = np.asarray(fc1_w, np.float32)
    l1 = fc1_w.shape[1]
    r = np.arange(FC1_IN)
    hp = r // LANES
    lane = r % LANES
    co = lane // WP2
    wp = lane % WP2
    valid = lane < CO2 * WP2
    src = np.clip(co * 25 + hp * 5 + wp, 0, fc1_w.shape[0] - 1)
    w = np.where(valid[:, None], fc1_w[src, :], 0.0)
    out = np.zeros((FC1_IN, FCW), np.float32)
    out[:, :l1] = w
    return out


def prepare_params(params):
    """Build all kernel-ready weights ONCE (host-side).  Results are plain device
    arrays fed to the jitted forward, so none of this runs per call."""
    l1 = params["fc1_w"].shape[1]
    l2 = params["fc2_w"].shape[1]

    def padw(w, rows, cols):
        out = np.zeros((rows, cols), np.float32)
        a = np.asarray(w, np.float32)
        out[:a.shape[0], :a.shape[1]] = a
        return out

    def padb(b):
        out = np.zeros((1, FCW), np.float32)
        a = np.asarray(b, np.float32)
        out[0, :a.shape[0]] = a
        return out

    m1 = jnp.asarray(_banded_conv_mat(params["w1"], WI1, WP1, A_W), jnp.bfloat16)
    b1 = jnp.asarray(_conv_bias_halves(params["b1"], WP1))
    m2 = jnp.asarray(_banded_conv_mat(params["w2"], WI2, WP2, LANES), jnp.bfloat16)
    b2 = jnp.asarray(_conv_bias_halves(params["b2"], WP2))
    fc1w = jnp.asarray(_fc1_reordered(params["fc1_w"]), jnp.bfloat16)
    fc1b = jnp.asarray(padb(params["fc1_b"]))
    fc2w = jnp.asarray(padw(params["fc2_w"], FCW, FCW), jnp.bfloat16)
    fc2b = jnp.asarray(padb(params["fc2_b"]))
    fc3w = jnp.asarray(padw(params["fc3_w"], FCW, FCW), jnp.bfloat16)   # 10 -> 128 lanes
    fc3b = jnp.asarray(padb(params["fc3_b"]))
    del l1, l2
    return (m1, b1, m2, b2, fc1w, fc1b, fc2w, fc2b, fc3w, fc3b)


def _build_rows(x_nchw):
    """NCHW (NB,3,32,32) -> (NB*36, 96) bf16 with row 36*b + h and lane ci*32 + w."""
    nb = x_nchw.shape[0]
    xt = jnp.transpose(x_nchw, (0, 2, 1, 3)).reshape(nb, 32, A_W)
    xt = jnp.pad(xt, ((0, 0), (0, RB - 32), (0, 0)))
    return xt.reshape(nb * RB, A_W).astype(jnp.bfloat16)


# ----------------------------------------------------------------------------- #
# The fused LeNet kernel (one batch tile per grid step)
# ----------------------------------------------------------------------------- #
def _lenet_kernel(a_ref, m1_ref, b1_ref, m2_ref, b2_ref,
                  fc1w_ref, fc1b_ref, fc2w_ref, fc2b_ref, fc3w_ref, fc3b_ref,
                  out_ref, s2_ref, s4_ref):
    # ---- conv1 + bias + ReLU + 2x2 max-pool, fused per 128-lane column half ----
    pooled0 = None
    for half in range(2):
        acc = jnp.dot(a_ref[pl.ds(0, H_ACC1), :], m1_ref[half * K],
                      preferred_element_type=jnp.float32)
        for kh in range(1, K):
            acc = acc + jnp.dot(a_ref[pl.ds(kh, H_ACC1), :], m1_ref[half * K + kh],
                                preferred_element_type=jnp.float32)
        r = jnp.maximum(acc + b1_ref[half], 0.0)                       # (140, 128) f32
        hp = jnp.maximum(r[:H_R1, :], r[1:H_R1 + 1, :])                # H-pool
        if half == 0:
            pooled0 = hp
        else:
            # W-pool = max over the two column halves; store only the pooled result.
            s2_ref[...] = jnp.maximum(pooled0, hp).astype(s2_ref.dtype)

    # ---- conv2 + bias + ReLU + 2x2 max-pool (valid rows live at stride 2) ----
    pooled0 = None
    for half in range(2):
        acc = jnp.dot(s2_ref[pl.ds(0, H_ACC2), :], m2_ref[half * K],
                      preferred_element_type=jnp.float32)
        for kh in range(1, K):
            acc = acc + jnp.dot(s2_ref[pl.ds(2 * kh, H_ACC2), :], m2_ref[half * K + kh],
                                preferred_element_type=jnp.float32)
        r = jnp.maximum(acc + b2_ref[half], 0.0)                       # (131, 128) f32
        hp = jnp.maximum(r[:H_R2, :], r[2:H_R2 + 2, :])                # H-pool (stride 2)
        if half == 0:
            pooled0 = hp
        else:
            s4_ref[...] = jnp.maximum(pooled0, hp)                     # (129, 128) f32

    # ---- banded fc1: 5 strided (BT,128)x(128,128) accumulated matmuls.
    #      Valid pooled rows per sample b, block hp sit at row 36*b + 4*hp; the
    #      torch (C,H,W) flatten order is baked into the fc1 weight row permutation.
    y = jnp.dot(s4_ref[pl.ds(0, BT, stride=RB), :].astype(jnp.bfloat16),
                fc1w_ref[pl.ds(0, LANES), :],
                preferred_element_type=jnp.float32)
    for hp3 in range(1, WP2):
        y = y + jnp.dot(s4_ref[pl.ds(4 * hp3, BT, stride=RB), :].astype(jnp.bfloat16),
                        fc1w_ref[pl.ds(hp3 * LANES, LANES), :],
                        preferred_element_type=jnp.float32)
    y = jnp.maximum(y + fc1b_ref[...], 0.0)                            # (BT, 128)

    # ---- fc2 (ReLU) and fc3 (lane-dense 128-wide store; sliced to 10 outside) ----
    y = jnp.maximum(jnp.dot(y.astype(jnp.bfloat16), fc2w_ref[...],
                            preferred_element_type=jnp.float32) + fc2b_ref[...], 0.0)
    out = jnp.dot(y.astype(jnp.bfloat16), fc3w_ref[...],
                  preferred_element_type=jnp.float32) + fc3b_ref[...]
    out_ref[0] = out


# ----------------------------------------------------------------------------- #
# Jitted forward: layout-only input prep + the pallas_call with a batch-tile grid
# ----------------------------------------------------------------------------- #
def net_forward(x_nchw, prepared):
    (m1, b1, m2, b2, fc1w, fc1b, fc2w, fc2b, fc3w, fc3b) = prepared
    nb = x_nchw.shape[0]
    assert nb % BT == 0, "batch must be a multiple of the batch tile"
    t = nb // BT
    a = _build_rows(x_nchw)                                            # (nb*36, 96) bf16

    def wspec(arr):
        nd = arr.ndim
        return pl.BlockSpec(arr.shape, lambda i, _nd=nd: (0,) * _nd)

    out = pl.pallas_call(
        _lenet_kernel,
        out_shape=jax.ShapeDtypeStruct((t, BT, FCW), jnp.float32),
        grid=(t,),
        in_specs=[
            pl.BlockSpec((G, A_W), lambda i: (i, 0)),          # activation tile (pipelined)
            wspec(m1), wspec(b1), wspec(m2), wspec(b2),        # constant maps -> weights
            wspec(fc1w), wspec(fc1b), wspec(fc2w), wspec(fc2b),  # stay VMEM-resident
            wspec(fc3w), wspec(fc3b),
        ],
        out_specs=pl.BlockSpec((1, BT, FCW), lambda i: (i, 0, 0)),
        scratch_shapes=[
            pltpu.VMEM((H_R1, LANES), jnp.bfloat16),   # pooled conv1 (conv2 operand)
            pltpu.VMEM((H_R2, LANES), jnp.float32),    # pooled conv2 (fc1 operand)
        ],
        compiler_params=pltpu.CompilerParams(
            dimension_semantics=("parallel",),
            vmem_limit_bytes=32 * 1024 * 1024),
    )(a, m1, b1, m2, b2, fc1w, fc1b, fc2w, fc2b, fc3w, fc3b)
    return out.reshape(nb, FCW)[:, :10]


# ----------------------------------------------------------------------------- #
# Pure-JAX reference (for correctness check) and parameter init
# ----------------------------------------------------------------------------- #
def ref_forward(x_nchw, p):
    nb = x_nchw.shape[0]
    x = jnp.transpose(x_nchw, (0, 2, 3, 1))

    def block(y, w, b):
        y = lax.conv_general_dilated(y, w, (1, 1), "VALID",
                                     dimension_numbers=("NHWC", "HWIO", "NHWC"))
        y = jnp.maximum(y + b[None, None, None, :], 0.0)
        return lax.reduce_window(y, -jnp.inf, lax.max, (1, 2, 2, 1), (1, 2, 2, 1), "VALID")

    y = block(x, p["w1"], p["b1"])
    y = block(y, p["w2"], p["b2"])
    y = jnp.transpose(y, (0, 3, 1, 2)).reshape(nb, -1)          # torch flatten order
    y = jnp.maximum(y @ p["fc1_w"] + p["fc1_b"], 0.0)
    y = jnp.maximum(y @ p["fc2_w"] + p["fc2_b"], 0.0)
    return y @ p["fc3_w"] + p["fc3_b"]


def init_params(key):
    ks = jax.random.split(key, 10)

    def w(k, shape, fan_in):
        return (jax.random.normal(k, shape, jnp.float32) / np.sqrt(fan_in)).astype(jnp.float32)

    return {
        "w1": w(ks[0], (5, 5, 3, 6), 5 * 5 * 3),
        "b1": w(ks[1], (6,), 5 * 5 * 3),
        "w2": w(ks[2], (5, 5, 6, 16), 5 * 5 * 6),
        "b2": w(ks[3], (16,), 5 * 5 * 6),
        "fc1_w": w(ks[4], (400, 120), 400),
        "fc1_b": w(ks[5], (120,), 400),
        "fc2_w": w(ks[6], (120, 84), 120),
        "fc2_b": w(ks[7], (84,), 120),
        "fc3_w": w(ks[8], (84, 10), 84),
        "fc3_b": w(ks[9], (10,), 84),
    }


if __name__ == "__main__":
    key = jax.random.PRNGKey(0)
    k_x, k_p = jax.random.split(key)
    NB = 8                                  # 2 batch tiles -> exercises the grid
    # Net's fc1 expects 16*5*5 flattened features => 32x32 spatial NCHW input.
    x = jax.random.normal(k_x, (NB, 3, 32, 32), jnp.float32)
    params = init_params(k_p)

    prepared = prepare_params(params)       # one-time weight plumbing (cached)
    fwd = jax.jit(net_forward)
    out = jax.block_until_ready(fwd(x, prepared))
    assert out.shape == (NB, 10) and out.dtype == jnp.float32

    expected = jax.block_until_ready(ref_forward(x, params))
    # bf16 operands (f32 accumulation) -> loosened tolerance vs the f32 reference.
    np.testing.assert_allclose(np.asarray(out), np.asarray(expected), rtol=5e-2, atol=5e-2)

    print("KERNEL_OK")
</pallas_src>

<mosaic_0001>
module attributes {stable_mosaic.version = 11 : i64} {
  func.func @_lenet_kernel(%arg0: i32, %arg1: memref<144x96xbf16, #tpu.memory_space<vmem>>, %arg2: memref<10x96x128xbf16, #tpu.memory_space<vmem>>, %arg3: memref<2x1x128xf32, #tpu.memory_space<vmem>>, %arg4: memref<10x128x128xbf16, #tpu.memory_space<vmem>>, %arg5: memref<2x1x128xf32, #tpu.memory_space<vmem>>, %arg6: memref<640x128xbf16, #tpu.memory_space<vmem>>, %arg7: memref<1x128xf32, #tpu.memory_space<vmem>>, %arg8: memref<128x128xbf16, #tpu.memory_space<vmem>>, %arg9: memref<1x128xf32, #tpu.memory_space<vmem>>, %arg10: memref<128x128xbf16, #tpu.memory_space<vmem>>, %arg11: memref<1x128xf32, #tpu.memory_space<vmem>>, %arg12: memref<1x4x128xf32, #tpu.memory_space<vmem>>, %arg13: memref<139x128xbf16, #tpu.memory_space<vmem>>, %arg14: memref<129x128xf32, #tpu.memory_space<vmem>>) attributes {dimension_semantics = [#tpu.dimension_semantics<parallel>], iteration_bounds = array<i64: 2>, scalar_prefetch = 0 : i64, scratch_operands = 2 : i64, tpu.core_type = #tpu.core_type<tc>, window_params = [{transform_indices = @transform_0, window_bounds = array<i64: 144, 96>}, {pipeline_mode = #tpu.pipeline_mode<synchronous>, transform_indices = @transform_1, window_bounds = array<i64: 10, 96, 128>}, {pipeline_mode = #tpu.pipeline_mode<synchronous>, transform_indices = @transform_2, window_bounds = array<i64: 2, 1, 128>}, {pipeline_mode = #tpu.pipeline_mode<synchronous>, transform_indices = @transform_3, window_bounds = array<i64: 10, 128, 128>}, {pipeline_mode = #tpu.pipeline_mode<synchronous>, transform_indices = @transform_4, window_bounds = array<i64: 2, 1, 128>}, {pipeline_mode = #tpu.pipeline_mode<synchronous>, transform_indices = @transform_5, window_bounds = array<i64: 640, 128>}, {pipeline_mode = #tpu.pipeline_mode<synchronous>, transform_indices = @transform_6, window_bounds = array<i64: 1, 128>}, {pipeline_mode = #tpu.pipeline_mode<synchronous>, transform_indices = @transform_7, window_bounds = array<i64: 128, 128>}, {pipeline_mode = #tpu.pipeline_mode<synchronous>, transform_indices = @transform_8, window_bounds = array<i64: 1, 128>}, {pipeline_mode = #tpu.pipeline_mode<synchronous>, transform_indices = @transform_9, window_bounds = array<i64: 128, 128>}, {pipeline_mode = #tpu.pipeline_mode<synchronous>, transform_indices = @transform_10, window_bounds = array<i64: 1, 128>}, {transform_indices = @transform_11, window_bounds = array<i64: 1, 4, 128>}]} {
    %c0 = arith.constant 0 : index
    %c0_0 = arith.constant 0 : index
    %0 = vector.load %arg1[%c0, %c0_0] : memref<144x96xbf16, #tpu.memory_space<vmem>>, vector<140x96xbf16>
    %c0_1 = arith.constant 0 : index
    %c0_2 = arith.constant 0 : index
    %c0_3 = arith.constant 0 : index
    %1 = vector.load %arg2[%c0_1, %c0_2, %c0_3] : memref<10x96x128xbf16, #tpu.memory_space<vmem>>, vector<1x96x128xbf16>
    %2 = vector.shape_cast %1 : vector<1x96x128xbf16> to vector<96x128xbf16>
    %cst = arith.constant dense<0.000000e+00> : vector<140x128xf32>
    %3 = tpu.matmul %0, %2, %cst {dimension_numbers = #tpu.dot_dimension_numbers<[1], [0], [0], [1], [0, 0, 1, 1], [], []>} : vector<140x96xbf16>, vector<96x128xbf16>, vector<140x128xf32> -> vector<140x128xf32>
    %c1 = arith.constant 1 : index
    %c0_4 = arith.constant 0 : index
    %4 = vector.load %arg1[%c1, %c0_4] : memref<144x96xbf16, #tpu.memory_space<vmem>>, vector<140x96xbf16>
    %c1_5 = arith.constant 1 : index
    %c0_6 = arith.constant 0 : index
    %c0_7 = arith.constant 0 : index
    %5 = vector.load %arg2[%c1_5, %c0_6, %c0_7] : memref<10x96x128xbf16, #tpu.memory_space<vmem>>, vector<1x96x128xbf16>
    %6 = vector.shape_cast %5 : vector<1x96x128xbf16> to vector<96x128xbf16>
    %cst_8 = arith.constant dense<0.000000e+00> : vector<140x128xf32>
    %7 = tpu.matmul %4, %6, %cst_8 {dimension_numbers = #tpu.dot_dimension_numbers<[1], [0], [0], [1], [0, 0, 1, 1], [], []>} : vector<140x96xbf16>, vector<96x128xbf16>, vector<140x128xf32> -> vector<140x128xf32>
    %8 = arith.addf %3, %7 : vector<140x128xf32>
    %c2 = arith.constant 2 : index
    %c0_9 = arith.constant 0 : index
    %9 = vector.load %arg1[%c2, %c0_9] : memref<144x96xbf16, #tpu.memory_space<vmem>>, vector<140x96xbf16>
    %c2_10 = arith.constant 2 : index
    %c0_11 = arith.constant 0 : index
    %c0_12 = arith.constant 0 : index
    %10 = vector.load %arg2[%c2_10, %c0_11, %c0_12] : memref<10x96x128xbf16, #tpu.memory_space<vmem>>, vector<1x96x128xbf16>
    %11 = vector.shape_cast %10 : vector<1x96x128xbf16> to vector<96x128xbf16>
    %cst_13 = arith.constant dense<0.000000e+00> : vector<140x128xf32>
    %12 = tpu.matmul %9, %11, %cst_13 {dimension_numbers = #tpu.dot_dimension_numbers<[1], [0], [0], [1], [0, 0, 1, 1], [], []>} : vector<140x96xbf16>, vector<96x128xbf16>, vector<140x128xf32> -> vector<140x128xf32>
    %13 = arith.addf %8, %12 : vector<140x128xf32>
    %c3 = arith.constant 3 : index
    %c0_14 = arith.constant 0 : index
    %14 = vector.load %arg1[%c3, %c0_14] : memref<144x96xbf16, #tpu.memory_space<vmem>>, vector<140x96xbf16>
    %c3_15 = arith.constant 3 : index
    %c0_16 = arith.constant 0 : index
    %c0_17 = arith.constant 0 : index
    %15 = vector.load %arg2[%c3_15, %c0_16, %c0_17] : memref<10x96x128xbf16, #tpu.memory_space<vmem>>, vector<1x96x128xbf16>
    %16 = vector.shape_cast %15 : vector<1x96x128xbf16> to vector<96x128xbf16>
    %cst_18 = arith.constant dense<0.000000e+00> : vector<140x128xf32>
    %17 = tpu.matmul %14, %16, %cst_18 {dimension_numbers = #tpu.dot_dimension_numbers<[1], [0], [0], [1], [0, 0, 1, 1], [], []>} : vector<140x96xbf16>, vector<96x128xbf16>, vector<140x128xf32> -> vector<140x128xf32>
    %18 = arith.addf %13, %17 : vector<140x128xf32>
    %c4 = arith.constant 4 : index
    %c0_19 = arith.constant 0 : index
    %19 = vector.load %arg1[%c4, %c0_19] : memref<144x96xbf16, #tpu.memory_space<vmem>>, vector<140x96xbf16>
    %c4_20 = arith.constant 4 : index
    %c0_21 = arith.constant 0 : index
    %c0_22 = arith.constant 0 : index
    %20 = vector.load %arg2[%c4_20, %c0_21, %c0_22] : memref<10x96x128xbf16, #tpu.memory_space<vmem>>, vector<1x96x128xbf16>
    %21 = vector.shape_cast %20 : vector<1x96x128xbf16> to vector<96x128xbf16>
    %cst_23 = arith.constant dense<0.000000e+00> : vector<140x128xf32>
    %22 = tpu.matmul %19, %21, %cst_23 {dimension_numbers = #tpu.dot_dimension_numbers<[1], [0], [0], [1], [0, 0, 1, 1], [], []>} : vector<140x96xbf16>, vector<96x128xbf16>, vector<140x128xf32> -> vector<140x128xf32>
    %23 = arith.addf %18, %22 : vector<140x128xf32>
    %c0_24 = arith.constant 0 : index
    %c0_25 = arith.constant 0 : index
    %c0_26 = arith.constant 0 : index
    %24 = vector.load %arg3[%c0_24, %c0_25, %c0_26] : memref<2x1x128xf32, #tpu.memory_space<vmem>>, vector<1x1x128xf32>
    %25 = vector.shape_cast %24 : vector<1x1x128xf32> to vector<1x128xf32>
    %26 = vector.broadcast %25 : vector<1x128xf32> to vector<140x128xf32>
    %27 = arith.addf %23, %26 : vector<140x128xf32>
    %cst_27 = arith.constant 0.000000e+00 : f32
    %28 = vector.broadcast %cst_27 : f32 to vector<140x128xf32>
    %29 = arith.maximumf %27, %28 : vector<140x128xf32>
    %30 = vector.extract_strided_slice %29 {offsets = [0, 0], sizes = [139, 128], strides = [1, 1]} : vector<140x128xf32> to vector<139x128xf32>
    %31 = vector.extract_strided_slice %29 {offsets = [1, 0], sizes = [139, 128], strides = [1, 1]} : vector<140x128xf32> to vector<139x128xf32>
    %32 = arith.maximumf %30, %31 : vector<139x128xf32>
    %c0_28 = arith.constant 0 : index
    %c0_29 = arith.constant 0 : index
    %33 = vector.load %arg1[%c0_28, %c0_29] : memref<144x96xbf16, #tpu.memory_space<vmem>>, vector<140x96xbf16>
    %c5 = arith.constant 5 : index
    %c0_30 = arith.constant 0 : index
    %c0_31 = arith.constant 0 : index
    %34 = vector.load %arg2[%c5, %c0_30, %c0_31] : memref<10x96x128xbf16, #tpu.memory_space<vmem>>, vector<1x96x128xbf16>
    %35 = vector.shape_cast %34 : vector<1x96x128xbf16> to vector<96x128xbf16>
    %cst_32 = arith.constant dense<0.000000e+00> : vector<140x128xf32>
    %36 = tpu.matmul %33, %35, %cst_32 {dimension_numbers = #tpu.dot_dimension_numbers<[1], [0], [0], [1], [0, 0, 1, 1], [], []>} : vector<140x96xbf16>, vector<96x128xbf16>, vector<140x128xf32> -> vector<140x128xf32>
    %c1_33 = arith.constant 1 : index
    %c0_34 = arith.constant 0 : index
    %37 = vector.load %arg1[%c1_33, %c0_34] : memref<144x96xbf16, #tpu.memory_space<vmem>>, vector<140x96xbf16>
    %c6 = arith.constant 6 : index
    %c0_35 = arith.constant 0 : index
    %c0_36 = arith.constant 0 : index
    %38 = vector.load %arg2[%c6, %c0_35, %c0_36] : memref<10x96x128xbf16, #tpu.memory_space<vmem>>, vector<1x96x128xbf16>
    %39 = vector.shape_cast %38 : vector<1x96x128xbf16> to vector<96x128xbf16>
    %cst_37 = arith.constant dense<0.000000e+00> : vector<140x128xf32>
    %40 = tpu.matmul %37, %39, %cst_37 {dimension_numbers = #tpu.dot_dimension_numbers<[1], [0], [0], [1], [0, 0, 1, 1], [], []>} : vector<140x96xbf16>, vector<96x128xbf16>, vector<140x128xf32> -> vector<140x128xf32>
    %41 = arith.addf %36, %40 : vector<140x128xf32>
    %c2_38 = arith.constant 2 : index
    %c0_39 = arith.constant 0 : index
    %42 = vector.load %arg1[%c2_38, %c0_39] : memref<144x96xbf16, #tpu.memory_space<vmem>>, vector<140x96xbf16>
    %c7 = arith.constant 7 : index
    %c0_40 = arith.constant 0 : index
    %c0_41 = arith.constant 0 : index
    %43 = vector.load %arg2[%c7, %c0_40, %c0_41] : memref<10x96x128xbf16, #tpu.memory_space<vmem>>, vector<1x96x128xbf16>
    %44 = vector.shape_cast %43 : vector<1x96x128xbf16> to vector<96x128xbf16>
    %cst_42 = arith.constant dense<0.000000e+00> : vector<140x128xf32>
    %45 = tpu.matmul %42, %44, %cst_42 {dimension_numbers = #tpu.dot_dimension_numbers<[1], [0], [0], [1], [0, 0, 1, 1], [], []>} : vector<140x96xbf16>, vector<96x128xbf16>, vector<140x128xf32> -> vector<140x128xf32>
    %46 = arith.addf %41, %45 : vector<140x128xf32>
    %c3_43 = arith.constant 3 : index
    %c0_44 = arith.constant 0 : index
    %47 = vector.load %arg1[%c3_43, %c0_44] : memref<144x96xbf16, #tpu.memory_space<vmem>>, vector<140x96xbf16>
    %c8 = arith.constant 8 : index
    %c0_45 = arith.constant 0 : index
    %c0_46 = arith.constant 0 : index
    %48 = vector.load %arg2[%c8, %c0_45, %c0_46] : memref<10x96x128xbf16, #tpu.memory_space<vmem>>, vector<1x96x128xbf16>
    %49 = vector.shape_cast %48 : vector<1x96x128xbf16> to vector<96x128xbf16>
    %cst_47 = arith.constant dense<0.000000e+00> : vector<140x128xf32>
    %50 = tpu.matmul %47, %49, %cst_47 {dimension_numbers = #tpu.dot_dimension_numbers<[1], [0], [0], [1], [0, 0, 1, 1], [], []>} : vector<140x96xbf16>, vector<96x128xbf16>, vector<140x128xf32> -> vector<140x128xf32>
    %51 = arith.addf %46, %50 : vector<140x128xf32>
    %c4_48 = arith.constant 4 : index
    %c0_49 = arith.constant 0 : index
    %52 = vector.load %arg1[%c4_48, %c0_49] : memref<144x96xbf16, #tpu.memory_space<vmem>>, vector<140x96xbf16>
    %c9 = arith.constant 9 : index
    %c0_50 = arith.constant 0 : index
    %c0_51 = arith.constant 0 : index
    %53 = vector.load %arg2[%c9, %c0_50, %c0_51] : memref<10x96x128xbf16, #tpu.memory_space<vmem>>, vector<1x96x128xbf16>
    %54 = vector.shape_cast %53 : vector<1x96x128xbf16> to vector<96x128xbf16>
    %cst_52 = arith.constant dense<0.000000e+00> : vector<140x128xf32>
    %55 = tpu.matmul %52, %54, %cst_52 {dimension_numbers = #tpu.dot_dimension_numbers<[1], [0], [0], [1], [0, 0, 1, 1], [], []>} : vector<140x96xbf16>, vector<96x128xbf16>, vector<140x128xf32> -> vector<140x128xf32>
    %56 = arith.addf %51, %55 : vector<140x128xf32>
    %c1_53 = arith.constant 1 : index
    %c0_54 = arith.constant 0 : index
    %c0_55 = arith.constant 0 : index
    %57 = vector.load %arg3[%c1_53, %c0_54, %c0_55] : memref<2x1x128xf32, #tpu.memory_space<vmem>>, vector<1x1x128xf32>
    %58 = vector.shape_cast %57 : vector<1x1x128xf32> to vector<1x128xf32>
    %59 = vector.broadcast %58 : vector<1x128xf32> to vector<140x128xf32>
    %60 = arith.addf %56, %59 : vector<140x128xf32>
    %cst_56 = arith.constant 0.000000e+00 : f32
    %61 = vector.broadcast %cst_56 : f32 to vector<140x128xf32>
    %62 = arith.maximumf %60, %61 : vector<140x128xf32>
    %63 = vector.extract_strided_slice %62 {offsets = [0, 0], sizes = [139, 128], strides = [1, 1]} : vector<140x128xf32> to vector<139x128xf32>
    %64 = vector.extract_strided_slice %62 {offsets = [1, 0], sizes = [139, 128], strides = [1, 1]} : vector<140x128xf32> to vector<139x128xf32>
    %65 = arith.maximumf %63, %64 : vector<139x128xf32>
    %66 = arith.maximumf %32, %65 : vector<139x128xf32>
    %67 = arith.truncf %66 : vector<139x128xf32> to vector<139x128xbf16>
    %c0_57 = arith.constant 0 : index
    %c0_58 = arith.constant 0 : index
    %68 = vector.load %arg13[%c0_57, %c0_58] : memref<139x128xbf16, #tpu.memory_space<vmem>>, vector<139x128xbf16>
    tpu.vector_store %arg13[%c0_57, %c0_58], %67 {strides = array<i32>} : memref<139x128xbf16, #tpu.memory_space<vmem>>, vector<139x128xbf16>,
    %c0_59 = arith.constant 0 : index
    %c0_60 = arith.constant 0 : index
    %69 = vector.load %arg13[%c0_59, %c0_60] : memref<139x128xbf16, #tpu.memory_space<vmem>>, vector<131x128xbf16>
    %c0_61 = arith.constant 0 : index
    %c0_62 = arith.constant 0 : index
    %c0_63 = arith.constant 0 : index
    %70 = vector.load %arg4[%c0_61, %c0_62, %c0_63] : memref<10x128x128xbf16, #tpu.memory_space<vmem>>, vector<1x128x128xbf16>
    %71 = vector.shape_cast %70 : vector<1x128x128xbf16> to vector<128x128xbf16>
    %cst_64 = arith.constant dense<0.000000e+00> : vector<131x128xf32>
    %72 = tpu.matmul %69, %71, %cst_64 {dimension_numbers = #tpu.dot_dimension_numbers<[1], [0], [0], [1], [0, 0, 1, 1], [], []>} : vector<131x128xbf16>, vector<128x128xbf16>, vector<131x128xf32> -> vector<131x128xf32>
    %c2_65 = arith.constant 2 : index
    %c0_66 = arith.constant 0 : index
    %73 = vector.load %arg13[%c2_65, %c0_66] : memref<139x128xbf16, #tpu.memory_space<vmem>>, vector<131x128xbf16>
    %c1_67 = arith.constant 1 : index
    %c0_68 = arith.constant 0 : index
    %c0_69 = arith.constant 0 : index
    %74 = vector.load %arg4[%c1_67, %c0_68, %c0_69] : memref<10x128x128xbf16, #tpu.memory_space<vmem>>, vector<1x128x128xbf16>
    %75 = vector.shape_cast %74 : vector<1x128x128xbf16> to vector<128x128xbf16>
    %cst_70 = arith.constant dense<0.000000e+00> : vector<131x128xf32>
    %76 = tpu.matmul %73, %75, %cst_70 {dimension_numbers = #tpu.dot_dimension_numbers<[1], [0], [0], [1], [0, 0, 1, 1], [], []>} : vector<131x128xbf16>, vector<128x128xbf16>, vector<131x128xf32> -> vector<131x128xf32>
    %77 = arith.addf %72, %76 : vector<131x128xf32>
    %c4_71 = arith.constant 4 : index
    %c0_72 = arith.constant 0 : index
    %78 = vector.load %arg13[%c4_71, %c0_72] : memref<139x128xbf16, #tpu.memory_space<vmem>>, vector<131x128xbf16>
    %c2_73 = arith.constant 2 : index
    %c0_74 = arith.constant 0 : index
    %c0_75 = arith.constant 0 : index
    %79 = vector.load %arg4[%c2_73, %c0_74, %c0_75] : memref<10x128x128xbf16, #tpu.memory_space<vmem>>, vector<1x128x128xbf16>
    %80 = vector.shape_cast %79 : vector<1x128x128xbf16> to vector<128x128xbf16>
    %cst_76 = arith.constant dense<0.000000e+00> : vector<131x128xf32>
    %81 = tpu.matmul %78, %80, %cst_76 {dimension_numbers = #tpu.dot_dimension_numbers<[1], [0], [0], [1], [0, 0, 1, 1], [], []>} : vector<131x128xbf16>, vector<128x128xbf16>, vector<131x128xf32> -> vector<131x128xf32>
    %82 = arith.addf %77, %81 : vector<131x128xf32>
    %c6_77 = arith.constant 6 : index
    %c0_78 = arith.constant 0 : index
    %83 = vector.load %arg13[%c6_77, %c0_78] : memref<139x128xbf16, #tpu.memory_space<vmem>>, vector<131x128xbf16>
    %c3_79 = arith.constant 3 : index
    %c0_80 = arith.constant 0 : index
    %c0_81 = arith.constant 0 : index
    %84 = vector.load %arg4[%c3_79, %c0_80, %c0_81] : memref<10x128x128xbf16, #tpu.memory_space<vmem>>, vector<1x128x128xbf16>
    %85 = vector.shape_cast %84 : vector<1x128x128xbf16> to vector<128x128xbf16>
    %cst_82 = arith.constant dense<0.000000e+00> : vector<131x128xf32>
    %86 = tpu.matmul %83, %85, %cst_82 {dimension_numbers = #tpu.dot_dimension_numbers<[1], [0], [0], [1], [0, 0, 1, 1], [], []>} : vector<131x128xbf16>, vector<128x128xbf16>, vector<131x128xf32> -> vector<131x128xf32>
    %87 = arith.addf %82, %86 : vector<131x128xf32>
    %c8_83 = arith.constant 8 : index
    %c0_84 = arith.constant 0 : index
    %88 = vector.load %arg13[%c8_83, %c0_84] : memref<139x128xbf16, #tpu.memory_space<vmem>>, vector<131x128xbf16>
    %c4_85 = arith.constant 4 : index
    %c0_86 = arith.constant 0 : index
    %c0_87 = arith.constant 0 : index
    %89 = vector.load %arg4[%c4_85, %c0_86, %c0_87] : memref<10x128x128xbf16, #tpu.memory_space<vmem>>, vector<1x128x128xbf16>
    %90 = vector.shape_cast %89 : vector<1x128x128xbf16> to vector<128x128xbf16>
    %cst_88 = arith.constant dense<0.000000e+00> : vector<131x128xf32>
    %91 = tpu.matmul %88, %90, %cst_88 {dimension_numbers = #tpu.dot_dimension_numbers<[1], [0], [0], [1], [0, 0, 1, 1], [], []>} : vector<131x128xbf16>, vector<128x128xbf16>, vector<131x128xf32> -> vector<131x128xf32>
    %92 = arith.addf %87, %91 : vector<131x128xf32>
    %c0_89 = arith.constant 0 : index
    %c0_90 = arith.constant 0 : index
    %c0_91 = arith.constant 0 : index
    %93 = vector.load %arg5[%c0_89, %c0_90, %c0_91] : memref<2x1x128xf32, #tpu.memory_space<vmem>>, vector<1x1x128xf32>
    %94 = vector.shape_cast %93 : vector<1x1x128xf32> to vector<1x128xf32>
    %95 = vector.broadcast %94 : vector<1x128xf32> to vector<131x128xf32>
    %96 = arith.addf %92, %95 : vector<131x128xf32>
    %cst_92 = arith.constant 0.000000e+00 : f32
    %97 = vector.broadcast %cst_92 : f32 to vector<131x128xf32>
    %98 = arith.maximumf %96, %97 : vector<131x128xf32>
    %99 = vector.extract_strided_slice %98 {offsets = [0, 0], sizes = [129, 128], strides = [1, 1]} : vector<131x128xf32> to vector<129x128xf32>
    %100 = vector.extract_strided_slice %98 {offsets = [2, 0], sizes = [129, 128], strides = [1, 1]} : vector<131x128xf32> to vector<129x128xf32>
    %101 = arith.maximumf %99, %100 : vector<129x128xf32>
    %c0_93 = arith.constant 0 : index
    %c0_94 = arith.constant 0 : index
    %102 = vector.load %arg13[%c0_93, %c0_94] : memref<139x128xbf16, #tpu.memory_space<vmem>>, vector<131x128xbf16>
    %c5_95 = arith.constant 5 : index
    %c0_96 = arith.constant 0 : index
    %c0_97 = arith.constant 0 : index
    %103 = vector.load %arg4[%c5_95, %c0_96, %c0_97] : memref<10x128x128xbf16, #tpu.memory_space<vmem>>, vector<1x128x128xbf16>
    %104 = vector.shape_cast %103 : vector<1x128x128xbf16> to vector<128x128xbf16>
    %cst_98 = arith.constant dense<0.000000e+00> : vector<131x128xf32>
    %105 = tpu.matmul %102, %104, %cst_98 {dimension_numbers = #tpu.dot_dimension_numbers<[1], [0], [0], [1], [0, 0, 1, 1], [], []>} : vector<131x128xbf16>, vector<128x128xbf16>, vector<131x128xf32> -> vector<131x128xf32>
    %c2_99 = arith.constant 2 : index
    %c0_100 = arith.constant 0 : index
    %106 = vector.load %arg13[%c2_99, %c0_100] : memref<139x128xbf16, #tpu.memory_space<vmem>>, vector<131x128xbf16>
    %c6_101 = arith.constant 6 : index
    %c0_102 = arith.constant 0 : index
    %c0_103 = arith.constant 0 : index
    %107 = vector.load %arg4[%c6_101, %c0_102, %c0_103] : memref<10x128x128xbf16, #tpu.memory_space<vmem>>, vector<1x128x128xbf16>
    %108 = vector.shape_cast %107 : vector<1x128x128xbf16> to vector<128x128xbf16>
    %cst_104 = arith.constant dense<0.000000e+00> : vector<131x128xf32>
    %109 = tpu.matmul %106, %108, %cst_104 {dimension_numbers = #tpu.dot_dimension_numbers<[1], [0], [0], [1], [0, 0, 1, 1], [], []>} : vector<131x128xbf16>, vector<128x128xbf16>, vector<131x128xf32> -> vector<131x128xf32>
    %110 = arith.addf %105, %109 : vector<131x128xf32>
    %c4_105 = arith.constant 4 : index
    %c0_106 = arith.constant 0 : index
    %111 = vector.load %arg13[%c4_105, %c0_106] : memref<139x128xbf16, #tpu.memory_space<vmem>>, vector<131x128xbf16>
    %c7_107 = arith.constant 7 : index
    %c0_108 = arith.constant 0 : index
    %c0_109 = arith.constant 0 : index
    %112 = vector.load %arg4[%c7_107, %c0_108, %c0_109] : memref<10x128x128xbf16, #tpu.memory_space<vmem>>, vector<1x128x128xbf16>
    %113 = vector.shape_cast %112 : vector<1x128x128xbf16> to vector<128x128xbf16>
    %cst_110 = arith.constant dense<0.000000e+00> : vector<131x128xf32>
    %114 = tpu.matmul %111, %113, %cst_110 {dimension_numbers = #tpu.dot_dimension_numbers<[1], [0], [0], [1], [0, 0, 1, 1], [], []>} : vector<131x128xbf16>, vector<128x128xbf16>, vector<131x128xf32> -> vector<131x128xf32>
    %115 = arith.addf %110, %114 : vector<131x128xf32>
    %c6_111 = arith.constant 6 : index
    %c0_112 = arith.constant 0 : index
    %116 = vector.load %arg13[%c6_111, %c0_112] : memref<139x128xbf16, #tpu.memory_space<vmem>>, vector<131x128xbf16>
    %c8_113 = arith.constant 8 : index
    %c0_114 = arith.constant 0 : index
    %c0_115 = arith.constant 0 : index
    %117 = vector.load %arg4[%c8_113, %c0_114, %c0_115] : memref<10x128x128xbf16, #tpu.memory_space<vmem>>, vector<1x128x128xbf16>
    %118 = vector.shape_cast %117 : vector<1x128x128xbf16> to vector<128x128xbf16>
    %cst_116 = arith.constant dense<0.000000e+00> : vector<131x128xf32>
    %119 = tpu.matmul %116, %118, %cst_116 {dimension_numbers = #tpu.dot_dimension_numbers<[1], [0], [0], [1], [0, 0, 1, 1], [], []>} : vector<131x128xbf16>, vector<128x128xbf16>, vector<131x128xf32> -> vector<131x128xf32>
    %120 = arith.addf %115, %119 : vector<131x128xf32>
    %c8_117 = arith.constant 8 : index
    %c0_118 = arith.constant 0 : index
    %121 = vector.load %arg13[%c8_117, %c0_118] : memref<139x128xbf16, #tpu.memory_space<vmem>>, vector<131x128xbf16>
    %c9_119 = arith.constant 9 : index
    %c0_120 = arith.constant 0 : index
    %c0_121 = arith.constant 0 : index
    %122 = vector.load %arg4[%c9_119, %c0_120, %c0_121] : memref<10x128x128xbf16, #tpu.memory_space<vmem>>, vector<1x128x128xbf16>
    %123 = vector.shape_cast %122 : vector<1x128x128xbf16> to vector<128x128xbf16>
    %cst_122 = arith.constant dense<0.000000e+00> : vector<131x128xf32>
    %124 = tpu.matmul %121, %123, %cst_122 {dimension_numbers = #tpu.dot_dimension_numbers<[1], [0], [0], [1], [0, 0, 1, 1], [], []>} : vector<131x128xbf16>, vector<128x128xbf16>, vector<131x128xf32> -> vector<131x128xf32>
    %125 = arith.addf %120, %124 : vector<131x128xf32>
    %c1_123 = arith.constant 1 : index
    %c0_124 = arith.constant 0 : index
    %c0_125 = arith.constant 0 : index
    %126 = vector.load %arg5[%c1_123, %c0_124, %c0_125] : memref<2x1x128xf32, #tpu.memory_space<vmem>>, vector<1x1x128xf32>
    %127 = vector.shape_cast %126 : vector<1x1x128xf32> to vector<1x128xf32>
    %128 = vector.broadcast %127 : vector<1x128xf32> to vector<131x128xf32>
    %129 = arith.addf %125, %128 : vector<131x128xf32>
    %cst_126 = arith.constant 0.000000e+00 : f32
    %130 = vector.broadcast %cst_126 : f32 to vector<131x128xf32>
    %131 = arith.maximumf %129, %130 : vector<131x128xf32>
    %132 = vector.extract_strided_slice %131 {offsets = [0, 0], sizes = [129, 128], strides = [1, 1]} : vector<131x128xf32> to vector<129x128xf32>
    %133 = vector.extract_strided_slice %131 {offsets = [2, 0], sizes = [129, 128], strides = [1, 1]} : vector<131x128xf32> to vector<129x128xf32>
    %134 = arith.maximumf %132, %133 : vector<129x128xf32>
    %135 = arith.maximumf %101, %134 : vector<129x128xf32>
    %c0_127 = arith.constant 0 : index
    %c0_128 = arith.constant 0 : index
    %136 = vector.load %arg14[%c0_127, %c0_128] : memref<129x128xf32, #tpu.memory_space<vmem>>, vector<129x128xf32>
    tpu.vector_store %arg14[%c0_127, %c0_128], %135 {strides = array<i32>} : memref<129x128xf32, #tpu.memory_space<vmem>>, vector<129x128xf32>,
    %c0_129 = arith.constant 0 : index
    %c0_130 = arith.constant 0 : index
    %137 = tpu.strided_load %arg14[%c0_129, %c0_130] {strides = array<i32: 36, 1>} : memref<129x128xf32, #tpu.memory_space<vmem>>, vector<4x128xf32>
    %138 = arith.truncf %137 : vector<4x128xf32> to vector<4x128xbf16>
    %c0_131 = arith.constant 0 : index
    %c0_132 = arith.constant 0 : index
    %139 = vector.load %arg6[%c0_131, %c0_132] : memref<640x128xbf16, #tpu.memory_space<vmem>>, vector<128x128xbf16>
    %cst_133 = arith.constant dense<0.000000e+00> : vector<4x128xf32>
    %140 = tpu.matmul %138, %139, %cst_133 {dimension_numbers = #tpu.dot_dimension_numbers<[1], [0], [0], [1], [0, 0, 1, 1], [], []>} : vector<4x128xbf16>, vector<128x128xbf16>, vector<4x128xf32> -> vector<4x128xf32>
    %c4_134 = arith.constant 4 : index
    %c0_135 = arith.constant 0 : index
    %141 = tpu.strided_load %arg14[%c4_134, %c0_135] {strides = array<i32: 36, 1>} : memref<129x128xf32, #tpu.memory_space<vmem>>, vector<4x128xf32>
    %142 = arith.truncf %141 : vector<4x128xf32> to vector<4x128xbf16>
    %c128 = arith.constant 128 : index
    %c0_136 = arith.constant 0 : index
    %143 = vector.load %arg6[%c128, %c0_136] : memref<640x128xbf16, #tpu.memory_space<vmem>>, vector<128x128xbf16>
    %cst_137 = arith.constant dense<0.000000e+00> : vector<4x128xf32>
    %144 = tpu.matmul %142, %143, %cst_137 {dimension_numbers = #tpu.dot_dimension_numbers<[1], [0], [0], [1], [0, 0, 1, 1], [], []>} : vector<4x128xbf16>, vector<128x128xbf16>, vector<4x128xf32> -> vector<4x128xf32>
    %145 = arith.addf %140, %144 : vector<4x128xf32>
    %c8_138 = arith.constant 8 : index
    %c0_139 = arith.constant 0 : index
    %146 = tpu.strided_load %arg14[%c8_138, %c0_139] {strides = array<i32: 36, 1>} : memref<129x128xf32, #tpu.memory_space<vmem>>, vector<4x128xf32>
    %147 = arith.truncf %146 : vector<4x128xf32> to vector<4x128xbf16>
    %c256 = arith.constant 256 : index
    %c0_140 = arith.constant 0 : index
    %148 = vector.load %arg6[%c256, %c0_140] : memref<640x128xbf16, #tpu.memory_space<vmem>>, vector<128x128xbf16>
    %cst_141 = arith.constant dense<0.000000e+00> : vector<4x128xf32>
    %149 = tpu.matmul %147, %148, %cst_141 {dimension_numbers = #tpu.dot_dimension_numbers<[1], [0], [0], [1], [0, 0, 1, 1], [], []>} : vector<4x128xbf16>, vector<128x128xbf16>, vector<4x128xf32> -> vector<4x128xf32>
    %150 = arith.addf %145, %149 : vector<4x128xf32>
    %c12 = arith.constant 12 : index
    %c0_142 = arith.constant 0 : index
    %151 = tpu.strided_load %arg14[%c12, %c0_142] {strides = array<i32: 36, 1>} : memref<129x128xf32, #tpu.memory_space<vmem>>, vector<4x128xf32>
    %152 = arith.truncf %151 : vector<4x128xf32> to vector<4x128xbf16>
    %c384 = arith.constant 384 : index
    %c0_143 = arith.constant 0 : index
    %153 = vector.load %arg6[%c384, %c0_143] : memref<640x128xbf16, #tpu.memory_space<vmem>>, vector<128x128xbf16>
    %cst_144 = arith.constant dense<0.000000e+00> : vector<4x128xf32>
    %154 = tpu.matmul %152, %153, %cst_144 {dimension_numbers = #tpu.dot_dimension_numbers<[1], [0], [0], [1], [0, 0, 1, 1], [], []>} : vector<4x128xbf16>, vector<128x128xbf16>, vector<4x128xf32> -> vector<4x128xf32>
    %155 = arith.addf %150, %154 : vector<4x128xf32>
    %c16 = arith.constant 16 : index
    %c0_145 = arith.constant 0 : index
    %156 = tpu.strided_load %arg14[%c16, %c0_145] {strides = array<i32: 36, 1>} : memref<129x128xf32, #tpu.memory_space<vmem>>, vector<4x128xf32>
    %157 = arith.truncf %156 : vector<4x128xf32> to vector<4x128xbf16>
    %c512 = arith.constant 512 : index
    %c0_146 = arith.constant 0 : index
    %158 = vector.load %arg6[%c512, %c0_146] : memref<640x128xbf16, #tpu.memory_space<vmem>>, vector<128x128xbf16>
    %cst_147 = arith.constant dense<0.000000e+00> : vector<4x128xf32>
    %159 = tpu.matmul %157, %158, %cst_147 {dimension_numbers = #tpu.dot_dimension_numbers<[1], [0], [0], [1], [0, 0, 1, 1], [], []>} : vector<4x128xbf16>, vector<128x128xbf16>, vector<4x128xf32> -> vector<4x128xf32>
    %160 = arith.addf %155, %159 : vector<4x128xf32>
    %c0_148 = arith.constant 0 : index
    %c0_149 = arith.constant 0 : index
    %161 = vector.load %arg7[%c0_148, %c0_149] : memref<1x128xf32, #tpu.memory_space<vmem>>, vector<1x128xf32>
    %162 = vector.broadcast %161 : vector<1x128xf32> to vector<4x128xf32>
    %163 = arith.addf %160, %162 : vector<4x128xf32>
    %cst_150 = arith.constant 0.000000e+00 : f32
    %164 = vector.broadcast %cst_150 : f32 to vector<4x128xf32>
    %165 = arith.maximumf %163, %164 : vector<4x128xf32>
    %166 = arith.truncf %165 : vector<4x128xf32> to vector<4x128xbf16>
    %c0_151 = arith.constant 0 : index
    %c0_152 = arith.constant 0 : index
    %167 = vector.load %arg8[%c0_151, %c0_152] : memref<128x128xbf16, #tpu.memory_space<vmem>>, vector<128x128xbf16>
    %cst_153 = arith.constant dense<0.000000e+00> : vector<4x128xf32>
    %168 = tpu.matmul %166, %167, %cst_153 {dimension_numbers = #tpu.dot_dimension_numbers<[1], [0], [0], [1], [0, 0, 1, 1], [], []>} : vector<4x128xbf16>, vector<128x128xbf16>, vector<4x128xf32> -> vector<4x128xf32>
    %c0_154 = arith.constant 0 : index
    %c0_155 = arith.constant 0 : index
    %169 = vector.load %arg9[%c0_154, %c0_155] : memref<1x128xf32, #tpu.memory_space<vmem>>, vector<1x128xf32>
    %170 = vector.broadcast %169 : vector<1x128xf32> to vector<4x128xf32>
    %171 = arith.addf %168, %170 : vector<4x128xf32>
    %cst_156 = arith.constant 0.000000e+00 : f32
    %172 = vector.broadcast %cst_156 : f32 to vector<4x128xf32>
    %173 = arith.maximumf %171, %172 : vector<4x128xf32>
    %174 = arith.truncf %173 : vector<4x128xf32> to vector<4x128xbf16>
    %c0_157 = arith.constant 0 : index
    %c0_158 = arith.constant 0 : index
    %175 = vector.load %arg10[%c0_157, %c0_158] : memref<128x128xbf16, #tpu.memory_space<vmem>>, vector<128x128xbf16>
    %cst_159 = arith.constant dense<0.000000e+00> : vector<4x128xf32>
    %176 = tpu.matmul %174, %175, %cst_159 {dimension_numbers = #tpu.dot_dimension_numbers<[1], [0], [0], [1], [0, 0, 1, 1], [], []>} : vector<4x128xbf16>, vector<128x128xbf16>, vector<4x128xf32> -> vector<4x128xf32>
    %c0_160 = arith.constant 0 : index
    %c0_161 = arith.constant 0 : index
    %177 = vector.load %arg11[%c0_160, %c0_161] : memref<1x128xf32, #tpu.memory_space<vmem>>, vector<1x128xf32>
    %178 = vector.broadcast %177 : vector<1x128xf32> to vector<4x128xf32>
    %179 = arith.addf %176, %178 : vector<4x128xf32>
    %c0_162 = arith.constant 0 : index
    %c0_163 = arith.constant 0 : index
    %c0_164 = arith.constant 0 : index
    %180 = vector.load %arg12[%c0_162, %c0_163, %c0_164] : memref<1x4x128xf32, #tpu.memory_space<vmem>>, vector<1x4x128xf32>
    %181 = vector.shape_cast %180 : vector<1x4x128xf32> to vector<4x128xf32>
    %182 = vector.shape_cast %179 : vector<4x128xf32> to vector<1x4x128xf32>
    tpu.vector_store %arg12[%c0_162, %c0_163, %c0_164], %182 {strides = array<i32>} : memref<1x4x128xf32, #tpu.memory_space<vmem>>, vector<1x4x128xf32>,
    return
  }
  func.func @transform_0(%arg0: i32) -> (i32, i32) {
    %c0_i32 = arith.constant 0 : i32
    %c0_i32_0 = arith.constant 0 : i32
    return %arg0, %c0_i32 : i32, i32
  }
  func.func @transform_1(%arg0: i32) -> (i32, i32, i32) {
    %c0_i32 = arith.constant 0 : i32
    %c0_i32_0 = arith.constant 0 : i32
    %c0_i32_1 = arith.constant 0 : i32
    %c0_i32_2 = arith.constant 0 : i32
    return %c0_i32, %c0_i32_0, %c0_i32_1 : i32, i32, i32
  }
  func.func @transform_2(%arg0: i32) -> (i32, i32, i32) {
    %c0_i32 = arith.constant 0 : i32
    %c0_i32_0 = arith.constant 0 : i32
    %c0_i32_1 = arith.constant 0 : i32
    %c0_i32_2 = arith.constant 0 : i32
    return %c0_i32, %c0_i32_0, %c0_i32_1 : i32, i32, i32
  }
  func.func @transform_3(%arg0: i32) -> (i32, i32, i32) {
    %c0_i32 = arith.constant 0 : i32
    %c0_i32_0 = arith.constant 0 : i32
    %c0_i32_1 = arith.constant 0 : i32
    %c0_i32_2 = arith.constant 0 : i32
    return %c0_i32, %c0_i32_0, %c0_i32_1 : i32, i32, i32
  }
  func.func @transform_4(%arg0: i32) -> (i32, i32, i32) {
    %c0_i32 = arith.constant 0 : i32
    %c0_i32_0 = arith.constant 0 : i32
    %c0_i32_1 = arith.constant 0 : i32
    %c0_i32_2 = arith.constant 0 : i32
    return %c0_i32, %c0_i32_0, %c0_i32_1 : i32, i32, i32
  }
  func.func @transform_5(%arg0: i32) -> (i32, i32) {
    %c0_i32 = arith.constant 0 : i32
    %c0_i32_0 = arith.constant 0 : i32
    %c0_i32_1 = arith.constant 0 : i32
    return %c0_i32, %c0_i32_0 : i32, i32
  }
  func.func @transform_6(%arg0: i32) -> (i32, i32) {
    %c0_i32 = arith.constant 0 : i32
    %c0_i32_0 = arith.constant 0 : i32
    %c0_i32_1 = arith.constant 0 : i32
    return %c0_i32, %c0_i32_0 : i32, i32
  }
  func.func @transform_7(%arg0: i32) -> (i32, i32) {
    %c0_i32 = arith.constant 0 : i32
    %c0_i32_0 = arith.constant 0 : i32
    %c0_i32_1 = arith.constant 0 : i32
    return %c0_i32, %c0_i32_0 : i32, i32
  }
  func.func @transform_8(%arg0: i32) -> (i32, i32) {
    %c0_i32 = arith.constant 0 : i32
    %c0_i32_0 = arith.constant 0 : i32
    %c0_i32_1 = arith.constant 0 : i32
    return %c0_i32, %c0_i32_0 : i32, i32
  }
  func.func @transform_9(%arg0: i32) -> (i32, i32) {
    %c0_i32 = arith.constant 0 : i32
    %c0_i32_0 = arith.constant 0 : i32
    %c0_i32_1 = arith.constant 0 : i32
    return %c0_i32, %c0_i32_0 : i32, i32
  }
  func.func @transform_10(%arg0: i32) -> (i32, i32) {
    %c0_i32 = arith.constant 0 : i32
    %c0_i32_0 = arith.constant 0 : i32
    %c0_i32_1 = arith.constant 0 : i32
    return %c0_i32, %c0_i32_0 : i32, i32
  }
  func.func @transform_11(%arg0: i32) -> (i32, i32, i32) {
    %c0_i32 = arith.constant 0 : i32
    %c0_i32_0 = arith.constant 0 : i32
    %c0_i32_1 = arith.constant 0 : i32
    return %arg0, %c0_i32, %c0_i32_0 : i32, i32, i32
  }
}

</mosaic_0001>

<bundles_post_ra>
// kernel: net_forward.1
= control target key start
LH: loop header
LB: loop body
LE: loop exit
PB: predicated region body
PF: predicated region fallthrough
CT: control target
= control target key end

     0   :  { %16 = vsyncpa [#allocation5], 0  ;;  %s11230_s0 = inlined_call_operand.vmem [shape: bf16[288,96], index: 0, kind: input, shape index: {}]   ;;  %s11231_s1 = inlined_call_operand.vmem [shape: bf16[10,96,128], index: 1, kind: input, shape index: {}]   ;;  %s11232_s2 = inlined_call_operand.vmem [shape: f32[2,1,128], index: 2, kind: input, shape index: {}]   ;;  %s11233_s3 = inlined_call_operand.vmem [shape: bf16[10,128,128], index: 3, kind: input, shape index: {}]   ;;  %s11234_s4 = inlined_call_operand.vmem [shape: f32[2,1,128], index: 4, kind: input, shape index: {}]   ;;  %s11235_s5 = inlined_call_operand.vmem [shape: bf16[640,128], index: 5, kind: input, shape index: {}]   ;;  %s11236_s6 = inlined_call_operand.vmem [shape: f32[1,128], index: 6, kind: input, shape index: {}]   ;;  %s11237_s7 = inlined_call_operand.vmem [shape: bf16[128,128], index: 7, kind: input, shape index: {}]   ;;  %s11238_s8 = inlined_call_operand.vmem [shape: f32[1,128], index: 8, kind: input, shape index: {}]   ;;  %s11239_s9 = inlined_call_operand.vmem [shape: bf16[128,128], index: 9, kind: input, shape index: {}]   ;;  %s11240_s10 = inlined_call_operand.vmem [shape: f32[1,128], index: 10, kind: input, shape index: {}]   ;;  %s11241_s11 = inlined_call_operand.hbm [shape: f32[2,4,128], index: 11, kind: output, shape index: {}]  }
   0x1   :  { %18 = vsyncpa [#allocation5 + $0x1], 0  ;;  %s8568_s17 = smov 0   ;;  %s8570_s18 = smov 0  }
   0x2   :  { %s8572_s19 = smov 0   ;;  %s8574_s20 = smov 0  }
   0x3 LB: > { %s8589_s21 = sadd.s32 4294967295, %s8503_s20   ;;  %s5945_s22 = sadd.s32 4294967294, %s8503_s20   ;;  %s8503_s20 = sphi %s8574_s20, %s11247_s20   ;;  %s8499_s19 = sphi %s8572_s19, %s11246_s19   ;;  %s8495_s18 = sphi %s8570_s18, %s11245_s18   ;;  %s8491_s17 = sphi %s8568_s17, %s11244_s17  }
   0x4   : > { %s8593_s23 = sadd.s32 1, %s8503_s20   ;;  %s267_s24 = sadd.s32 1, %s8499_s19 }
   0x5   : > { %s264_s25 = ssub.s32 %s8503_s20, %s8593_s23  ;;  %p277_p0 = scmp.ne.s32.totalorder %s8499_s19, %s8495_s18 }
   0x6   : > { %p265_p1 = scmp.eq.s32.totalorder %s264_s25, 0  ;;  %p278_p2 = scmp.eq.s32.totalorder %s8589_s21, 1 }
   0x7   : > { %p283_p3 = scmp.ne.s32.totalorder %s8495_s18, %s8491_s17  ;;  %p284_p4 = scmp.eq.s32.totalorder %s5945_s22, 1 }
   0x8   : > { %s8604_s26 = scalar_select %p265_p1, %s8499_s19, %s267_s24  }
   0x9   : > { %p8606_p5 = por %p278_p2, %p277_p0  ;;  %p8610_p6 = por %p284_p4, %p283_p3 }
   0xa   : > { %p5948_p7 = scmp.ge.s32.totalorder %s8503_s20, 1  ;;  %p341_p8 = scmp.lt.s32.totalorder %s8503_s20, 3 }
   0xc   : > { %p342_p9 = pnand %p5948_p7, %p341_p8 }
   0xd   : > { %v8193_v0 = vld [vmem:[%s11231_s1 + $0x30] sm:$0xff] (!%p342_p9)   ;;  %v8505_v1 = vmov (!%p342_p9), 0.0   ;;  %v8194_v2 = vld [vmem:[%s11231_s1] sm:$0xff] (!%p342_p9)   ;;  %v8195_v3 = vld [vmem:[%s11231_s1 + $0x38] sm:$0xff] (!%p342_p9)   ;;  %vm8506_vm0 = vmmov (!%p342_p9), 0   ;;  %s381_s16 = smul.u32 (!%p342_p9), 18, %s8589_s21 }
   0xe   : > { %345 = sbr.rel (%p342_p9) target bundleno = 1895 (0x767), region = 64  ;;  %7012 = vmatprep.subr.bf16.mxu0 (!%p342_p9), %v8505_v1  ;;  %7060 = vmatprep.subr.bf16.mxu1 (!%p342_p9), %v8505_v1  ;;  %v8196_v4 = vld [vmem:[%s11231_s1 + $0x8] sm:$0xff] (!%p342_p9)   ;;  %v8197_v5 = vld [vmem:[%s11231_s1 + $0x40] sm:$0xff] (!%p342_p9)   ;;  %v8198_v6 = vld [vmem:[%s11231_s1 + $0x10] sm:$0xff] (!%p342_p9)   ;;  %vm477_vm1 = vsmask.f32 (!%p342_p9), 7424 }
   0xf   : > { %7013 = vmatpush3.bf16.msra.mxu0 (!%p342_p9), %v8193_v0  ;;  %7024 = vmatprep.mubr.msk.bf16.mxu0 (!%p342_p9), %vm8506_vm0, %v8505_v1  ;;  %p382_p10 = scmp.lt.s32.totalorder (!%p342_p9), %s381_s16, 35  ;;  %v8199_v7 = vld [vmem:[%s11231_s1 + $0x48] sm:$0xff] (!%p342_p9)   ;;  %v8200_v8 = vld [vmem:[%s11231_s1 + $0x18] sm:$0xff] (!%p342_p9)   ;;  %v8201_v11 = vld [vmem:[%s11231_s1 + $0x50] sm:$0xff] (!%p342_p9)   ;;  %vm585_vm2 = vcmask (!%p342_p9), 785408   ;;  %vm898_vm4 = vcmask (!%p342_p9), 1046528  }
  0x10   : > { %7061 = vmatpush3.bf16.msra.mxu1 (!%p342_p9), %v8194_v2  ;;  %7014 = vmatprep.subr.bf16.mxu0 (!%p342_p9), %v8505_v1  ;;  %v8202_v14 = vld [vmem:[%s11231_s1 + $0x20] sm:$0xff] (!%p342_p9)   ;;  %v8203_v18 = vld [vmem:[%s11231_s1 + $0x58] sm:$0xff] (!%p342_p9)   ;;  %v8204_v20 = vld [vmem:[%s11231_s1 + $0x28] sm:$0xff] (!%p342_p9)   ;;  %vm1119_vm3 = vsmask.f32 (!%p342_p9), 6400  ;;  %vm1368_vm5 = vcmask (!%p342_p9), 1045504  }
  0x11   : > { %7062 = vmatprep.subr.bf16.mxu1 (!%p342_p9), %v8505_v1  ;;  %7072 = vmatprep.mubr.msk.bf16.mxu1 (!%p342_p9), %vm8506_vm0, %v8505_v1  ;;  %v8207_v29 = vld [vmem:[%s11231_s1 + $0x60] sm:$0xff] (!%p342_p9)   ;;  %v8208_v31 = vld [vmem:[%s11231_s1 + $0x90] sm:$0xff] (!%p342_p9)   ;;  %v8210_v35 = vld [vmem:[%s11231_s1 + $0x68] sm:$0xff] (!%p342_p9)   ;;  %vm2769_vm6 = vcmask (!%p342_p9), 1041408   ;;  %vm2770_vm7 = vsmask.f32 (!%p342_p9), 1280 }
  0x12   : > { %v8211_v36 = vld [vmem:[%s11231_s1 + $0x98] sm:$0xff] (!%p342_p9)   ;;  %v8214_v41 = vld [vmem:[%s11231_s1 + $0x70] sm:$0xff] (!%p342_p9)   ;;  %v8215_v43 = vld [vmem:[%s11231_s1 + $0xa0] sm:$0xff] (!%p342_p9)   ;;  %vm3515_vm9 = vcmask (!%p342_p9), 1044480   ;;  %s378_s25 = sand.u32 (!%p342_p9), 1, %s8495_s18  }
  0x13   : > { %7015 = vmatpush3.bf16.msra.mxu0 (!%p342_p9), %v8195_v3  ;;  %v8217_v51 = vld [vmem:[%s11231_s1 + $0x78] sm:$0xff] (!%p342_p9)   ;;  %v8218_v55 = vld [vmem:[%s11231_s1 + $0xa8] sm:$0xff] (!%p342_p9)   ;;  %v8221_v62 = vld [vmem:[%s11231_s1 + $0x80] sm:$0xff] (!%p342_p9)   ;;  %s5949_s29 = sshll.u32 (!%p342_p9), %s378_s25, 2 }
  0x14   : > { %7063 = vmatpush3.bf16.msra.mxu1 (!%p342_p9), %v8196_v4  ;;  %7016 = vmatprep.subr.bf16.mxu0 (!%p342_p9), %v8505_v1  ;;  %v8222_v3 = vld [vmem:[%s11231_s1 + $0xb0] sm:$0xff] (!%p342_p9)   ;;  %vm2771_vm8 = vmand (!%p342_p9), %vm2769_vm6, %vm2770_vm7  ;;  %s380_s12 = scalar_lea.vmem (!%p342_p9), [#allocation4], %s5949_s29  ;;  %s8507_s29 = smov (!%p342_p9), [#allocation4]  }
  0x15   : > { %s11249_s16 = smov (!%p382_p10, %s381_s16), 35  ;;  %7064 = vmatprep.subr.bf16.mxu1 %v8505_v1  ;;  %s8445_s30 = sshll.u32 %s8507_s29, 4  ;;  %s8446_s30 = int_to_ptr.vmem [resolvable:$false] %s8445_s30 }
  0x16   : > { %s5950_s13 = sshll.u32 %s11249_s16, 2  ;;  %s6561_s16 = sshll.u32 %s8589_s21, 6 }
  0x17   : > { %s8648_s22 = scalar_lea.vmem %s11230_s0, %s5950_s13  ;;  %7017 = vmatpush3.bf16.msra.mxu0 %v8197_v5  ;;  %s5886_s13 = sshll.u32 %s380_s12, 4  ;;  %s11190_s13 = int_to_ptr.vmem [resolvable:$true] %s5886_s13 }
  0x18   : > { %7065 = vmatpush3.bf16.msra.mxu1 %v8198_v6  ;;  %7018 = vmatprep.subr.bf16.mxu0 %v8505_v1  ;;  %v388_v9 = vld [vmem:[%s8648_s22] sm:$0xf]  ;;  %v8660_v10 = vld [vmem:[%s8648_s22 + $0x4] sm:$0xf]  ;;  %v8669_v13 = vld [vmem:[%s8648_s22 + $0x8] sm:$0xff]   ;;  %s11188_s24 = scalar_lea.hbm %s11241_s11, %s6561_s16  ;;  %s8441_s21 = scalar_lea.vmem %s11190_s13, 64 }
  0x19   : > { %7066 = vmatprep.subr.bf16.mxu1 %v8505_v1  ;;  %v8666_v12 = vcombine.low %v388_v9, %v8660_v10  ;;  %v486_v17 = vshll.u32 %v8669_v13, 16  ;;  %v490_v19 = vshrl.u32 %v8669_v13, 16  ;;  %v8687_v23 = vld [vmem:[%s8648_s22 + $0x10] sm:$0xff]   ;;  %v8708_v32 = vld [vmem:[%s8648_s22 + $0x18] sm:$0xff]   ;;  %v8724_v37 = vld [vmem:[%s8648_s22 + $0x20] sm:$0xff]   ;;  %p8442_p11 = scmp.ne.s32.totalorder %s11190_s13, %s8441_s21  ;;  %s8447_s14 = scalar_lea.vmem %s8446_s30, 128 }
  0x1a   : > { %v494_v30 = vshll.u32 %v8687_v23, 16  ;;  %v502_v38 = vshll.u32 %v8708_v32, 16  ;;  %v498_v40 = vshrl.u32 %v8687_v23, 16  ;;  %v510_v42 = vshll.u32 %v8724_v37, 16  ;;  %v8742_v44 = vld [vmem:[%s8648_s22 + $0x28] sm:$0xff]   ;;  %v8753_v49 = vld [vmem:[%s8648_s22 + $0x30] sm:$0xff]   ;;  %p8448_p0 = scmp.lt.s32.totalorder %s11190_s13, %s8446_s30  ;;  %p8449_p1 = scmp.lt.s32.totalorder %s8447_s14, %s8441_s21 }
  0x1b   : > { %7019 = vmatpush3.bf16.msra.mxu0 %v8199_v7  ;;  %v479_v15 = vshrl.u32 %v8666_v12, 16  ;;  %v481_v16 = vshll.u32 %v8666_v12, 16  ;;  %v1129_v22 = vrot.slane %v486_v17, 2  ;;  %v488_v24 = vrot.slane %v486_v17, 1  ;;  %v881_v50 = vld [vmem:[%s8648_s22] sm:$0xe]  ;;  %p8443_p12 = pnand %p8442_p11, %p8606_p5 }
  0x1c   : > { %7067 = vmatpush3.bf16.msra.mxu1 %v8200_v8  ;;  %7020 = vmatprep.subr.bf16.mxu0 %v8505_v1  ;;  %v1128_v25 = vrot.slane %v490_v19, 1  ;;  %v496_v34 = vrot.slane %v494_v30, 1  ;;  %v504_v45 = vrot.slane %v502_v38, 1  ;;  %v506_v46 = vshrl.u32 %v8708_v32, 16  ;;  %v8774_v58 = vld [vmem:[%s8648_s22 + $0x38] sm:$0xff]   ;;  %p8450_p2 = por %p8449_p1, %p8448_p0 }
  0x1d   : > { %7068 = vmatprep.subr.bf16.mxu1 %v8505_v1  ;;  %v483_v21 = vrot.slane %v481_v16, 1  ;;  %v492_v33 = vor.u32 %v490_v19, %v488_v24  ;;  %v514_v48 = vshrl.u32 %v8724_v37, 16  ;;  %v1132_v52 = vrot.slane %v498_v40, 1  ;;  %p8444_p13 = pneg %p8443_p12 }
  0x1e   : > { %v8691_v27 = vor.u32 %v1129_v22, %v1128_v25  ;;  %v500_v47 = vor.u32 %v498_v40, %v496_v34  ;;  %v8761_v53 = vrot.slane %v510_v42, 1  ;;  %v518_v54 = vshll.u32 %v8742_v44, 16 }
  0x1f   : > { %7021 = vmatpush3.bf16.msra.mxu0 %v8201_v11  ;;  %v484_v26 = vor.u32 %v483_v21, %v479_v15  ;;  %v8729_v39 = vsel %vm477_vm1, %v492_v33, %v496_v34  ;;  %v522_v56 = vshrl.u32 %v8742_v44, 16  ;;  %v8770_v57 = vcombine.low %v881_v50, %v8660_v10  ;;  %v8224_v15 = vld [vmem:[%s11231_s1 + $0x88] sm:$0xff]   ;;  %p8451_p3 = pnand %p8450_p2, %p8444_p13 }
  0x20   : > { %7069 = vmatpush3.bf16.msra.mxu1 %v8202_v14  ;;  %7022 = vmatprep.subr.bf16.mxu0 %v8505_v1  ;;  %v1133_v59 = vrot.slane %v494_v30, 2  ;;  %v8777_v60 = vsel %vm477_vm1, %v500_v47, %v504_v45  ;;  %v526_v61 = vshll.u32 %v8753_v49, 16  ;;  %v1136_v6 = vrot.slane %v506_v46, 1 }
  0x21   : > { %7070 = vmatprep.subr.bf16.mxu1 %v8505_v1  ;;  %v8694_v28 = vsel %vm477_vm1, %v484_v26, %v488_v24  ;;  %v1121_v63 = vshrl.u32 %v8770_v57, 16  ;;  %v1124_v0 = vshll.u32 %v8770_v57, 16  ;;  %v508_v7 = vor.u32 %v506_v46, %v504_v45  ;;  %v8225_v24 = vld [vmem:[%s11231_s1 + $0xb8] sm:$0xff]  }
  0x22   : > { %v1134_v2 = vor.u32 %v1133_v59, %v1132_v52  ;;  %v530_v8 = vshrl.u32 %v8753_v49, 16  ;;  %v1137_v11 = vrot.slane %v502_v38, 2  ;;  %v534_v14 = vshll.u32 %v8774_v58, 16 }
  0x23   : > { %7023 = vmatpush3.bf16.msra.mxu0 %v8203_v18  ;;  %v1123_v4 = vrot.slane %v1121_v63, 1  ;;  %v1126_v5 = vrot.slane %v1124_v0, 2  ;;  %v1140_v17 = vrot.slane %v514_v48, 1  ;;  %v1141_v18 = vrot.slane %v510_v42, 2  ;;  %v404_v42 = vld [vmem:[%s8648_s22 + $0x40] sm:$0xf] }
  0x24   : > { %7071 = vmatpush3.bf16.msra.mxu1 %v8204_v20  ;;  %7108 = vmatprep.subr.bf16.mxu0 %v8505_v1  ;;  %v8795_v9 = vsel %vm1119_vm3, %v8691_v27, %v1134_v2  ;;  %v1138_v19 = vor.u32 %v1137_v11, %v1136_v6  ;;  %v1144_v20 = vrot.slane %v522_v56, 1  ;;  %v1145_v21 = vrot.slane %v518_v54, 2 }
  0x25   : > { %7156 = vmatprep.subr.bf16.mxu1 %v8505_v1  ;;  %v1127_v16 = vor.u32 %v1126_v5, %v1123_v4  ;;  %v538_v22 = vshrl.u32 %v8774_v58, 16  ;;  %v1142_v26 = vor.u32 %v1141_v18, %v1140_v17  ;;  %v1149_v33 = vrot.slane %v526_v61, 2  ;;  %v8229_v17 = vld [vmem:[%s11231_s1 + $0x120] sm:$0xff]  }
  0x26   : > { %7025 = vmatmul.mubr.msk.bf16.vlgmr.msra.gmra.mrb[0].mxu0 %vm585_vm2, %v8694_v28  ;;  %v1146_v30 = vor.u32 %v1145_v21, %v1144_v20  ;;  %v8832_v34 = vsel %vm477_vm1, %v508_v7, %v8761_v53  ;;  %v1153_v40 = vrot.slane %v534_v14, 2  ;;  %v516_v46 = vor.u32 %v514_v48, %v8761_v53  ;;  %v405_v7 = vld [vmem:[%s8648_s22 + $0x44] sm:$0x3] }
  0x27   : > { %7073 = vmatmul.mubr.msk.bf16.vlgmr.msra.gmra.mrb[0].mxu1 %vm585_vm2, %v8666_v12  ;;  %7109 = vmatpush3.bf16.msra.mxu0 %v8207_v29  ;;  %v8820_v25 = vsel %vm1119_vm3, %v1127_v16, %v8691_v27  ;;  %v8824_v29 = vsel %vm1119_vm3, %v1134_v2, %v1138_v19  ;;  %v8835_v27 = vsel %vm1119_vm3, %v1138_v19, %v1142_v26  ;;  %v520_v47 = vrot.slane %v518_v54, 1  ;;  %v418_v54 = vld [vmem:[%s8648_s22 + $0x44] sm:$0x7]  ;;  %v8231_v19 = vld [vmem:[%s11231_s1 + $0x128] sm:$0xff]  }
  0x28   : > { %7157 = vmatpush3.bf16.msra.mxu1 %v8208_v31  ;;  %7028 = vmatprep.mubr.msk.bf16.mxu0 %vm8506_vm0, %v8505_v1  ;;  %v1148_v31 = vrot.slane %v530_v8, 1  ;;  %v528_v48 = vrot.slane %v526_v61, 1  ;;  %v8892_v61 = vcombine.low %v404_v42, %v418_v54  ;;  %v536_v63 = vrot.slane %v534_v14, 1  ;;  %v8228_v16 = vld [vmem:[%s11231_s1 + $0xc0] sm:$0xff]  }
  0x29   : > { %7076 = vmatprep.mubr.msk.bf16.mxu1 %vm8506_vm0, %v8505_v1  ;;  %7110 = vmatprep.subr.bf16.mxu0 %v8505_v1  ;;  %v8874_v59 = vsel %vm477_vm1, %v516_v46, %v520_v47  ;;  %v524_v53 = vor.u32 %v522_v56, %v520_v47  ;;  %v8931_v11 = vcombine.low %v404_v42, %v405_v7  ;;  %v899_v14 = vrot.slane %v8770_v57, 1  ;;  %v8230_v57 = vld [vmem:[%s11231_s1 + $0xc8] sm:$0xff]   ;;  %v8243_v7 = vld [vmem:[%s11231_s1 + $0x150] sm:$0xff]  }
  0x2a   : > { %7158 = vmatprep.subr.bf16.mxu1 %v8505_v1  ;;  %v1150_v38 = vor.u32 %v1149_v33, %v1148_v31  ;;  %v532_v56 = vor.u32 %v530_v8, %v528_v48  ;;  %v542_v0 = vshll.u32 %v8892_v61, 16  ;;  %v546_v5 = vshrl.u32 %v8892_v61, 16  ;;  %v8237_v31 = vld [vmem:[%s11231_s1 + $0x140] sm:$0xff]   ;;  %v8239_v33 = vld [vmem:[%s11231_s1 + $0xe8] sm:$0xff]  }
  0x2b   : > { %7111 = vmatpush3.bf16.msra.mxu0 %v8210_v35  ;;  %v1152_v35 = vrot.slane %v538_v22, 1  ;;  %v904_v20 = vrot.slane %v8708_v32, 1  ;;  %v9045_v46 = vrot.slane %v8892_v61, 1 }
  0x2c   : > { %7159 = vmatpush3.bf16.msra.mxu1 %v8211_v36  ;;  %7112 = vmatprep.subr.bf16.mxu0 %v8505_v1  ;;  %v8838_v36 = vsel %vm1119_vm3, %v1142_v26, %v1146_v30  ;;  %v8906_v2 = vsel %vm477_vm1, %v532_v56, %v536_v63  ;;  %v544_v4 = vrot.slane %v542_v0, 1  ;;  %v8236_v26 = vld [vmem:[%s11231_s1 + $0xe0] sm:$0xff]   ;;  %v9108_v0 = vld [vmem:[%s8648_s22 + $0x8] sm:$0xff]  }
  0x2d   : > { %7160 = vmatprep.subr.bf16.mxu1 %v8505_v1  ;;  %v8849_v45 = vor.u32 %v1153_v40, %v1152_v35  ;;  %v906_v35 = vrot.slane %v8724_v37, 1 }
  0x2e   : > { %7029 = vmatmul.mubr.msk.bf16.gmra.mrb[4].mxu0 %vm585_vm2, %v8729_v39  ;;  %v8929_v8 = vor.u32 %v546_v5, %v544_v4  ;;  %v8242_v5 = vld [vmem:[%s11231_s1 + $0xf0] sm:$0xff]  }
  0x2f   : > { %7077 = vmatmul.mubr.msk.bf16.gmra.mrb[4].mxu1 %vm585_vm2, %v8669_v13  ;;  %7032 = vmatprep.mubr.msk.bf16.mxu0 %vm8506_vm0, %v8505_v1  ;;  %v8869_v52 = vsel %vm1119_vm3, %v1150_v38, %v8849_v45  ;;  %v9026_v40 = vsel %vm898_vm4, %v904_v20, %v906_v35 }
  0x30   : > { %7080 = vmatprep.mubr.msk.bf16.mxu1 %vm8506_vm0, %v8505_v1  ;;  %7113 = vmatpush3.bf16.msra.mxu0 %v8214_v41  ;;  %v1102_v41 = vld [vmem:[%s8648_s22 + $0x44] sm:$0xf] }
  0x31   : > { %7161 = vmatpush3.bf16.msra.mxu1 %v8215_v43  ;;  %7114 = vmatprep.subr.bf16.mxu0 %v8505_v1  ;;  %v8847_v43 = vsel %vm1119_vm3, %v1146_v30, %v1150_v38  ;;  %v8860_v50 = vcombine.low %v404_v42, %v1102_v41  ;;  %v8240_v38 = vld [vmem:[%s11231_s1 + $0x148] sm:$0xff]   ;;  %v908_v41 = vrot.slane %v8742_v44, 1  ;;  %v912_v42 = vrot.slane %v8774_v58, 1 }
  0x32   : > { %7162 = vmatprep.subr.bf16.mxu1 %v8505_v1 }
  0x33   : > { %v9083_v56 = vsel %vm898_vm4, %v912_v42, %v9045_v46 }
  0x34   : > { %7115 = vmatpush3.bf16.msra.mxu0 %v8217_v51  ;;  %v8863_v51 = vld [vmem:[%s8648_s22] sm:$0xc] }
  0x35   : > { %7163 = vmatpush3.bf16.msra.mxu1 %v8218_v55  ;;  %7116 = vmatprep.subr.bf16.mxu0 %v8505_v1  ;;  %v6071_v55 = vcombine.low %v8863_v51, %v8660_v10  ;;  %v9127_v10 = vld [vmem:[%s8648_s22 + $0x10] sm:$0xff]  }
  0x36   : > { %7033 = vmatmul.mubr.msk.bf16.gmra.mrb[8].mxu0 %vm585_vm2, %v8777_v60  ;;  %7164 = vmatprep.subr.bf16.mxu1 %v8505_v1  ;;  %v1372_v51 = vrot.slane %v9127_v10, 2 }
  0x37   : > { %7081 = vmatmul.mubr.msk.bf16.gmra.mrb[8].mxu1 %vm585_vm2, %v8687_v23  ;;  %7036 = vmatprep.mubr.msk.bf16.mxu0 %vm8506_vm0, %v8505_v1 }
  0x38   : > { %7084 = vmatprep.mubr.msk.bf16.mxu1 %vm8506_vm0, %v8505_v1  ;;  %7117 = vmatpush3.bf16.msra.mxu0 %v8221_v62  ;;  %v8890_v62 = vsel %vm477_vm1, %v524_v53, %v528_v48 }
  0x39   : > { %7165 = vmatpush3.bf16.msra.mxu1 %v8222_v3  ;;  %7118 = vmatprep.subr.bf16.mxu0 %v8505_v1  ;;  %v540_v3 = vor.u32 %v538_v22, %v536_v63  ;;  %v8233_v22 = vld [vmem:[%s11231_s1 + $0x130] sm:$0xff]  }
  0x3a   : > { %7166 = vmatprep.subr.bf16.mxu1 %v8505_v1 }
  0x3b   : > { %v8918_v6 = vsel %vm477_vm1, %v540_v3, %v544_v4  ;;  %v1370_v3 = vrot.slane %v9108_v0, 2 }
  0x3c   : > { %7119 = vmatpush3.bf16.msra.mxu0 %v8224_v15  ;;  %v900_v15 = vrot.slane %v8669_v13, 1  ;;  %v902_v13 = vrot.slane %v8687_v23, 1  ;;  %v8232_v23 = vld [vmem:[%s11231_s1 + $0xd0] sm:$0xff]  }
  0x3d   : > { %7167 = vmatpush3.bf16.msra.mxu1 %v8225_v24  ;;  %7204 = vmatprep.subr.bf16.mxu0 %v8505_v1  ;;  %v8235_v24 = vld [vmem:[%s11231_s1 + $0x138] sm:$0xff]  }
  0x3e   : > { %7037 = vmatmul.mubr.msk.bf16.gmra.mrb[12].mxu0 %vm585_vm2, %v8832_v34  ;;  %7252 = vmatprep.subr.bf16.mxu1 %v8505_v1  ;;  %v8950_v18 = vsel %vm898_vm4, %v899_v14, %v900_v15  ;;  %v8974_v21 = vsel %vm898_vm4, %v900_v15, %v902_v13  ;;  %v9001_v30 = vsel %vm898_vm4, %v902_v13, %v904_v20  ;;  %v8245_v14 = vld [vmem:[%s11231_s1 + $0x158] sm:$0xff]   ;;  %v8246_v15 = vld [vmem:[%s11231_s1 + $0x100] sm:$0xff]   ;;  %v8250_v20 = vld [vmem:[%s11231_s1 + $0x110] sm:$0xff]  }
  0x3f   : > { %7085 = vmatmul.mubr.msk.bf16.gmra.mrb[12].mxu1 %vm585_vm2, %v8708_v32  ;;  %7040 = vmatprep.mubr.msk.bf16.mxu0 %vm8506_vm0, %v8505_v1  ;;  %v8234_v32 = vld [vmem:[%s11231_s1 + $0xd8] sm:$0xff]  }
  0x40   : > { %7088 = vmatprep.mubr.msk.bf16.mxu1 %vm8506_vm0, %v8505_v1 }
  0x46   : > { %7041 = vmatmul.mubr.msk.bf16.gmra.mrb[16].mxu0 %vm585_vm2, %v8874_v59 }
  0x47   : > { %7089 = vmatmul.mubr.msk.bf16.gmra.mrb[16].mxu1 %vm585_vm2, %v8724_v37  ;;  %7044 = vmatprep.mubr.msk.bf16.mxu0 %vm8506_vm0, %v8505_v1  ;;  %v9040_v37 = vsel %vm898_vm4, %v906_v35, %v908_v41 }
  0x48   : > { %7092 = vmatprep.mubr.msk.bf16.mxu1 %vm8506_vm0, %v8505_v1 }
  0x4e   : > { %7045 = vmatmul.mubr.msk.bf16.gmra.mrb[20].mxu0 %vm585_vm2, %v8890_v62 }
  0x4f   : > { %7093 = vmatmul.mubr.msk.bf16.gmra.mrb[20].mxu1 %vm585_vm2, %v8742_v44  ;;  %7048 = vmatprep.mubr.msk.bf16.mxu0 %vm8506_vm0, %v8505_v1  ;;  %v910_v44 = vrot.slane %v8753_v49, 1 }
  0x50   : > { %7096 = vmatprep.mubr.msk.bf16.mxu1 %vm8506_vm0, %v8505_v1 }
  0x51   : > { %v9056_v47 = vsel %vm898_vm4, %v908_v41, %v910_v44  ;;  %v9069_v48 = vsel %vm898_vm4, %v910_v44, %v912_v42 }
  0x56   : > { %7049 = vmatmul.mubr.msk.bf16.gmra.mrb[24].mxu0 %vm585_vm2, %v8906_v2 }
  0x57   : > { %7097 = vmatmul.mubr.msk.bf16.gmra.mrb[24].mxu1 %vm585_vm2, %v8753_v49  ;;  %7052 = vmatprep.mubr.msk.bf16.mxu0 %vm8506_vm0, %v8505_v1  ;;  %v1157_v49 = vshrl.u32 %v8860_v50, 16 }
  0x58   : > { %7100 = vmatprep.mubr.msk.bf16.mxu1 %vm8506_vm0, %v8505_v1 }
  0x59   : > { %v1159_v53 = vrot.slane %v1157_v49, 1 }
  0x5e   : > { %7053 = vmatmul.mubr.msk.bf16.gmra.mrb[28].mxu0 %vm585_vm2, %v8918_v6 }
  0x5f   : > { %7101 = vmatmul.mubr.msk.bf16.gmra.mrb[28].mxu1 %vm585_vm2, %v8774_v58  ;;  %7056 = vmatprep.mubr.msk.bf16.mxu0 %vm8506_vm0, %v8505_v1  ;;  %v1160_v58 = vshll.u32 %v8860_v50, 16 }
  0x60   : > { %7104 = vmatprep.mubr.msk.bf16.mxu1 %vm8506_vm0, %v8505_v1 }
  0x61   : > { %v1162_v54 = vrot.slane %v1160_v58, 2 }
  0x63   : > { %v9079_v61 = vor.u32 %v1162_v54, %v1159_v53 }
  0x65   : > { %v9088_v63 = vsel %vm1119_vm3, %v8849_v45, %v9079_v61  ;;  %v1369_v45 = vrot.slane %v6071_v55, 2  ;;  %v8244_v55 = vld [vmem:[%s11231_s1 + $0xf8] sm:$0xff]  }
  0x66   : > { %7057 = vmatmul.mubr.msk.bf16.gmra.mrb[32].mxu0 %vm585_vm2, %v8929_v8 }
  0x67   : > { %7105 = vmatmul.mubr.msk.bf16.gmra.mrb[32].mxu1 %vm585_vm2, %v8931_v11  ;;  %7120 = vmatprep.mubr.msk.bf16.mxu0 %vm8506_vm0, %v8505_v1  ;;  %v9114_v4 = vsel %vm1368_vm5, %v1369_v45, %v1370_v3  ;;  %v8254_v45 = vld [vmem:[%s11231_s1 + $0x180] sm:$0xff]  }
  0x68   : > { %7168 = vmatprep.mubr.msk.bf16.mxu1 %vm8506_vm0, %v8505_v1 }
  0x6e   : > { %7121 = vmatmul.mubr.msk.bf16.vlgmr.msra.gmra.mrb[36].mxu0 %vm585_vm2, %v8950_v18 }
  0x6f   : > { %7169 = vmatmul.mubr.msk.bf16.vlgmr.msra.gmra.mrb[36].mxu1 %vm585_vm2, %v8820_v25  ;;  %7205 = vmatpush3.bf16.msra.mxu0 %v8228_v16  ;;  %v8247_v16 = vld [vmem:[%s11231_s1 + $0x160] sm:$0xff]  }
  0x70   : > { %7253 = vmatpush3.bf16.msra.mxu1 %v8229_v17  ;;  %7124 = vmatprep.mubr.msk.bf16.mxu0 %vm8506_vm0, %v8505_v1  ;;  %v9160_v17 = vld [vmem:[%s8648_s22 + $0x18] sm:$0xff]  }
  0x71   : > { %7172 = vmatprep.mubr.msk.bf16.mxu1 %vm8506_vm0, %v8505_v1  ;;  %7206 = vmatprep.subr.bf16.mxu0 %v8505_v1  ;;  %v1374_v13 = vrot.slane %v9160_v17, 2 }
  0x72   : > { %7254 = vmatprep.subr.bf16.mxu1 %v8505_v1 }
  0x73   : > { %7207 = vmatpush3.bf16.msra.mxu0 %v8230_v57  ;;  %v8248_v57 = vld [vmem:[%s11231_s1 + $0x108] sm:$0xff]  }
  0x74   : > { %7255 = vmatpush3.bf16.msra.mxu1 %v8231_v19  ;;  %7208 = vmatprep.subr.bf16.mxu0 %v8505_v1  ;;  %v9174_v19 = vsel %vm1368_vm5, %v1372_v51, %v1374_v13 }
  0x75   : > { %7256 = vmatprep.subr.bf16.mxu1 %v8505_v1 }
  0x76   : > { %7125 = vmatmul.mubr.msk.bf16.gmra.mrb[40].mxu0 %vm585_vm2, %v8974_v21 }
  0x77   : > { %7173 = vmatmul.mubr.msk.bf16.gmra.mrb[40].mxu1 %vm585_vm2, %v8795_v9  ;;  %7128 = vmatprep.mubr.msk.bf16.mxu0 %vm8506_vm0, %v8505_v1 }
  0x78   : > { %7176 = vmatprep.mubr.msk.bf16.mxu1 %vm8506_vm0, %v8505_v1  ;;  %7209 = vmatpush3.bf16.msra.mxu0 %v8232_v23  ;;  %v8251_v23 = vld [vmem:[%s11231_s1 + $0x170] sm:$0xff]  }
  0x79   : > { %7257 = vmatpush3.bf16.msra.mxu1 %v8233_v22  ;;  %7210 = vmatprep.subr.bf16.mxu0 %v8505_v1  ;;  %v9191_v22 = vld [vmem:[%s8648_s22 + $0x20] sm:$0xff]  }
  0x7a   : > { %7258 = vmatprep.subr.bf16.mxu1 %v8505_v1 }
  0x7c   : > { %7211 = vmatpush3.bf16.msra.mxu0 %v8234_v32  ;;  %v1376_v32 = vrot.slane %v9191_v22, 2 }
  0x7d   : > { %7259 = vmatpush3.bf16.msra.mxu1 %v8235_v24  ;;  %7212 = vmatprep.subr.bf16.mxu0 %v8505_v1  ;;  %v8252_v24 = vld [vmem:[%s11231_s1 + $0x118] sm:$0xff]  }
  0x7e   : > { %7129 = vmatmul.mubr.msk.bf16.gmra.mrb[44].mxu0 %vm585_vm2, %v9001_v30  ;;  %7260 = vmatprep.subr.bf16.mxu1 %v8505_v1 }
  0x7f   : > { %7177 = vmatmul.mubr.msk.bf16.gmra.mrb[44].mxu1 %vm585_vm2, %v8824_v29  ;;  %7132 = vmatprep.mubr.msk.bf16.mxu0 %vm8506_vm0, %v8505_v1 }
  0x80   : > { %7180 = vmatprep.mubr.msk.bf16.mxu1 %vm8506_vm0, %v8505_v1  ;;  %7213 = vmatpush3.bf16.msra.mxu0 %v8236_v26  ;;  %v9205_v26 = vsel %vm1368_vm5, %v1374_v13, %v1376_v32 }
  0x81   : > { %7261 = vmatpush3.bf16.msra.mxu1 %v8237_v31  ;;  %7214 = vmatprep.subr.bf16.mxu0 %v8505_v1  ;;  %v9216_v31 = vld [vmem:[%s8648_s22 + $0x28] sm:$0xff]  }
  0x82   : > { %7262 = vmatprep.subr.bf16.mxu1 %v8505_v1 }
  0x84   : > { %7215 = vmatpush3.bf16.msra.mxu0 %v8239_v33  ;;  %v1378_v33 = vrot.slane %v9216_v31, 2 }
  0x85   : > { %7263 = vmatpush3.bf16.msra.mxu1 %v8240_v38  ;;  %7300 = vmatprep.subr.bf16.mxu0 %v8505_v1 }
  0x86   : > { %7133 = vmatmul.mubr.msk.bf16.gmra.mrb[48].mxu0 %vm585_vm2, %v9026_v40  ;;  %7348 = vmatprep.subr.bf16.mxu1 %v8505_v1  ;;  %v9222_v35 = vsel %vm1368_vm5, %v1376_v32, %v1378_v33 }
  0x87   : > { %7181 = vmatmul.mubr.msk.bf16.gmra.mrb[48].mxu1 %vm585_vm2, %v8835_v27  ;;  %7136 = vmatprep.mubr.msk.bf16.mxu0 %vm8506_vm0, %v8505_v1 }
  0x88   : > { %7184 = vmatprep.mubr.msk.bf16.mxu1 %vm8506_vm0, %v8505_v1 }
  0x8e   : > { %7137 = vmatmul.mubr.msk.bf16.gmra.mrb[52].mxu0 %vm585_vm2, %v9040_v37 }
  0x8f   : > { %7185 = vmatmul.mubr.msk.bf16.gmra.mrb[52].mxu1 %vm585_vm2, %v8838_v36  ;;  %7140 = vmatprep.mubr.msk.bf16.mxu0 %vm8506_vm0, %v8505_v1 }
  0x90   : > { %7188 = vmatprep.mubr.msk.bf16.mxu1 %vm8506_vm0, %v8505_v1 }
  0x96   : > { %7141 = vmatmul.mubr.msk.bf16.gmra.mrb[56].mxu0 %vm585_vm2, %v9056_v47 }
  0x97   : > { %7189 = vmatmul.mubr.msk.bf16.gmra.mrb[56].mxu1 %vm585_vm2, %v8847_v43  ;;  %7144 = vmatprep.mubr.msk.bf16.mxu0 %vm8506_vm0, %v8505_v1 }
  0x98   : > { %7192 = vmatprep.mubr.msk.bf16.mxu1 %vm8506_vm0, %v8505_v1 }
  0x9e   : > { %7145 = vmatmul.mubr.msk.bf16.gmra.mrb[60].mxu0 %vm585_vm2, %v9069_v48 }
  0x9f   : > { %7193 = vmatmul.mubr.msk.bf16.gmra.mrb[60].mxu1 %vm585_vm2, %v8869_v52  ;;  %7148 = vmatprep.mubr.msk.bf16.mxu0 %vm8506_vm0, %v8505_v1 }
  0xa0   : > { %7196 = vmatprep.mubr.msk.bf16.mxu1 %vm8506_vm0, %v8505_v1 }
  0xa6   : > { %7149 = vmatmul.mubr.msk.bf16.gmra.mrb[64].mxu0 %vm585_vm2, %v9083_v56 }
  0xa7   : > { %7197 = vmatmul.mubr.msk.bf16.gmra.mrb[64].mxu1 %vm585_vm2, %v9088_v63  ;;  %7152 = vmatprep.mubr.msk.bf16.mxu0 %vm8506_vm0, %v8505_v1 }
  0xa8   : > { %7200 = vmatprep.mubr.msk.bf16.mxu1 %vm8506_vm0, %v8505_v1 }
  0xae   : > { %7153 = vmatmul.mubr.msk.bf16.gmra.mrb[68].mxu0 %vm585_vm2, %v9045_v46 }
  0xaf   : > { %7201 = vmatmul.mubr.msk.bf16.gmra.mrb[68].mxu1 %vm585_vm2, %v9079_v61  ;;  %7216 = vmatprep.mubr.msk.bf16.mxu0 %vm8506_vm0, %v8505_v1 }
  0xb0   : > { %7264 = vmatprep.mubr.msk.bf16.mxu1 %vm8506_vm0, %v8505_v1 }
  0xb6   : > { %7217 = vmatmul.mubr.msk.bf16.vlgmr.msra.gmra.mrb[72].mxu0 %vm585_vm2, %v9114_v4 }
  0xb7   : > { %7265 = vmatmul.mubr.msk.bf16.vlgmr.msra.gmra.mrb[72].mxu1 %vm585_vm2, %v8694_v28  ;;  %7301 = vmatpush3.bf16.msra.mxu0 %v8242_v5  ;;  %v9143_v28 = vsel %vm1368_vm5, %v1370_v3, %v1372_v51 }
  0xb8   : > { %7349 = vmatpush3.bf16.msra.mxu1 %v8243_v7  ;;  %7220 = vmatprep.mubr.msk.bf16.mxu0 %vm8506_vm0, %v8505_v1 }
  0xb9   : > { %7268 = vmatprep.mubr.msk.bf16.mxu1 %vm8506_vm0, %v8505_v1  ;;  %7302 = vmatprep.subr.bf16.mxu0 %v8505_v1 }
  0xba   : > { %7350 = vmatprep.subr.bf16.mxu1 %v8505_v1 }
  0xbb   : > { %7303 = vmatpush3.bf16.msra.mxu0 %v8244_v55  ;;  %v8256_v55 = vld [vmem:[%s11231_s1 + $0x188] sm:$0xff]  }
  0xbc   : > { %7351 = vmatpush3.bf16.msra.mxu1 %v8245_v14  ;;  %7304 = vmatprep.subr.bf16.mxu0 %v8505_v1  ;;  %v8257_v14 = vld [vmem:[%s11231_s1 + $0x1b8] sm:$0xff]  }
  0xbd   : > { %7352 = vmatprep.subr.bf16.mxu1 %v8505_v1 }
  0xbe   : > { %7221 = vmatmul.mubr.msk.bf16.gmra.mrb[76].mxu0 %vm585_vm2, %v9143_v28 }
  0xbf   : > { %7269 = vmatmul.mubr.msk.bf16.gmra.mrb[76].mxu1 %vm585_vm2, %v8729_v39  ;;  %7224 = vmatprep.mubr.msk.bf16.mxu0 %vm8506_vm0, %v8505_v1  ;;  %v8249_v39 = vld [vmem:[%s11231_s1 + $0x168] sm:$0xff]  }
  0xc0   : > { %7272 = vmatprep.mubr.msk.bf16.mxu1 %vm8506_vm0, %v8505_v1  ;;  %7305 = vmatpush3.bf16.msra.mxu0 %v8246_v15 }
  0xc1   : > { %7353 = vmatpush3.bf16.msra.mxu1 %v8247_v16  ;;  %7306 = vmatprep.subr.bf16.mxu0 %v8505_v1 }
  0xc2   : > { %7354 = vmatprep.subr.bf16.mxu1 %v8505_v1 }
  0xc4   : > { %7307 = vmatpush3.bf16.msra.mxu0 %v8248_v57 }
  0xc5   : > { %7355 = vmatpush3.bf16.msra.mxu1 %v8249_v39  ;;  %7308 = vmatprep.subr.bf16.mxu0 %v8505_v1 }
  0xc6   : > { %7225 = vmatmul.mubr.msk.bf16.gmra.mrb[80].mxu0 %vm585_vm2, %v9174_v19  ;;  %7356 = vmatprep.subr.bf16.mxu1 %v8505_v1 }
  0xc7   : > { %7273 = vmatmul.mubr.msk.bf16.gmra.mrb[80].mxu1 %vm585_vm2, %v8777_v60  ;;  %7228 = vmatprep.mubr.msk.bf16.mxu0 %vm8506_vm0, %v8505_v1  ;;  %v8253_v60 = vld [vmem:[%s11231_s1 + $0x178] sm:$0xff]  }
  0xc8   : > { %7276 = vmatprep.mubr.msk.bf16.mxu1 %vm8506_vm0, %v8505_v1  ;;  %7309 = vmatpush3.bf16.msra.mxu0 %v8250_v20 }
  0xc9   : > { %7357 = vmatpush3.bf16.msra.mxu1 %v8251_v23  ;;  %7310 = vmatprep.subr.bf16.mxu0 %v8505_v1  ;;  %v8258_v23 = vld [vmem:[%s11231_s1 + $0x190] sm:$0xff]  }
  0xca   : > { %7358 = vmatprep.subr.bf16.mxu1 %v8505_v1 }
  0xcc   : > { %7311 = vmatpush3.bf16.msra.mxu0 %v8252_v24 }
  0xcd   : > { %7359 = vmatpush3.bf16.msra.mxu1 %v8253_v60  ;;  %7396 = vmatprep.subr.bf16.mxu0 %v8505_v1  ;;  %v8259_v60 = vld [vmem:[%s11231_s1 + $0x1c0] sm:$0xff]  }
  0xce   : > { %7229 = vmatmul.mubr.msk.bf16.gmra.mrb[84].mxu0 %vm585_vm2, %v9205_v26  ;;  %7444 = vmatprep.subr.bf16.mxu1 %v8505_v1 }
  0xcf   : > { %7277 = vmatmul.mubr.msk.bf16.gmra.mrb[84].mxu1 %vm585_vm2, %v8832_v34  ;;  %7232 = vmatprep.mubr.msk.bf16.mxu0 %vm8506_vm0, %v8505_v1  ;;  %v9231_v34 = vld [vmem:[%s8648_s22 + $0x30] sm:$0xff]  }
  0xd0   : > { %7280 = vmatprep.mubr.msk.bf16.mxu1 %vm8506_vm0, %v8505_v1  ;;  %v1380_v38 = vrot.slane %v9231_v34, 2 }
  0xd2   : > { %v9237_v41 = vsel %vm1368_vm5, %v1378_v33, %v1380_v38  ;;  %v8260_v33 = vld [vmem:[%s11231_s1 + $0x198] sm:$0xff]  }
  0xd6   : > { %7233 = vmatmul.mubr.msk.bf16.gmra.mrb[88].mxu0 %vm585_vm2, %v9222_v35 }
  0xd7   : > { %7281 = vmatmul.mubr.msk.bf16.gmra.mrb[88].mxu1 %vm585_vm2, %v8874_v59  ;;  %7236 = vmatprep.mubr.msk.bf16.mxu0 %vm8506_vm0, %v8505_v1  ;;  %v9246_v59 = vld [vmem:[%s8648_s22 + $0x38] sm:$0xff]   ;;  %s5873_s22 = scalar_lea.sflag [#allocation5], %s378_s25 }
  0xd8   : > { %7284 = vmatprep.mubr.msk.bf16.mxu1 %vm8506_vm0, %v8505_v1  ;;  %v1382_v44 = vrot.slane %v9246_v59, 2 }
  0xda   : > { %v9252_v42 = vsel %vm1368_vm5, %v1380_v38, %v1382_v44 }
  0xde   : > { %7237 = vmatmul.mubr.msk.bf16.gmra.mrb[92].mxu0 %vm585_vm2, %v9237_v41 }
  0xdf   : > { %7285 = vmatmul.mubr.msk.bf16.gmra.mrb[92].mxu1 %vm585_vm2, %v8890_v62  ;;  %7240 = vmatprep.mubr.msk.bf16.mxu0 %vm8506_vm0, %v8505_v1  ;;  %v9261_v62 = vrot.slane %v8860_v50, 2 }
  0xe0   : > { %7288 = vmatprep.mubr.msk.bf16.mxu1 %vm8506_vm0, %v8505_v1 }
  0xe1   : > { %v9267_v49 = vsel %vm1368_vm5, %v1382_v44, %v9261_v62 }
  0xe6   : > { %7241 = vmatmul.mubr.msk.bf16.gmra.mrb[96].mxu0 %vm585_vm2, %v9252_v42 }
  0xe7   : > { %7289 = vmatmul.mubr.msk.bf16.gmra.mrb[96].mxu1 %vm585_vm2, %v8906_v2  ;;  %7244 = vmatprep.mubr.msk.bf16.mxu0 %vm8506_vm0, %v8505_v1 }
  0xe8   : > { %7292 = vmatprep.mubr.msk.bf16.mxu1 %vm8506_vm0, %v8505_v1 }
  0xee   : > { %7245 = vmatmul.mubr.msk.bf16.gmra.mrb[100].mxu0 %vm585_vm2, %v9267_v49 }
  0xef   : > { %7293 = vmatmul.mubr.msk.bf16.gmra.mrb[100].mxu1 %vm585_vm2, %v8918_v6  ;;  %7248 = vmatprep.mubr.msk.bf16.mxu0 %vm8506_vm0, %v8505_v1 }
  0xf0   : > { %7296 = vmatprep.mubr.msk.bf16.mxu1 %vm8506_vm0, %v8505_v1 }
  0xf6   : > { %7249 = vmatmul.mubr.msk.bf16.gmra.mrb[104].mxu0 %vm585_vm2, %v9261_v62 }
  0xf7   : > { %7297 = vmatmul.mubr.msk.bf16.gmra.mrb[104].mxu1 %vm585_vm2, %v8929_v8  ;;  %7312 = vmatprep.mubr.msk.bf16.mxu0 %vm8506_vm0, %v8505_v1  ;;  %v8255_v8 = vld [vmem:[%s11231_s1 + $0x1b0] sm:$0xff]  }
  0xf8   : > { %7360 = vmatprep.mubr.msk.bf16.mxu1 %vm8506_vm0, %v8505_v1 }
  0xf9   : > { %v647_v50 = vpop.f32.mrb[0].mxu0 }
  0xfa   : > { %v810_v2 = vpop.f32.mrb[0].mxu1  ;;  %v7026_v6 = vpop.f32.mrb[1].mxu0 }
  0xfb   : > { %v9285_v58 = vadd.f32 %v810_v2, %v647_v50  ;;  %v7074_v53 = vpop.f32.mrb[1].mxu1  ;;  %v650_v54 = vpop.f32.mrb[2].mxu0 }
  0xfc   : > { %v813_v3 = vpop.f32.mrb[2].mxu1  ;;  %v7027_v5 = vpop.f32.mrb[3].mxu0 }
  0xfd   : > { %v9293_v7 = vadd.f32 %v813_v3, %v650_v54  ;;  %v7075_v51 = vpop.f32.mrb[3].mxu1 }
  0xfe   : > { %7313 = vmatmul.mubr.msk.bf16.vlgmr.msra.gmra.mrb[108].mxu0 %vm585_vm2, %v8666_v12  ;;  %v8264_v51 = vld [vmem:[%s11231_s1 + $0x1a8] sm:$0xff]  }
  0xff   : > { %7361 = vmatmul.mubr.msk.bf16.vlgmr.msra.gmra.mrb[108].mxu1 %vm585_vm2, %v8950_v18  ;;  %7397 = vmatpush3.bf16.msra.mxu0 %v8254_v45  ;;  %v8262_v45 = vld [vmem:[%s11231_s1 + $0x1a0] sm:$0xff]  }
 0x100   : > { %7445 = vmatpush3.bf16.msra.mxu1 %v8255_v8  ;;  %7316 = vmatprep.mubr.msk.bf16.mxu0 %vm8506_vm0, %v8505_v1  ;;  %v8263_v8 = vld [vmem:[%s11231_s1 + $0x1d0] sm:$0xff]  }
 0x101   : > { %v655_v15 = vpop.f32.mrb[4].mxu0  ;;  %7364 = vmatprep.mubr.msk.bf16.mxu1 %vm8506_vm0, %v8505_v1  ;;  %7398 = vmatprep.subr.bf16.mxu0 %v8505_v1 }
 0x102   : > { %v818_v12 = vpop.f32.mrb[4].mxu1  ;;  %v7030_v18 = vpop.f32.mrb[5].mxu0  ;;  %7446 = vmatprep.subr.bf16.mxu1 %v8505_v1 }
 0x103   : > { %v9311_v16 = vadd.f32 %v818_v12, %v655_v15  ;;  %v7078_v13 = vpop.f32.mrb[5].mxu1  ;;  %v658_v57 = vpop.f32.mrb[6].mxu0  ;;  %7399 = vmatpush3.bf16.msra.mxu0 %v8256_v55 }
 0x104   : > { %v821_v39 = vpop.f32.mrb[6].mxu1  ;;  %v7031_v20 = vpop.f32.mrb[7].mxu0  ;;  %7447 = vmatpush3.bf16.msra.mxu1 %v8257_v14  ;;  %7400 = vmatprep.subr.bf16.mxu0 %v8505_v1 }
 0x105   : > { %v9317_v32 = vadd.f32 %v821_v39, %v658_v57  ;;  %v7079_v24 = vpop.f32.mrb[7].mxu1  ;;  %7448 = vmatprep.subr.bf16.mxu1 %v8505_v1 }
 0x106   : > { %7317 = vmatmul.mubr.msk.bf16.gmra.mrb[112].mxu0 %vm585_vm2, %v9108_v0  ;;  %v8261_v0 = vld [vmem:[%s11231_s1 + $0x1c8] sm:$0xff]  }
 0x107   : > { %7365 = vmatmul.mubr.msk.bf16.gmra.mrb[112].mxu1 %vm585_vm2, %v8974_v21  ;;  %7320 = vmatprep.mubr.msk.bf16.mxu0 %vm8506_vm0, %v8505_v1 }
 0x108   : > { %7368 = vmatprep.mubr.msk.bf16.mxu1 %vm8506_vm0, %v8505_v1  ;;  %7401 = vmatpush3.bf16.msra.mxu0 %v8258_v23 }
 0x109   : > { %v663_v38 = vpop.f32.mrb[8].mxu0  ;;  %7449 = vmatpush3.bf16.msra.mxu1 %v8259_v60  ;;  %7402 = vmatprep.subr.bf16.mxu0 %v8505_v1 }
 0x10a   : > { %v826_v21 = vpop.f32.mrb[8].mxu1  ;;  %v7034_v44 = vpop.f32.mrb[9].mxu0  ;;  %7450 = vmatprep.subr.bf16.mxu1 %v8505_v1 }
 0x10b   : > { %v9339_v50 = vadd.f32 %v826_v21, %v663_v38  ;;  %v7082_v2 = vpop.f32.mrb[9].mxu1  ;;  %v666_v6 = vpop.f32.mrb[10].mxu0 }
 0x10c   : > { %v829_v53 = vpop.f32.mrb[10].mxu1  ;;  %v7035_v54 = vpop.f32.mrb[11].mxu0  ;;  %7403 = vmatpush3.bf16.msra.mxu0 %v8260_v33 }
 0x10d   : > { %v9344_v3 = vadd.f32 %v829_v53, %v666_v6  ;;  %v7083_v5 = vpop.f32.mrb[11].mxu1  ;;  %7451 = vmatpush3.bf16.msra.mxu1 %v8261_v0  ;;  %7404 = vmatprep.subr.bf16.mxu0 %v8505_v1 }
 0x10e   : > { %7321 = vmatmul.mubr.msk.bf16.gmra.mrb[116].mxu0 %vm585_vm2, %v9127_v10  ;;  %7452 = vmatprep.subr.bf16.mxu1 %v8505_v1  ;;  %v8265_v10 = vld [vmem:[%s11231_s1 + $0x1d8] sm:$0xff]  }
 0x10f   : > { %7369 = vmatmul.mubr.msk.bf16.gmra.mrb[116].mxu1 %vm585_vm2, %v9001_v30  ;;  %7324 = vmatprep.mubr.msk.bf16.mxu0 %vm8506_vm0, %v8505_v1 }
 0x110   : > { %7372 = vmatprep.mubr.msk.bf16.mxu1 %vm8506_vm0, %v8505_v1  ;;  %7405 = vmatpush3.bf16.msra.mxu0 %v8262_v45 }
 0x111   : > { %v671_v55 = vpop.f32.mrb[12].mxu0  ;;  %7453 = vmatpush3.bf16.msra.mxu1 %v8263_v8  ;;  %7406 = vmatprep.subr.bf16.mxu0 %v8505_v1 }
 0x112   : > { %v834_v30 = vpop.f32.mrb[12].mxu1  ;;  %v7038_v14 = vpop.f32.mrb[13].mxu0  ;;  %7454 = vmatprep.subr.bf16.mxu1 %v8505_v1 }
 0x113   : > { %v9367_v15 = vadd.f32 %v834_v30, %v671_v55  ;;  %v7086_v12 = vpop.f32.mrb[13].mxu1  ;;  %v674_v18 = vpop.f32.mrb[14].mxu0 }
 0x114   : > { %v837_v13 = vpop.f32.mrb[14].mxu1  ;;  %v7039_v57 = vpop.f32.mrb[15].mxu0  ;;  %7407 = vmatpush3.bf16.msra.mxu0 %v8264_v51 }
 0x115   : > { %v9369_v39 = vadd.f32 %v837_v13, %v674_v18  ;;  %v7087_v20 = vpop.f32.mrb[15].mxu1  ;;  %7455 = vmatpush3.bf16.msra.mxu1 %v8265_v10  ;;  %7492 = vmatprep.subr.bf16.mxu0 %v8505_v1 }
 0x116   : > { %7325 = vmatmul.mubr.msk.bf16.gmra.mrb[120].mxu0 %vm585_vm2, %v9160_v17  ;;  %7544 = vmatprep.subr.bf16.mxu1 %v8505_v1 }
 0x117   : > { %7373 = vmatmul.mubr.msk.bf16.gmra.mrb[120].mxu1 %vm585_vm2, %v9026_v40  ;;  %7328 = vmatprep.mubr.msk.bf16.mxu0 %vm8506_vm0, %v8505_v1 }
 0x118   : > { %7376 = vmatprep.mubr.msk.bf16.mxu1 %vm8506_vm0, %v8505_v1 }
 0x119   : > { %v679_v23 = vpop.f32.mrb[16].mxu0 }
 0x11a   : > { %v842_v24 = vpop.f32.mrb[16].mxu1  ;;  %v7042_v60 = vpop.f32.mrb[17].mxu0 }
 0x11b   : > { %v9381_v33 = vadd.f32 %v842_v24, %v679_v23  ;;  %v7090_v38 = vpop.f32.mrb[17].mxu1  ;;  %v682_v0 = vpop.f32.mrb[18].mxu0 }
 0x11c   : > { %v845_v21 = vpop.f32.mrb[18].mxu1  ;;  %v7043_v17 = vpop.f32.mrb[19].mxu0 }
 0x11d   : > { %v9383_v44 = vadd.f32 %v845_v21, %v682_v0  ;;  %v7091_v2 = vpop.f32.mrb[19].mxu1 }
 0x11e   : > { %7329 = vmatmul.mubr.msk.bf16.gmra.mrb[124].mxu0 %vm585_vm2, %v9191_v22 }
 0x11f   : > { %7377 = vmatmul.mubr.msk.bf16.gmra.mrb[124].mxu1 %vm585_vm2, %v9040_v37  ;;  %7332 = vmatprep.mubr.msk.bf16.mxu0 %vm8506_vm0, %v8505_v1 }
 0x120   : > { %7380 = vmatprep.mubr.msk.bf16.mxu1 %vm8506_vm0, %v8505_v1 }
 0x121   : > { %v687_v40 = vpop.f32.mrb[20].mxu0 }
 0x122   : > { %v850_v6 = vpop.f32.mrb[20].mxu1  ;;  %v7046_v53 = vpop.f32.mrb[21].mxu0 }
 0x123   : > { %v9393_v54 = vadd.f32 %v850_v6, %v687_v40  ;;  %v7094_v45 = vpop.f32.mrb[21].mxu1  ;;  %v690_v5 = vpop.f32.mrb[22].mxu0 }
 0x124   : > { %v853_v8 = vpop.f32.mrb[22].mxu1  ;;  %v7047_v51 = vpop.f32.mrb[23].mxu0 }
 0x125   : > { %v9395_v55 = vadd.f32 %v853_v8, %v690_v5  ;;  %v7095_v22 = vpop.f32.mrb[23].mxu1 }
 0x126   : > { %7333 = vmatmul.mubr.msk.bf16.gmra.mrb[128].mxu0 %vm585_vm2, %v9216_v31 }
 0x127   : > { %7381 = vmatmul.mubr.msk.bf16.gmra.mrb[128].mxu1 %vm585_vm2, %v9056_v47  ;;  %7336 = vmatprep.mubr.msk.bf16.mxu0 %vm8506_vm0, %v8505_v1 }
 0x128   : > { %7384 = vmatprep.mubr.msk.bf16.mxu1 %vm8506_vm0, %v8505_v1 }
 0x129   : > { %v695_v37 = vpop.f32.mrb[24].mxu0 }
 0x12a   : > { %v858_v10 = vpop.f32.mrb[24].mxu1  ;;  %v7050_v30 = vpop.f32.mrb[25].mxu0 }
 0x12b   : > { %v9405_v14 = vadd.f32 %v858_v10, %v695_v37  ;;  %v7098_v12 = vpop.f32.mrb[25].mxu1  ;;  %v698_v18 = vpop.f32.mrb[26].mxu0 }
 0x12c   : > { %v861_v13 = vpop.f32.mrb[26].mxu1  ;;  %v7051_v57 = vpop.f32.mrb[27].mxu0 }
 0x12d   : > { %v9407_v20 = vadd.f32 %v861_v13, %v698_v18  ;;  %v7099_v31 = vpop.f32.mrb[27].mxu1 }
 0x12e   : > { %7337 = vmatmul.mubr.msk.bf16.gmra.mrb[132].mxu0 %vm585_vm2, %v9231_v34 }
 0x12f   : > { %7385 = vmatmul.mubr.msk.bf16.gmra.mrb[132].mxu1 %vm585_vm2, %v9069_v48  ;;  %7340 = vmatprep.mubr.msk.bf16.mxu0 %vm8506_vm0, %v8505_v1 }
 0x130   : > { %7388 = vmatprep.mubr.msk.bf16.mxu1 %vm8506_vm0, %v8505_v1 }
 0x131   : > { %v703_v47 = vpop.f32.mrb[28].mxu0 }
 0x132   : > { %v866_v23 = vpop.f32.mrb[28].mxu1  ;;  %v7054_v24 = vpop.f32.mrb[29].mxu0 }
 0x133   : > { %v9417_v60 = vadd.f32 %v866_v23, %v703_v47  ;;  %v7102_v38 = vpop.f32.mrb[29].mxu1  ;;  %v706_v0 = vpop.f32.mrb[30].mxu0 }
 0x134   : > { %v869_v21 = vpop.f32.mrb[30].mxu1  ;;  %v7055_v17 = vpop.f32.mrb[31].mxu0 }
 0x135   : > { %v9419_v2 = vadd.f32 %v869_v21, %v706_v0  ;;  %v7103_v34 = vpop.f32.mrb[31].mxu1 }
 0x136   : > { %7341 = vmatmul.mubr.msk.bf16.gmra.mrb[136].mxu0 %vm585_vm2, %v9246_v59 }
 0x137   : > { %7389 = vmatmul.mubr.msk.bf16.gmra.mrb[136].mxu1 %vm585_vm2, %v9083_v56  ;;  %7344 = vmatprep.mubr.msk.bf16.mxu0 %vm8506_vm0, %v8505_v1 }
 0x138   : > { %7392 = vmatprep.mubr.msk.bf16.mxu1 %vm8506_vm0, %v8505_v1 }
 0x139   : > { %v711_v48 = vpop.f32.mrb[32].mxu0 }
 0x13a   : > { %v874_v40 = vpop.f32.mrb[32].mxu1  ;;  %v7058_v6 = vpop.f32.mrb[33].mxu0 }
 0x13b   : > { %v9429_v53 = vadd.f32 %v874_v40, %v711_v48  ;;  %v7106_v45 = vpop.f32.mrb[33].mxu1  ;;  %v714_v5 = vpop.f32.mrb[34].mxu0 }
 0x13c   : > { %v877_v8 = vpop.f32.mrb[34].mxu1  ;;  %v7059_v51 = vpop.f32.mrb[35].mxu0 }
 0x13d   : > { %v9431_v22 = vadd.f32 %v877_v8, %v714_v5  ;;  %v7107_v59 = vpop.f32.mrb[35].mxu1 }
 0x13e   : > { %7345 = vmatmul.mubr.msk.bf16.gmra.mrb[140].mxu0 %vm585_vm2, %v8931_v11 }
 0x13f   : > { %7393 = vmatmul.mubr.msk.bf16.gmra.mrb[140].mxu1 %vm585_vm2, %v9045_v46  ;;  %7408 = vmatprep.mubr.msk.bf16.mxu0 %vm8506_vm0, %v8505_v1 }
 0x140   : > { %7456 = vmatprep.mubr.msk.bf16.mxu1 %vm8506_vm0, %v8505_v1 }
 0x141   : > { %v1013_v56 = vpop.f32.mrb[36].mxu0 }
 0x142   : > { %v1084_v37 = vadd.f32 %v1013_v56, %v9285_v58  ;;  %v1262_v10 = vpop.f32.mrb[36].mxu1  ;;  %v7122_v30 = vpop.f32.mrb[37].mxu0 }
 0x143   : > { %v7170_v12 = vpop.f32.mrb[37].mxu1  ;;  %v1016_v18 = vpop.f32.mrb[38].mxu0 }
 0x144   : > { %v9442_v13 = vadd.f32 %v1262_v10, %v1084_v37  ;;  %v1085_v11 = vadd.f32 %v1016_v18, %v9293_v7  ;;  %v1265_v57 = vpop.f32.mrb[38].mxu1  ;;  %v7123_v31 = vpop.f32.mrb[39].mxu0 }
 0x145   : > { %v7171_v46 = vpop.f32.mrb[39].mxu1 }
 0x146   : > { %v9445_v47 = vadd.f32 %v1265_v57, %v1085_v11  ;;  %7409 = vmatmul.mubr.msk.bf16.vlgmr.msra.gmra.mrb[144].mxu0 %vm585_vm2, %v8820_v25 }
 0x147   : > { %7457 = vmatmul.mubr.msk.bf16.vlgmr.msra.gmra.mrb[144].mxu1 %vm585_vm2, %v9114_v4  ;;  %7412 = vmatprep.mubr.msk.bf16.mxu0 %vm8506_vm0, %v8505_v1 }
 0x148   : > { %7460 = vmatprep.mubr.msk.bf16.mxu1 %vm8506_vm0, %v8505_v1 }
 0x149   : > { %v1021_v58 = vpop.f32.mrb[40].mxu0 }
 0x14a   : > { %v1086_v7 = vadd.f32 %v1021_v58, %v9311_v16  ;;  %v1270_v23 = vpop.f32.mrb[40].mxu1  ;;  %v7126_v24 = vpop.f32.mrb[41].mxu0 }
 0x14b   : > { %v7174_v38 = vpop.f32.mrb[41].mxu1  ;;  %v1024_v0 = vpop.f32.mrb[42].mxu0 }
 0x14c   : > { %v9456_v21 = vadd.f32 %v1270_v23, %v1086_v7  ;;  %v1087_v25 = vadd.f32 %v1024_v0, %v9317_v32  ;;  %v1273_v17 = vpop.f32.mrb[42].mxu1  ;;  %v7127_v34 = vpop.f32.mrb[43].mxu0 }
 0x14d   : > { %v7175_v4 = vpop.f32.mrb[43].mxu1 }
 0x14e   : > { %v9459_v48 = vadd.f32 %v1273_v17, %v1087_v25  ;;  %7413 = vmatmul.mubr.msk.bf16.gmra.mrb[148].mxu0 %vm585_vm2, %v8795_v9 }
 0x14f   : > { %7461 = vmatmul.mubr.msk.bf16.gmra.mrb[148].mxu1 %vm585_vm2, %v9143_v28  ;;  %7416 = vmatprep.mubr.msk.bf16.mxu0 %vm8506_vm0, %v8505_v1 }
 0x150   : > { %7464 = vmatprep.mubr.msk.bf16.mxu1 %vm8506_vm0, %v8505_v1 }
 0x151   : > { %v1029_v16 = vpop.f32.mrb[44].mxu0 }
 0x152   : > { %v1088_v32 = vadd.f32 %v1029_v16, %v9339_v50  ;;  %v1278_v40 = vpop.f32.mrb[44].mxu1  ;;  %v7130_v6 = vpop.f32.mrb[45].mxu0 }
 0x153   : > { %v7178_v45 = vpop.f32.mrb[45].mxu1  ;;  %v1032_v5 = vpop.f32.mrb[46].mxu0 }
 0x154   : > { %v9470_v8 = vadd.f32 %v1278_v40, %v1088_v32  ;;  %v1089_v9 = vadd.f32 %v1032_v5, %v9344_v3  ;;  %v1281_v51 = vpop.f32.mrb[46].mxu1  ;;  %v7131_v59 = vpop.f32.mrb[47].mxu0 }
 0x155   : > { %v7179_v28 = vpop.f32.mrb[47].mxu1 }
 0x156   : > { %v9473_v56 = vadd.f32 %v1281_v51, %v1089_v9  ;;  %7417 = vmatmul.mubr.msk.bf16.gmra.mrb[152].mxu0 %vm585_vm2, %v8824_v29 }
 0x157   : > { %7465 = vmatmul.mubr.msk.bf16.gmra.mrb[152].mxu1 %vm585_vm2, %v9174_v19  ;;  %7420 = vmatprep.mubr.msk.bf16.mxu0 %vm8506_vm0, %v8505_v1 }
 0x158   : > { %7468 = vmatprep.mubr.msk.bf16.mxu1 %vm8506_vm0, %v8505_v1 }
 0x159   : > { %v1037_v50 = vpop.f32.mrb[48].mxu0 }
 0x15a   : > { %v1090_v3 = vadd.f32 %v1037_v50, %v9367_v15  ;;  %v1286_v37 = vpop.f32.mrb[48].mxu1  ;;  %v7134_v10 = vpop.f32.mrb[49].mxu0 }
 0x15b   : > { %v7182_v30 = vpop.f32.mrb[49].mxu1  ;;  %v1040_v12 = vpop.f32.mrb[50].mxu0 }
 0x15c   : > { %v9484_v18 = vadd.f32 %v1286_v37, %v1090_v3  ;;  %v1091_v29 = vadd.f32 %v1040_v12, %v9369_v39  ;;  %v1289_v11 = vpop.f32.mrb[50].mxu1  ;;  %v7135_v57 = vpop.f32.mrb[51].mxu0 }
 0x15d   : > { %v7183_v19 = vpop.f32.mrb[51].mxu1 }
 0x15e   : > { %v9487_v31 = vadd.f32 %v1289_v11, %v1091_v29  ;;  %7421 = vmatmul.mubr.msk.bf16.gmra.mrb[156].mxu0 %vm585_vm2, %v8835_v27 }
 0x15f   : > { %7469 = vmatmul.mubr.msk.bf16.gmra.mrb[156].mxu1 %vm585_vm2, %v9205_v26  ;;  %7424 = vmatprep.mubr.msk.bf16.mxu0 %vm8506_vm0, %v8505_v1 }
 0x160   : > { %7472 = vmatprep.mubr.msk.bf16.mxu1 %vm8506_vm0, %v8505_v1 }
 0x161   : > { %v1045_v15 = vpop.f32.mrb[52].mxu0 }
 0x162   : > { %v1092_v39 = vadd.f32 %v1045_v15, %v9381_v33  ;;  %v1294_v46 = vpop.f32.mrb[52].mxu1  ;;  %v7138_v58 = vpop.f32.mrb[53].mxu0 }
 0x163   : > { %v7186_v7 = vpop.f32.mrb[53].mxu1  ;;  %v1048_v23 = vpop.f32.mrb[54].mxu0 }
 0x164   : > { %v9498_v24 = vadd.f32 %v1294_v46, %v1092_v39  ;;  %v1093_v27 = vadd.f32 %v1048_v23, %v9383_v44  ;;  %v1297_v38 = vpop.f32.mrb[54].mxu1  ;;  %v7139_v0 = vpop.f32.mrb[55].mxu0 }
 0x165   : > { %v7187_v26 = vpop.f32.mrb[55].mxu1 }
 0x166   : > { %v9501_v25 = vadd.f32 %v1297_v38, %v1093_v27  ;;  %7425 = vmatmul.mubr.msk.bf16.gmra.mrb[160].mxu0 %vm585_vm2, %v8838_v36 }
 0x167   : > { %7473 = vmatmul.mubr.msk.bf16.gmra.mrb[160].mxu1 %vm585_vm2, %v9222_v35  ;;  %7428 = vmatprep.mubr.msk.bf16.mxu0 %vm8506_vm0, %v8505_v1 }
 0x168   : > { %7476 = vmatprep.mubr.msk.bf16.mxu1 %vm8506_vm0, %v8505_v1 }
 0x169   : > { %v1053_v33 = vpop.f32.mrb[56].mxu0 }
 0x16a   : > { %v1094_v44 = vadd.f32 %v1053_v33, %v9393_v54  ;;  %v1302_v17 = vpop.f32.mrb[56].mxu1  ;;  %v7142_v34 = vpop.f32.mrb[57].mxu0  ;;  %v9573_v33 = vld [vmem:[%s11232_s2] ss:$0 sm:$0xff] }
 0x16b   : > { %v7190_v4 = vpop.f32.mrb[57].mxu1  ;;  %v1056_v16 = vpop.f32.mrb[58].mxu0 }
 0x16c   : > { %v9512_v32 = vadd.f32 %v1302_v17, %v1094_v44  ;;  %v1095_v36 = vadd.f32 %v1056_v16, %v9395_v55  ;;  %v1305_v40 = vpop.f32.mrb[58].mxu1  ;;  %v7143_v6 = vpop.f32.mrb[59].mxu0 }
 0x16d   : > { %v7191_v35 = vpop.f32.mrb[59].mxu1  ;;  %v8268_v6 = vld [vmem:[%s11233_s3 + $0x48] sm:$0xff]  }
 0x16e   : > { %v9515_v45 = vadd.f32 %v1305_v40, %v1095_v36  ;;  %7429 = vmatmul.mubr.msk.bf16.gmra.mrb[164].mxu0 %vm585_vm2, %v8847_v43 }
 0x16f   : > { %7477 = vmatmul.mubr.msk.bf16.gmra.mrb[164].mxu1 %vm585_vm2, %v9237_v41  ;;  %7432 = vmatprep.mubr.msk.bf16.mxu0 %vm8506_vm0, %v8505_v1 }
 0x170   : > { %7480 = vmatprep.mubr.msk.bf16.mxu1 %vm8506_vm0, %v8505_v1 }
 0x171   : > { %v1061_v54 = vpop.f32.mrb[60].mxu0 }
 0x172   : > { %v1096_v55 = vadd.f32 %v1061_v54, %v9405_v14  ;;  %v1310_v5 = vpop.f32.mrb[60].mxu1  ;;  %v7146_v9 = vpop.f32.mrb[61].mxu0 }
 0x173   : > { %v7194_v51 = vpop.f32.mrb[61].mxu1  ;;  %v1064_v59 = vpop.f32.mrb[62].mxu0 }
 0x174   : > { %v9526_v28 = vadd.f32 %v1310_v5, %v1096_v55  ;;  %v1097_v43 = vadd.f32 %v1064_v59, %v9407_v20  ;;  %v1313_v50 = vpop.f32.mrb[62].mxu1  ;;  %v7147_v3 = vpop.f32.mrb[63].mxu0  ;;  %v8269_v55 = vld [vmem:[%s11233_s3 + $0x8] sm:$0xff]  }
 0x175   : > { %v7195_v41 = vpop.f32.mrb[63].mxu1 }
 0x176   : > { %v9529_v37 = vadd.f32 %v1313_v50, %v1097_v43  ;;  %7433 = vmatmul.mubr.msk.bf16.gmra.mrb[168].mxu0 %vm585_vm2, %v8869_v52 }
 0x177   : > { %7481 = vmatmul.mubr.msk.bf16.gmra.mrb[168].mxu1 %vm585_vm2, %v9252_v42  ;;  %7436 = vmatprep.mubr.msk.bf16.mxu0 %vm8506_vm0, %v8505_v1 }
 0x178   : > { %7484 = vmatprep.mubr.msk.bf16.mxu1 %vm8506_vm0, %v8505_v1 }
 0x179   : > { %v1069_v14 = vpop.f32.mrb[64].mxu0 }
 0x17a   : > { %v1098_v20 = vadd.f32 %v1069_v14, %v9417_v60  ;;  %v1318_v10 = vpop.f32.mrb[64].mxu1  ;;  %v7150_v30 = vpop.f32.mrb[65].mxu0 }
 0x17b   : > { %v7198_v12 = vpop.f32.mrb[65].mxu1  ;;  %v1072_v29 = vpop.f32.mrb[66].mxu0 }
 0x17c   : > { %v9540_v11 = vadd.f32 %v1318_v10, %v1098_v20  ;;  %v1099_v52 = vadd.f32 %v1072_v29, %v9419_v2  ;;  %v1321_v57 = vpop.f32.mrb[66].mxu1  ;;  %v7151_v19 = vpop.f32.mrb[67].mxu0 }
 0x17d   : > { %v7199_v42 = vpop.f32.mrb[67].mxu1  ;;  %v8270_v19 = vld [vmem:[%s11233_s3 + $0x50] sm:$0xff]  }
 0x17e   : > { %v9543_v15 = vadd.f32 %v1321_v57, %v1099_v52  ;;  %7437 = vmatmul.mubr.msk.bf16.gmra.mrb[172].mxu0 %vm585_vm2, %v9088_v63  ;;  %v8271_v42 = vld [vmem:[%s11233_s3 + $0x10] sm:$0xff]  }
 0x17f   : > { %7485 = vmatmul.mubr.msk.bf16.gmra.mrb[172].mxu1 %vm585_vm2, %v9267_v49  ;;  %7440 = vmatprep.mubr.msk.bf16.mxu0 %vm8506_vm0, %v8505_v1  ;;  %v8266_v49 = vld [vmem:[%s11233_s3 + $0x40] sm:$0xff]  }
 0x180   : > { %7488 = vmatprep.mubr.msk.bf16.mxu1 %vm8506_vm0, %v8505_v1  ;;  %7493 = vmatpush3.bf16.msra.mxu0 %v8266_v49 }
 0x181   : > { %v1077_v60 = vpop.f32.mrb[68].mxu0  ;;  %7494 = vmatprep.subr.bf16.mxu0 %v8505_v1 }
 0x182   : > { %v1100_v2 = vadd.f32 %v1077_v60, %v9429_v53  ;;  %v1326_v39 = vpop.f32.mrb[68].mxu1  ;;  %v7154_v46 = vpop.f32.mrb[69].mxu0  ;;  %v8267_v53 = vld [vmem:[%s11233_s3] sm:$0xff]  }
 0x183   : > { %v7202_v58 = vpop.f32.mrb[69].mxu1  ;;  %v1080_v7 = vpop.f32.mrb[70].mxu0  ;;  %7545 = vmatpush3.bf16.msra.mxu1 %v8267_v53 }
 0x184   : > { %v9554_v23 = vadd.f32 %v1326_v39, %v1100_v2  ;;  %v1101_v63 = vadd.f32 %v1080_v7, %v9431_v22  ;;  %v1329_v27 = vpop.f32.mrb[70].mxu1  ;;  %v7155_v38 = vpop.f32.mrb[71].mxu0  ;;  %7546 = vmatprep.subr.bf16.mxu1 %v8505_v1  ;;  %7495 = vmatpush3.bf16.msra.mxu0 %v8268_v6 }
 0x185   : > { %v7203_v0 = vpop.f32.mrb[71].mxu1  ;;  %7496 = vmatprep.subr.bf16.mxu0 %v8505_v1 }
 0x186   : > { %v9560_v26 = vadd.f32 %v1329_v27, %v1101_v63  ;;  %7441 = vmatmul.mubr.msk.bf16.gmra.mrb[176].mxu0 %vm585_vm2, %v9079_v61 }
 0x187   : > { %7489 = vmatmul.mubr.msk.bf16.gmra.mrb[176].mxu1 %vm585_vm2, %v9261_v62  ;;  %7508 = vmatprep.mubr.msk.bf16.mxu0 %vm8506_vm0, %v8505_v1 }
 0x188   : > { %7560 = vmatprep.mubr.msk.bf16.mxu1 %vm8506_vm0, %v8505_v1  ;;  %7547 = vmatpush3.bf16.msra.mxu1 %v8269_v55 }
 0x189   : > { %v1483_v22 = vpop.f32.mrb[72].mxu0  ;;  %7548 = vmatprep.subr.bf16.mxu1 %v8505_v1  ;;  %7497 = vmatpush3.bf16.msra.mxu0 %v8270_v19 }
 0x18a   : > { %v1554_v61 = vadd.f32 %v1483_v22, %v9442_v13  ;;  %v9579_v44 = vpop.f32.mrb[72].mxu1  ;;  %v7218_v62 = vpop.f32.mrb[73].mxu0  ;;  %7498 = vmatprep.subr.bf16.mxu0 %v8505_v1 }
 0x18b   : > { %v7266_v17 = vpop.f32.mrb[73].mxu1  ;;  %v1486_v34 = vpop.f32.mrb[74].mxu0 }
 0x18c   : > { %v1579_v4 = vadd.f32 %v9573_v33, %v1554_v61  ;;  %v1555_v16 = vadd.f32 %v1486_v34, %v9445_v47  ;;  %v9585_v36 = vpop.f32.mrb[74].mxu1  ;;  %v7219_v40 = vpop.f32.mrb[75].mxu0  ;;  %7549 = vmatpush3.bf16.msra.mxu1 %v8271_v42 }
 0x18d   : > { %v7267_v13 = vpop.f32.mrb[75].mxu1  ;;  %7550 = vmatprep.subr.bf16.mxu1 %v8505_v1 }
 0x18e   : > { %v1597_v35 = vmax.f32 %v1579_v4, 0.0  ;;  %v1580_v54 = vadd.f32 %v9573_v33, %v1555_v16 }
 0x190   : > { %v1598_v5 = vmax.f32 %v1580_v54, 0.0  ;;  %v1634_v9 = vrot.slane %v1597_v35, 1 }
 0x191   : > { %v1491_v47 = vpop.f32.mrb[76].mxu0 }
 0x192   : > { %v1635_v51 = vrot.slane %v1598_v5, 1  ;;  %v1556_v59 = vadd.f32 %v1491_v47, %v9456_v21  ;;  %v9597_v43 = vpop.f32.mrb[76].mxu1  ;;  %v7222_v50 = vpop.f32.mrb[77].mxu0 }
 0x193   : > { %v7270_v3 = vpop.f32.mrb[77].mxu1  ;;  %v1494_v41 = vpop.f32.mrb[78].mxu0 }
 0x194   : > { %v1636_v14 = vsel %vm898_vm4, %v1634_v9, %v1635_v51  ;;  %v1581_v20 = vadd.f32 %v9573_v33, %v1556_v59  ;;  %v1557_v10 = vadd.f32 %v1494_v41, %v9459_v48  ;;  %v9602_v30 = vpop.f32.mrb[78].mxu1  ;;  %v7223_v12 = vpop.f32.mrb[79].mxu0 }
 0x195   : > { %v9604_v29 = vmax.f32 %v1597_v35, %v1636_v14  ;;  %v7271_v52 = vpop.f32.mrb[79].mxu1 }
 0x196   : > { %v1599_v57 = vmax.f32 %v1581_v20, 0.0  ;;  %v1582_v21 = vadd.f32 %v9573_v33, %v1557_v10 }
 0x198   : > { %v1637_v60 = vrot.slane %v1599_v57, 1  ;;  %v1600_v2 = vmax.f32 %v1582_v21, 0.0  ;;  %v8272_v21 = vld [vmem:[%s11233_s3 + $0x58] sm:$0xff]  }
 0x199   : > { %v1499_v48 = vpop.f32.mrb[80].mxu0  ;;  %7499 = vmatpush3.bf16.msra.mxu0 %v8272_v21 }
 0x19a   : > { %v1638_v39 = vsel %vm898_vm4, %v1635_v51, %v1637_v60  ;;  %v1639_v46 = vrot.slane %v1600_v2, 1  ;;  %v1558_v58 = vadd.f32 %v1499_v48, %v9470_v8  ;;  %v9617_v7 = vpop.f32.mrb[80].mxu1  ;;  %v7226_v63 = vpop.f32.mrb[81].mxu0  ;;  %7500 = vmatprep.subr.bf16.mxu0 %v8505_v1 }
 0x19b   : > { %v9619_v27 = vmax.f32 %v1598_v5, %v1638_v39  ;;  %v7274_v38 = vpop.f32.mrb[81].mxu1  ;;  %v1502_v49 = vpop.f32.mrb[82].mxu0 }
 0x19c   : > { %v1640_v0 = vsel %vm898_vm4, %v1637_v60, %v1639_v46  ;;  %v1583_v53 = vadd.f32 %v9573_v33, %v1558_v58  ;;  %v1559_v22 = vadd.f32 %v1502_v49, %v9473_v56  ;;  %v9624_v61 = vpop.f32.mrb[82].mxu1  ;;  %v7227_v62 = vpop.f32.mrb[83].mxu0 }
 0x19d   : > { %v9626_v17 = vmax.f32 %v1599_v57, %v1640_v0  ;;  %v7275_v34 = vpop.f32.mrb[83].mxu1  ;;  %v8275_v62 = vld [vmem:[%s11233_s3 + $0x20] sm:$0xff]  }
 0x19e   : > { %v1601_v8 = vmax.f32 %v1583_v53, 0.0  ;;  %v1584_v4 = vadd.f32 %v9573_v33, %v1559_v22 }
 0x1a0   : > { %v1641_v16 = vrot.slane %v1601_v8, 1  ;;  %v1602_v40 = vmax.f32 %v1584_v4, 0.0 }
 0x1a1   : > { %v1507_v6 = vpop.f32.mrb[84].mxu0 }
 0x1a2   : > { %v1642_v13 = vsel %vm898_vm4, %v1639_v46, %v1641_v16  ;;  %v1643_v35 = vrot.slane %v1602_v40, 1  ;;  %v1560_v54 = vadd.f32 %v1507_v6, %v9484_v18  ;;  %v9631_v55 = vpop.f32.mrb[84].mxu1  ;;  %v7230_v56 = vpop.f32.mrb[85].mxu0 }
 0x1a3   : > { %v9633_v5 = vmax.f32 %v1600_v2, %v1642_v13  ;;  %v7278_v47 = vpop.f32.mrb[85].mxu1  ;;  %v1510_v9 = vpop.f32.mrb[86].mxu0 }
 0x1a4   : > { %v1644_v51 = vsel %vm898_vm4, %v1641_v16, %v1643_v35  ;;  %v1585_v59 = vadd.f32 %v9573_v33, %v1560_v54  ;;  %v1561_v50 = vadd.f32 %v1510_v9, %v9487_v31  ;;  %v9638_v3 = vpop.f32.mrb[86].mxu1  ;;  %v7231_v41 = vpop.f32.mrb[87].mxu0  ;;  %v8273_v31 = vld [vmem:[%s11233_s3 + $0x18] sm:$0xff]  }
 0x1a5   : > { %v9640_v14 = vmax.f32 %v1601_v8, %v1644_v51  ;;  %v7279_v20 = vpop.f32.mrb[87].mxu1  ;;  %7551 = vmatpush3.bf16.msra.mxu1 %v8273_v31 }
 0x1a6   : > { %v1603_v18 = vmax.f32 %v1585_v59, 0.0  ;;  %v1586_v10 = vadd.f32 %v9573_v33, %v1561_v50  ;;  %7552 = vmatprep.subr.bf16.mxu1 %v8505_v1  ;;  %v8274_v59 = vld [vmem:[%s11233_s3 + $0x60] sm:$0xff]  }
 0x1a7   : > { %7501 = vmatpush3.bf16.msra.mxu0 %v8274_v59 }
 0x1a8   : > { %v1645_v12 = vrot.slane %v1603_v18, 1  ;;  %v1604_v52 = vmax.f32 %v1586_v10, 0.0  ;;  %7502 = vmatprep.subr.bf16.mxu0 %v8505_v1 }
 0x1a9   : > { %v1515_v57 = vpop.f32.mrb[88].mxu0  ;;  %7553 = vmatpush3.bf16.msra.mxu1 %v8275_v62 }
 0x1aa   : > { %v1646_v19 = vsel %vm898_vm4, %v1643_v35, %v1645_v12  ;;  %v1647_v42 = vrot.slane %v1604_v52, 1  ;;  %v1562_v60 = vadd.f32 %v1515_v57, %v9498_v24  ;;  %v9651_v2 = vpop.f32.mrb[88].mxu1  ;;  %v7234_v48 = vpop.f32.mrb[89].mxu0  ;;  %7554 = vmatprep.subr.bf16.mxu1 %v8505_v1 }
 0x1ab   : > { %v9653_v39 = vmax.f32 %v1602_v40, %v1646_v19  ;;  %v7282_v46 = vpop.f32.mrb[89].mxu1  ;;  %v1518_v58 = vpop.f32.mrb[90].mxu0  ;;  %v8277_v40 = vld [vmem:[%s11233_s3 + $0x28] sm:$0xff]  }
 0x1ac   : > { %v1648_v63 = vsel %vm898_vm4, %v1645_v12, %v1647_v42  ;;  %v1587_v38 = vadd.f32 %v9573_v33, %v1562_v60  ;;  %v1563_v49 = vadd.f32 %v1518_v58, %v9501_v25  ;;  %v9658_v0 = vpop.f32.mrb[90].mxu1  ;;  %v7235_v53 = vpop.f32.mrb[91].mxu0 }
 0x1ad   : > { %v9662_v24 = vmax.f32 %v1603_v18, %v1648_v63  ;;  %v7283_v22 = vpop.f32.mrb[91].mxu1  ;;  %7555 = vmatpush3.bf16.msra.mxu1 %v8277_v40 }
 0x1ae   : > { %v1605_v34 = vmax.f32 %v1587_v38, 0.0  ;;  %v1588_v8 = vadd.f32 %v9573_v33, %v1563_v49  ;;  %7556 = vmatprep.subr.bf16.mxu1 %v8505_v1  ;;  %v8276_v22 = vld [vmem:[%s11233_s3 + $0x68] sm:$0xff]  }
 0x1af   : > { %7503 = vmatpush3.bf16.msra.mxu0 %v8276_v22 }
 0x1b0   : > { %v1649_v4 = vrot.slane %v1605_v34, 1  ;;  %v1606_v25 = vmax.f32 %v1588_v8, 0.0  ;;  %7504 = vmatprep.subr.bf16.mxu0 %v8505_v1 }
 0x1b1   : > { %v1523_v16 = vpop.f32.mrb[92].mxu0 }
 0x1b2   : > { %v1650_v6 = vsel %vm898_vm4, %v1647_v42, %v1649_v4  ;;  %v1651_v13 = vrot.slane %v1606_v25, 1  ;;  %v1564_v35 = vadd.f32 %v1523_v16, %v9512_v32  ;;  %v9674_v54 = vpop.f32.mrb[92].mxu1  ;;  %v7238_v56 = vpop.f32.mrb[93].mxu0  ;;  %v8280_v42 = vld [vmem:[%s11233_s3 + $0x38] sm:$0xff]  }
 0x1b3   : > { %v9676_v47 = vmax.f32 %v1604_v52, %v1650_v6  ;;  %v7286_v9 = vpop.f32.mrb[93].mxu1  ;;  %v1526_v51 = vpop.f32.mrb[94].mxu0  ;;  %v8278_v52 = vld [vmem:[%s11233_s3 + $0x30] sm:$0xff]  }
 0x1b4   : > { %v1652_v50 = vsel %vm898_vm4, %v1649_v4, %v1651_v13  ;;  %v1589_v41 = vadd.f32 %v9573_v33, %v1564_v35  ;;  %v1565_v20 = vadd.f32 %v1526_v51, %v9515_v45  ;;  %v9684_v18 = vpop.f32.mrb[94].mxu1  ;;  %v7239_v32 = vpop.f32.mrb[95].mxu0  ;;  %7557 = vmatpush3.bf16.msra.mxu1 %v8278_v52 }
 0x1b5   : > { %v9687_v10 = vmax.f32 %v1605_v34, %v1652_v50  ;;  %v7287_v12 = vpop.f32.mrb[95].mxu1  ;;  %7558 = vmatprep.subr.bf16.mxu1 %v8505_v1 }
 0x1b6   : > { %v1607_v57 = vmax.f32 %v1589_v41, 0.0  ;;  %v1590_v21 = vadd.f32 %v9573_v33, %v1565_v20 }
 0x1b8   : > { %v1653_v45 = vrot.slane %v1607_v57, 1  ;;  %v1608_v31 = vmax.f32 %v1590_v21, 0.0  ;;  %7559 = vmatpush3.bf16.msra.mxu1 %v8280_v42 }
 0x1b9   : > { %v1531_v19 = vpop.f32.mrb[96].mxu0  ;;  %7648 = vmatprep.subr.bf16.mxu1 %v8505_v1 }
 0x1ba   : > { %v1654_v60 = vsel %vm898_vm4, %v1651_v13, %v1653_v45  ;;  %v1655_v48 = vrot.slane %v1608_v31, 1  ;;  %v1566_v46 = vadd.f32 %v1531_v19, %v9526_v28  ;;  %v9700_v58 = vpop.f32.mrb[96].mxu1  ;;  %v7242_v63 = vpop.f32.mrb[97].mxu0  ;;  %v8279_v13 = vld [vmem:[%s11233_s3 + $0x70] sm:$0xff]  }
 0x1bb   : > { %v9702_v38 = vmax.f32 %v1606_v25, %v1654_v60  ;;  %v7290_v49 = vpop.f32.mrb[97].mxu1  ;;  %v1534_v53 = vpop.f32.mrb[98].mxu0  ;;  %7505 = vmatpush3.bf16.msra.mxu0 %v8279_v13 }
 0x1bc   : > { %v1656_v62 = vsel %vm898_vm4, %v1653_v45, %v1655_v48  ;;  %v1591_v34 = vadd.f32 %v9573_v33, %v1566_v46  ;;  %v1567_v8 = vadd.f32 %v1534_v53, %v9529_v37  ;;  %v9710_v4 = vpop.f32.mrb[98].mxu1  ;;  %v7243_v28 = vpop.f32.mrb[99].mxu0  ;;  %7506 = vmatprep.subr.bf16.mxu0 %v8505_v1 }
 0x1bd   : > { %v9713_v25 = vmax.f32 %v1607_v57, %v1656_v62  ;;  %v7291_v16 = vpop.f32.mrb[99].mxu1 }
 0x1be   : > { %v1609_v40 = vmax.f32 %v1591_v34, 0.0  ;;  %v1592_v6 = vadd.f32 %v9573_v33, %v1567_v8 }
 0x1c0   : > { %v1657_v35 = vrot.slane %v1609_v40, 1  ;;  %v1610_v37 = vmax.f32 %v1592_v6, 0.0 }
 0x1c1   : > { %v1539_v56 = vpop.f32.mrb[100].mxu0 }
 0x1c2   : > { %v1658_v9 = vsel %vm898_vm4, %v1655_v48, %v1657_v35  ;;  %v1659_v51 = vrot.slane %v1610_v37, 1  ;;  %v1568_v59 = vadd.f32 %v1539_v56, %v9540_v11  ;;  %v9722_v50 = vpop.f32.mrb[100].mxu1  ;;  %v7246_v41 = vpop.f32.mrb[101].mxu0  ;;  %v8282_v11 = vld [vmem:[%s11233_s3 + $0x78] sm:$0xff]  }
 0x1c3   : > { %v9725_v20 = vmax.f32 %v1608_v31, %v1658_v9  ;;  %v7294_v32 = vpop.f32.mrb[101].mxu1  ;;  %v1542_v12 = vpop.f32.mrb[102].mxu0  ;;  %7507 = vmatpush3.bf16.msra.mxu0 %v8282_v11 }
 0x1c4   : > { %v1660_v52 = vsel %vm898_vm4, %v1657_v35, %v1659_v51  ;;  %v1593_v57 = vadd.f32 %v9573_v33, %v1568_v59  ;;  %v1569_v21 = vadd.f32 %v1542_v12, %v9543_v15  ;;  %v9730_v45 = vpop.f32.mrb[102].mxu1  ;;  %v7247_v19 = vpop.f32.mrb[103].mxu0  ;;  %7596 = vmatprep.subr.bf16.mxu0 %v8505_v1 }
 0x1c5   : > { %v9735_v42 = vmax.f32 %v1609_v40, %v1660_v52  ;;  %v7295_v60 = vpop.f32.mrb[103].mxu1 }
 0x1c6   : > { %v1611_v31 = vmax.f32 %v1593_v57, 0.0  ;;  %v1594_v48 = vadd.f32 %v9573_v33, %v1569_v21 }
 0x1c8   : > { %v1661_v46 = vrot.slane %v1611_v31, 1  ;;  %v1612_v63 = vmax.f32 %v1594_v48, 0.0 }
 0x1c9   : > { %v1547_v49 = vpop.f32.mrb[104].mxu0 }
 0x1ca   : > { %v1662_v15 = vsel %vm898_vm4, %v1659_v51, %v1661_v46  ;;  %v1663_v53 = vrot.slane %v1612_v63, 1  ;;  %v1570_v22 = vadd.f32 %v1547_v49, %v9554_v23  ;;  %v9741_v62 = vpop.f32.mrb[104].mxu1  ;;  %v7250_v34 = vpop.f32.mrb[105].mxu0 }
 0x1cb   : > { %v9743_v8 = vmax.f32 %v1610_v37, %v1662_v15  ;;  %v7298_v28 = vpop.f32.mrb[105].mxu1  ;;  %v1550_v16 = vpop.f32.mrb[106].mxu0 }
 0x1cc   : > { %v1664_v40 = vsel %vm898_vm4, %v1661_v46, %v1663_v53  ;;  %v1595_v6 = vadd.f32 %v9573_v33, %v1570_v22  ;;  %v1571_v13 = vadd.f32 %v1550_v16, %v9560_v26  ;;  %v9748_v35 = vpop.f32.mrb[106].mxu1  ;;  %v7251_v56 = vpop.f32.mrb[107].mxu0 }
 0x1cd   : > { %v9750_v9 = vmax.f32 %v1611_v31, %v1664_v40  ;;  %v7299_v51 = vpop.f32.mrb[107].mxu1 }
 0x1ce   : > { %v1613_v23 = vmax.f32 %v1595_v6, 0.0  ;;  %v9753_v59 = vadd.f32 %v9573_v33, %v1571_v13 }
 0x1d0   : > { %v1665_v37 = vrot.slane %v1613_v23, 1  ;;  %v1614_v41 = vmax.f32 %v9753_v59, 0.0 }
 0x1d1   : > { %v1942_v32 = vpop.f32.mrb[108].mxu0 }
 0x1d2   : > { %v1666_v12 = vsel %vm898_vm4, %v1663_v53, %v1665_v37  ;;  %v9759_v52 = vrot.slane %v1614_v41, 1  ;;  %v1943_v26 = vadd.f32 %v1942_v32, %v9579_v44  ;;  %v2096_v57 = vpop.f32.mrb[108].mxu1  ;;  %v7314_v21 = vpop.f32.mrb[109].mxu0 }
 0x1d3   : > { %v9762_v19 = vmax.f32 %v1612_v63, %v1666_v12  ;;  %v7362_v11 = vpop.f32.mrb[109].mxu1  ;;  %v1945_v60 = vpop.f32.mrb[110].mxu0 }
 0x1d4   : > { %v1668_v33 = vsel %vm898_vm4, %v1665_v37, %v9759_v52  ;;  %v1946_v31 = vadd.f32 %v1945_v60, %v9585_v36  ;;  %v2099_v48 = vpop.f32.mrb[110].mxu1  ;;  %v7315_v46 = vpop.f32.mrb[111].mxu0  ;;  %v9767_v49 = vadd.f32 %v2096_v57, %v1943_v26 }
 0x1d5   : > { %v9769_v15 = vmax.f32 %v1613_v23, %v1668_v33  ;;  %v7363_v53 = vpop.f32.mrb[111].mxu1 }
 0x1d6   : > { %v9771_v22 = vadd.f32 %v2099_v48, %v1946_v31 }
 0x1d9   : > { %v1950_v44 = vpop.f32.mrb[112].mxu0 }
 0x1da   : > { %v1951_v63 = vadd.f32 %v1950_v44, %v9597_v43  ;;  %v2104_v34 = vpop.f32.mrb[112].mxu1  ;;  %v7318_v28 = vpop.f32.mrb[113].mxu0 }
 0x1db   : > { %v7366_v16 = vpop.f32.mrb[113].mxu1  ;;  %v1953_v40 = vpop.f32.mrb[114].mxu0 }
 0x1dc   : > { %v1954_v6 = vadd.f32 %v1953_v40, %v9602_v30  ;;  %v2107_v13 = vpop.f32.mrb[114].mxu1  ;;  %v7319_v36 = vpop.f32.mrb[115].mxu0  ;;  %v9775_v56 = vadd.f32 %v2104_v34, %v1951_v63 }
 0x1dd   : > { %v7367_v51 = vpop.f32.mrb[115].mxu1 }
 0x1de   : > { %v9777_v37 = vadd.f32 %v2107_v13, %v1954_v6 }
 0x1e1   : > { %v1958_v23 = vpop.f32.mrb[116].mxu0 }
 0x1e2   : > { %v1959_v32 = vadd.f32 %v1958_v23, %v9617_v7  ;;  %v2112_v12 = vpop.f32.mrb[116].mxu1  ;;  %v7322_v26 = vpop.f32.mrb[117].mxu0 }
 0x1e3   : > { %v7370_v57 = vpop.f32.mrb[117].mxu1  ;;  %v1961_v43 = vpop.f32.mrb[118].mxu0 }
 0x1e4   : > { %v9780_v21 = vadd.f32 %v2112_v12, %v1959_v32  ;;  %v1962_v11 = vadd.f32 %v1961_v43, %v9624_v61  ;;  %v2115_v60 = vpop.f32.mrb[118].mxu1  ;;  %v7323_v30 = vpop.f32.mrb[119].mxu0 }
 0x1e5   : > { %v7371_v33 = vpop.f32.mrb[119].mxu1 }
 0x1e6   : > { %v9783_v31 = vadd.f32 %v2115_v60, %v1962_v11 }
 0x1e9   : > { %v1966_v48 = vpop.f32.mrb[120].mxu0 }
 0x1ea   : > { %v1967_v46 = vadd.f32 %v1966_v48, %v9631_v55  ;;  %v2120_v53 = vpop.f32.mrb[120].mxu1  ;;  %v7326_v44 = vpop.f32.mrb[121].mxu0 }
 0x1eb   : > { %v7374_v63 = vpop.f32.mrb[121].mxu1  ;;  %v1969_v7 = vpop.f32.mrb[122].mxu0 }
 0x1ec   : > { %v9786_v34 = vadd.f32 %v2120_v53, %v1967_v46  ;;  %v1970_v28 = vadd.f32 %v1969_v7, %v9638_v3  ;;  %v2123_v16 = vpop.f32.mrb[122].mxu1  ;;  %v7327_v40 = vpop.f32.mrb[123].mxu0 }
 0x1ed   : > { %v7375_v6 = vpop.f32.mrb[123].mxu1 }
 0x1ee   : > { %v9789_v61 = vadd.f32 %v2123_v16, %v1970_v28 }
 0x1f1   : > { %v1974_v13 = vpop.f32.mrb[124].mxu0 }
 0x1f2   : > { %v1975_v36 = vadd.f32 %v1974_v13, %v9651_v2  ;;  %v2128_v51 = vpop.f32.mrb[124].mxu1  ;;  %v7330_v23 = vpop.f32.mrb[125].mxu0 }
 0x1f3   : > { %v7378_v32 = vpop.f32.mrb[125].mxu1  ;;  %v1977_v55 = vpop.f32.mrb[126].mxu0 }
 0x1f4   : > { %v9792_v12 = vadd.f32 %v2128_v51, %v1975_v36  ;;  %v1978_v26 = vadd.f32 %v1977_v55, %v9658_v0  ;;  %v2131_v57 = vpop.f32.mrb[126].mxu1  ;;  %v7331_v43 = vpop.f32.mrb[127].mxu0 }
 0x1f5   : > { %v7379_v11 = vpop.f32.mrb[127].mxu1 }
 0x1f6   : > { %v9795_v3 = vadd.f32 %v2131_v57, %v1978_v26 }
 0x1f9   : > { %v1982_v60 = vpop.f32.mrb[128].mxu0 }
 0x1fa   : > { %v1983_v30 = vadd.f32 %v1982_v60, %v9674_v54  ;;  %v2136_v33 = vpop.f32.mrb[128].mxu1  ;;  %v7334_v48 = vpop.f32.mrb[129].mxu0 }
 0x1fb   : > { %v7382_v46 = vpop.f32.mrb[129].mxu1  ;;  %v1985_v2 = vpop.f32.mrb[130].mxu0 }
 0x1fc   : > { %v9798_v53 = vadd.f32 %v2136_v33, %v1983_v30  ;;  %v1986_v44 = vadd.f32 %v1985_v2, %v9684_v18  ;;  %v2139_v63 = vpop.f32.mrb[130].mxu1  ;;  %v7335_v7 = vpop.f32.mrb[131].mxu0 }
 0x1fd   : > { %v7383_v28 = vpop.f32.mrb[131].mxu1 }
 0x1fe   : > { %v9801_v0 = vadd.f32 %v2139_v63, %v1986_v44 }
 0x201   : > { %v1990_v16 = vpop.f32.mrb[132].mxu0 }
 0x202   : > { %v1991_v40 = vadd.f32 %v1990_v16, %v9700_v58  ;;  %v2144_v6 = vpop.f32.mrb[132].mxu1  ;;  %v7338_v13 = vpop.f32.mrb[133].mxu0 }
 0x203   : > { %v7386_v36 = vpop.f32.mrb[133].mxu1  ;;  %v1993_v54 = vpop.f32.mrb[134].mxu0 }
 0x204   : > { %v9804_v51 = vadd.f32 %v2144_v6, %v1991_v40  ;;  %v1994_v23 = vadd.f32 %v1993_v54, %v9710_v4  ;;  %v2147_v32 = vpop.f32.mrb[134].mxu1  ;;  %v7339_v55 = vpop.f32.mrb[135].mxu0 }
 0x205   : > { %v7387_v26 = vpop.f32.mrb[135].mxu1 }
 0x206   : > { %v9807_v18 = vadd.f32 %v2147_v32, %v1994_v23 }
 0x209   : > { %v1998_v57 = vpop.f32.mrb[136].mxu0 }
 0x20a   : > { %v1999_v43 = vadd.f32 %v1998_v57, %v9722_v50  ;;  %v2152_v11 = vpop.f32.mrb[136].mxu1  ;;  %v7342_v60 = vpop.f32.mrb[137].mxu0 }
 0x20b   : > { %v7390_v30 = vpop.f32.mrb[137].mxu1  ;;  %v2001_v58 = vpop.f32.mrb[138].mxu0 }
 0x20c   : > { %v9810_v33 = vadd.f32 %v2152_v11, %v1999_v43  ;;  %v2002_v48 = vadd.f32 %v2001_v58, %v9730_v45  ;;  %v2155_v46 = vpop.f32.mrb[138].mxu1  ;;  %v7343_v2 = vpop.f32.mrb[139].mxu0 }
 0x20d   : > { %v7391_v44 = vpop.f32.mrb[139].mxu1 }
 0x20e   : > { %v9813_v4 = vadd.f32 %v2155_v46, %v2002_v48 }
 0x211   : > { %v2006_v63 = vpop.f32.mrb[140].mxu0 }
 0x212   : > { %v2007_v7 = vadd.f32 %v2006_v63, %v9741_v62  ;;  %v2160_v28 = vpop.f32.mrb[140].mxu1  ;;  %v7346_v16 = vpop.f32.mrb[141].mxu0  ;;  %v9825_v62 = vld [vmem:[%s11232_s2 + $0x1] ss:$0 sm:$0xff] }
 0x213   : > { %v7394_v40 = vpop.f32.mrb[141].mxu1  ;;  %v2009_v50 = vpop.f32.mrb[142].mxu0 }
 0x214   : > { %v9816_v6 = vadd.f32 %v2160_v28, %v2007_v7  ;;  %v2010_v13 = vadd.f32 %v2009_v50, %v9748_v35  ;;  %v2163_v36 = vpop.f32.mrb[142].mxu1  ;;  %v7347_v54 = vpop.f32.mrb[143].mxu0 }
 0x215   : > { %v7395_v23 = vpop.f32.mrb[143].mxu1 }
 0x216   : > { %v9819_v45 = vadd.f32 %v2163_v36, %v2010_v13 }
 0x219   : > { %v2268_v32 = vpop.f32.mrb[144].mxu0 }
 0x21a   : > { %v2339_v55 = vadd.f32 %v2268_v32, %v9767_v49  ;;  %v2440_v26 = vpop.f32.mrb[144].mxu1  ;;  %v7410_v57 = vpop.f32.mrb[145].mxu0 }
 0x21b   : > { %v7458_v43 = vpop.f32.mrb[145].mxu1  ;;  %v2271_v11 = vpop.f32.mrb[146].mxu0 }
 0x21c   : > { %v2511_v60 = vadd.f32 %v2440_v26, %v2339_v55  ;;  %v2340_v35 = vadd.f32 %v2271_v11, %v9771_v22  ;;  %v2443_v30 = vpop.f32.mrb[146].mxu1  ;;  %v7411_v58 = vpop.f32.mrb[147].mxu0 }
 0x21d   : > { %v7459_v48 = vpop.f32.mrb[147].mxu1 }
 0x21e   : > { %v2537_v46 = vadd.f32 %v9825_v62, %v2511_v60  ;;  %v2512_v2 = vadd.f32 %v2443_v30, %v2340_v35 }
 0x220   : > { %v2555_v44 = vmax.f32 %v2537_v46, 0.0  ;;  %v2538_v49 = vadd.f32 %v9825_v62, %v2512_v2 }
 0x221   : > { %v2276_v63 = vpop.f32.mrb[148].mxu0 }
 0x222   : > { %v2556_v7 = vmax.f32 %v2538_v49, 0.0  ;;  %v2341_v28 = vadd.f32 %v2276_v63, %v9775_v56  ;;  %v2448_v16 = vpop.f32.mrb[148].mxu1  ;;  %v7414_v40 = vpop.f32.mrb[149].mxu0  ;;  %v2591_v36 = vrot.slane %v2555_v44, 1 }
 0x223   : > { %v7462_v50 = vpop.f32.mrb[149].mxu1  ;;  %v2279_v13 = vpop.f32.mrb[150].mxu0 }
 0x224   : > { %v2592_v54 = vrot.slane %v2556_v7, 1  ;;  %v2513_v22 = vadd.f32 %v2448_v16, %v2341_v28  ;;  %v2342_v23 = vadd.f32 %v2279_v13, %v9777_v37  ;;  %v2451_v32 = vpop.f32.mrb[150].mxu1  ;;  %v7415_v55 = vpop.f32.mrb[151].mxu0 }
 0x225   : > { %v7463_v26 = vpop.f32.mrb[151].mxu1 }
 0x226   : > { %v2593_v57 = vsel %vm898_vm4, %v2591_v36, %v2592_v54  ;;  %v2539_v43 = vadd.f32 %v9825_v62, %v2513_v22  ;;  %v2514_v11 = vadd.f32 %v2451_v32, %v2342_v23 }
 0x227   : > { %v2644_v60 = vmax.f32 %v2555_v44, %v2593_v57 }
 0x228   : > { %v2557_v35 = vmax.f32 %v2539_v43, 0.0  ;;  %v2540_v56 = vadd.f32 %v9825_v62, %v2514_v11 }
 0x229   : > { %v2662_v30 = vmax.f32 %v9604_v29, %v2644_v60  ;;  %v2284_v58 = vpop.f32.mrb[152].mxu0 }
 0x22a   : > { %v2594_v48 = vrot.slane %v2557_v35, 1  ;;  %v2558_v46 = vmax.f32 %v2540_v56, 0.0  ;;  %v2343_v2 = vadd.f32 %v2284_v58, %v9780_v21  ;;  %v2456_v37 = vpop.f32.mrb[152].mxu1  ;;  %v7418_v49 = vpop.f32.mrb[153].mxu0 }
 0x22b   : > { %v7466_v63 = vpop.f32.mrb[153].mxu1  ;;  %v2287_v28 = vpop.f32.mrb[154].mxu0 }
 0x22c   : > { %v2595_v16 = vsel %vm898_vm4, %v2592_v54, %v2594_v48  ;;  %v2596_v40 = vrot.slane %v2558_v46, 1  ;;  %v2515_v50 = vadd.f32 %v2456_v37, %v2343_v2  ;;  %v2344_v44 = vadd.f32 %v2287_v28, %v9783_v31  ;;  %v2459_v13 = vpop.f32.mrb[154].mxu1  ;;  %v7419_v36 = vpop.f32.mrb[155].mxu0 }
 0x22d   : > { %v2645_v22 = vmax.f32 %v2556_v7, %v2595_v16  ;;  %v7467_v23 = vpop.f32.mrb[155].mxu1 }
 0x22e   : > { %v2597_v29 = vsel %vm898_vm4, %v2594_v48, %v2596_v40  ;;  %v2541_v32 = vadd.f32 %v9825_v62, %v2515_v50  ;;  %v2516_v55 = vadd.f32 %v2459_v13, %v2344_v44 }
 0x22f   : > { %v2663_v21 = vmax.f32 %v9619_v27, %v2645_v22  ;;  %v2646_v26 = vmax.f32 %v2557_v35, %v2597_v29 }
 0x230   : > { %v2559_v57 = vmax.f32 %v2541_v32, 0.0  ;;  %v2542_v43 = vadd.f32 %v9825_v62, %v2516_v55 }
 0x231   : > { %v6585_v54 = vpack.c.bf16 %v2663_v21, %v2662_v30  ;;  %v2664_v11 = vmax.f32 %v9626_v17, %v2646_v26  ;;  %v2292_v60 = vpop.f32.mrb[156].mxu0 }
 0x232   : > { %v2598_v31 = vrot.slane %v2559_v57, 1  ;;  %v2560_v56 = vmax.f32 %v2542_v43, 0.0  ;;  %v2345_v7 = vadd.f32 %v2292_v60, %v9786_v34  ;;  %v2464_v58 = vpop.f32.mrb[156].mxu1  ;;  %v7422_v2 = vpop.f32.mrb[157].mxu0 }
 0x233   : > { %6586 = vst [vmem:[#allocation2] sm:$0xff] %v6585_v54   ;;  %v7470_v48 = vpop.f32.mrb[157].mxu1  ;;  %v2295_v37 = vpop.f32.mrb[158].mxu0 }
 0x234   : > { %v2599_v49 = vsel %vm898_vm4, %v2596_v40, %v2598_v31  ;;  %v2600_v27 = vrot.slane %v2560_v56, 1  ;;  %v2517_v35 = vadd.f32 %v2464_v58, %v2345_v7  ;;  %v2346_v63 = vadd.f32 %v2295_v37, %v9789_v61  ;;  %v2467_v28 = vpop.f32.mrb[158].mxu1  ;;  %v7423_v30 = vpop.f32.mrb[159].mxu0 }
 0x235   : > { %v2647_v16 = vmax.f32 %v2558_v46, %v2599_v49  ;;  %v7471_v17 = vpop.f32.mrb[159].mxu1 }
 0x236   : > { %v2601_v50 = vsel %vm898_vm4, %v2598_v31, %v2600_v27  ;;  %v2543_v44 = vadd.f32 %v9825_v62, %v2517_v35  ;;  %v2518_v34 = vadd.f32 %v2467_v28, %v2346_v63 }
 0x237   : > { %v2665_v13 = vmax.f32 %v9633_v5, %v2647_v16  ;;  %v2648_v36 = vmax.f32 %v2559_v57, %v2601_v50 }
 0x238   : > { %v2561_v22 = vmax.f32 %v2543_v44, 0.0  ;;  %v2544_v23 = vadd.f32 %v9825_v62, %v2518_v34 }
 0x239   : > { %v6590_v40 = vpack.c.bf16 %v2665_v13, %v2664_v11  ;;  %v2666_v29 = vmax.f32 %v9640_v14, %v2648_v36  ;;  %v2300_v32 = vpop.f32.mrb[160].mxu0 }
 0x23a   : > { %v2602_v61 = vrot.slane %v2561_v22, 1  ;;  %v2562_v55 = vmax.f32 %v2544_v23, 0.0  ;;  %v2347_v46 = vadd.f32 %v2300_v32, %v9792_v12  ;;  %v2472_v21 = vpop.f32.mrb[160].mxu1  ;;  %v7426_v26 = vpop.f32.mrb[161].mxu0  ;;  %v2775_v43 = vld [vmem:[#allocation2] sm:$0xf] }
 0x23b   : > { %6622 = vst [vmem:[#allocation2 + $0x8] sm:$0xff] %v6590_v40   ;;  %v7474_v54 = vpop.f32.mrb[161].mxu1  ;;  %v2303_v60 = vpop.f32.mrb[162].mxu0  ;;  %v9853_v31 = vld [vmem:[#allocation2 + $0x4] sm:$0xf] }
 0x23c   : > { %v2603_v5 = vsel %vm898_vm4, %v2600_v27, %v2602_v61  ;;  %v2604_v57 = vrot.slane %v2562_v55, 1  ;;  %v2519_v7 = vadd.f32 %v2472_v21, %v2347_v46  ;;  %v2348_v11 = vadd.f32 %v2303_v60, %v9795_v3  ;;  %v2475_v14 = vpop.f32.mrb[162].mxu1  ;;  %v7427_v58 = vpop.f32.mrb[163].mxu0  ;;  %v8286_v12 = vld [vmem:[%s11233_s3 + $0xc0] sm:$0xff]  }
 0x23d   : > { %v2649_v2 = vmax.f32 %v2560_v56, %v2603_v5  ;;  %v7475_v48 = vpop.f32.mrb[163].mxu1  ;;  %v9861_v37 = vcombine.low %v2775_v43, %v9853_v31  ;;  %v2808_v63 = vld [vmem:[#allocation2] sm:$0xe]  ;;  %v8289_v56 = vld [vmem:[%s11233_s3 + $0xc8] sm:$0xff]   ;;  %v9880_v40 = vld [vmem:[#allocation2 + $0x4] sm:$0xf] }
 0x23e   : > { %v2605_v49 = vsel %vm898_vm4, %v2602_v61, %v2604_v57  ;;  %v2545_v35 = vadd.f32 %v9825_v62, %v2519_v7  ;;  %v2520_v27 = vadd.f32 %v2475_v14, %v2348_v11 }
 0x23f   : > { %v2667_v28 = vmax.f32 %v9653_v39, %v2649_v2  ;;  %v2650_v3 = vmax.f32 %v2561_v22, %v2605_v49  ;;  %7561 = vmatmul.mubr.bf16.vlgmr.msra.gmra.mrb[180].mxu1 %v9861_v37  ;;  %v6259_v39 = vcombine.low %v2808_v63, %v9853_v31 }
 0x240   : > { %v2563_v30 = vmax.f32 %v2545_v35, 0.0  ;;  %v9868_v16 = vadd.f32 %v9825_v62, %v2520_v27  ;;  %7564 = vmatprep.mubr.msk.bf16.mxu1 %vm8506_vm0, %v8505_v1  ;;  %7649 = vmatpush3.bf16.msra.mxu1 %v8286_v12 }
 0x241   : > { %v6595_v17 = vpack.c.bf16 %v2667_v28, %v2666_v29  ;;  %v2668_v50 = vmax.f32 %v9662_v24, %v2650_v3  ;;  %v2308_v44 = vpop.f32.mrb[164].mxu0  ;;  %7650 = vmatprep.subr.bf16.mxu1 %v8505_v1  ;;  %v2870_v7 = vrot.slane %v6259_v39, 1 }
 0x242   : > { %v2606_v34 = vrot.slane %v2563_v30, 1  ;;  %v2564_v13 = vmax.f32 %v9868_v16, 0.0  ;;  %v2349_v36 = vadd.f32 %v2308_v44, %v9798_v53  ;;  %v2480_v22 = vpop.f32.mrb[164].mxu1  ;;  %v7430_v23 = vpop.f32.mrb[165].mxu0  ;;  %v9882_v29 = vld [vmem:[#allocation2 + $0x8] sm:$0xff]   ;;  %v8299_v16 = vld [vmem:[%s11233_s3 + $0xe0] sm:$0xff]  }
 0x243   : > { %6623 = vst [vmem:[#allocation2 + $0x10] sm:$0xff] %v6595_v17   ;;  %v7478_v32 = vpop.f32.mrb[165].mxu1  ;;  %v2311_v61 = vpop.f32.mrb[166].mxu0  ;;  %v9888_v53 = vld [vmem:[#allocation2 + $0x8] sm:$0xf]  ;;  %v2871_v11 = vrot.slane %v9882_v29, 1 }
 0x244   : > { %v2607_v24 = vsel %vm898_vm4, %v2604_v57, %v2606_v34  ;;  %v2608_v46 = vrot.slane %v2564_v13, 1  ;;  %v2521_v21 = vadd.f32 %v2480_v22, %v2349_v36  ;;  %v2350_v26 = vadd.f32 %v2311_v61, %v9801_v0  ;;  %v2483_v43 = vpop.f32.mrb[166].mxu1  ;;  %v7431_v54 = vpop.f32.mrb[167].mxu0  ;;  %7651 = vmatpush3.bf16.msra.mxu1 %v8289_v56  ;;  %v8285_v57 = vld [vmem:[%s11233_s3 + $0x80] sm:$0xff]   ;;  %v9927_v39 = vld [vmem:[#allocation2 + $0xc] sm:$0xf] }
 0x245   : > { %v2651_v60 = vmax.f32 %v2562_v55, %v2607_v24  ;;  %v7479_v5 = vpop.f32.mrb[167].mxu1  ;;  %7652 = vmatprep.subr.bf16.mxu1 %v8505_v1  ;;  %v9897_v14 = vcombine.low %v9880_v40, %v9888_v53  ;;  %v8293_v55 = vld [vmem:[%s11233_s3 + $0xd0] sm:$0xff]   ;;  %v9907_v49 = vsel %vm898_vm4, %v2870_v7, %v2871_v11 }
 0x246   : > { %v2609_v0 = vsel %vm898_vm4, %v2606_v34, %v2608_v46  ;;  %v2547_v58 = vadd.f32 %v9825_v62, %v2521_v21  ;;  %v2522_v12 = vadd.f32 %v2483_v43, %v2350_v26  ;;  %7509 = vmatmul.mubr.bf16.vlgmr.msra.gmra.mrb[180].mxu0 %v9907_v49 }
 0x247   : > { %v2669_v2 = vmax.f32 %v9676_v47, %v2651_v60  ;;  %v2652_v48 = vmax.f32 %v2563_v30, %v2609_v0  ;;  %7565 = vmatmul.mubr.bf16.gmra.mrb[184].mxu1 %v9882_v29  ;;  %7597 = vmatpush3.bf16.msra.mxu0 %v8285_v57  ;;  %v8288_v47 = vld [vmem:[%s11233_s3 + $0x88] sm:$0xff]   ;;  %v8296_v30 = vld [vmem:[%s11233_s3 + $0xd8] sm:$0xff]  }
 0x248   : > { %v2565_v35 = vmax.f32 %v2547_v58, 0.0  ;;  %v9910_v27 = vadd.f32 %v9825_v62, %v2522_v12  ;;  %7568 = vmatprep.mubr.msk.bf16.mxu1 %vm8506_vm0, %v8505_v1  ;;  %7512 = vmatprep.mubr.msk.bf16.mxu0 %vm8506_vm0, %v8505_v1 }
 0x249   : > { %v6600_v63 = vpack.c.bf16 %v2669_v2, %v2668_v50  ;;  %v2670_v28 = vmax.f32 %v9687_v10, %v2652_v48  ;;  %v2316_v3 = vpop.f32.mrb[168].mxu0  ;;  %7598 = vmatprep.subr.bf16.mxu0 %v8505_v1  ;;  %7653 = vmatpush3.bf16.msra.mxu1 %v8293_v55 }
 0x24a   : > { %v2610_v56 = vrot.slane %v2565_v35, 1  ;;  %v2566_v17 = vmax.f32 %v9910_v27, 0.0  ;;  %v2351_v50 = vadd.f32 %v2316_v3, %v9804_v51  ;;  %v2488_v44 = vpop.f32.mrb[168].mxu1  ;;  %v7434_v10 = vpop.f32.mrb[169].mxu0  ;;  %v9929_v22 = vld [vmem:[#allocation2 + $0x10] sm:$0xff]   ;;  %7654 = vmatprep.subr.bf16.mxu1 %v8505_v1 }
 0x24b   : > { %6624 = vst [vmem:[#allocation2 + $0x18] sm:$0xff] %v6600_v63   ;;  %v7482_v34 = vpop.f32.mrb[169].mxu1  ;;  %v2319_v36 = vpop.f32.mrb[170].mxu0  ;;  %v9936_v26 = vld [vmem:[#allocation2 + $0x10] sm:$0xf]  ;;  %v2873_v60 = vrot.slane %v9929_v22, 1  ;;  %7599 = vmatpush3.bf16.msra.mxu0 %v8288_v47 }
 0x24c   : > { %v2611_v23 = vsel %vm898_vm4, %v2608_v46, %v2610_v56  ;;  %v2612_v32 = vrot.slane %v2566_v17, 1  ;;  %v2523_v51 = vadd.f32 %v2488_v44, %v2351_v50  ;;  %v2352_v61 = vadd.f32 %v2319_v36, %v9807_v18  ;;  %v2491_v24 = vpop.f32.mrb[170].mxu1  ;;  %v7435_v21 = vpop.f32.mrb[171].mxu0  ;;  %v8291_v46 = vld [vmem:[%s11233_s3 + $0x90] sm:$0xff]   ;;  %7600 = vmatprep.subr.bf16.mxu0 %v8505_v1 }
 0x24d   : > { %v2653_v43 = vmax.f32 %v2564_v13, %v2611_v23  ;;  %v7483_v54 = vpop.f32.mrb[171].mxu1  ;;  %v9946_v5 = vcombine.low %v9927_v39, %v9936_v26  ;;  %7655 = vmatpush3.bf16.msra.mxu1 %v8296_v30  ;;  %v9957_v58 = vsel %vm898_vm4, %v2871_v11, %v2873_v60  ;;  %v8294_v11 = vld [vmem:[%s11233_s3 + $0x98] sm:$0xff]   ;;  %v9978_v30 = vld [vmem:[#allocation2 + $0x14] sm:$0xf] }
 0x24e   : > { %v2613_v18 = vsel %vm898_vm4, %v2610_v56, %v2612_v32  ;;  %v2549_v7 = vadd.f32 %v9825_v62, %v2523_v51  ;;  %v2524_v57 = vadd.f32 %v2491_v24, %v2352_v61  ;;  %7656 = vmatprep.subr.bf16.mxu1 %v8505_v1  ;;  %7513 = vmatmul.mubr.bf16.gmra.mrb[184].mxu0 %v9957_v58  ;;  %v8304_v27 = vld [vmem:[%s11233_s3 + $0xf0] sm:$0xff]  }
 0x24f   : > { %v2671_v13 = vmax.f32 %v9702_v38, %v2653_v43  ;;  %v2654_v0 = vmax.f32 %v2565_v35, %v2613_v18  ;;  %7569 = vmatmul.mubr.bf16.gmra.mrb[188].mxu1 %v9929_v22  ;;  %7516 = vmatprep.mubr.msk.bf16.mxu0 %vm8506_vm0, %v8505_v1  ;;  %v8302_v35 = vld [vmem:[%s11233_s3 + $0xe8] sm:$0xff]  }
 0x250   : > { %v2567_v12 = vmax.f32 %v2549_v7, 0.0  ;;  %v9961_v55 = vadd.f32 %v9825_v62, %v2524_v57  ;;  %7572 = vmatprep.mubr.msk.bf16.mxu1 %vm8506_vm0, %v8505_v1  ;;  %7601 = vmatpush3.bf16.msra.mxu0 %v8291_v46 }
 0x251   : > { %v6605_v2 = vpack.c.bf16 %v2671_v13, %v2670_v28  ;;  %v2672_v38 = vmax.f32 %v9713_v25, %v2654_v0  ;;  %v2324_v48 = vpop.f32.mrb[172].mxu0  ;;  %7602 = vmatprep.subr.bf16.mxu0 %v8505_v1  ;;  %7657 = vmatpush3.bf16.msra.mxu1 %v8299_v16 }
 0x252   : > { %v2614_v63 = vrot.slane %v2567_v12, 1  ;;  %v2568_v3 = vmax.f32 %v9961_v55, 0.0  ;;  %v2353_v28 = vadd.f32 %v2324_v48, %v9810_v33  ;;  %v2496_v47 = vpop.f32.mrb[172].mxu1  ;;  %v7438_v25 = vpop.f32.mrb[173].mxu0  ;;  %v9980_v44 = vld [vmem:[#allocation2 + $0x18] sm:$0xff]   ;;  %7658 = vmatprep.subr.bf16.mxu1 %v8505_v1 }
 0x253   : > { %6625 = vst [vmem:[#allocation2 + $0x20] sm:$0xff] %v6605_v2   ;;  %v7486_v56 = vpop.f32.mrb[173].mxu1  ;;  %v2327_v50 = vpop.f32.mrb[174].mxu0  ;;  %v9987_v61 = vld [vmem:[#allocation2 + $0x18] sm:$0xf]  ;;  %v2875_v43 = vrot.slane %v9980_v44, 1 }
 0x254   : > { %v2615_v10 = vsel %vm898_vm4, %v2612_v32, %v2614_v63  ;;  %v2616_v34 = vrot.slane %v2568_v3, 1  ;;  %v2525_v33 = vadd.f32 %v2496_v47, %v2353_v28  ;;  %v2354_v36 = vadd.f32 %v2327_v50, %v9813_v4  ;;  %v2499_v23 = vpop.f32.mrb[174].mxu1  ;;  %v7439_v51 = vpop.f32.mrb[175].mxu0  ;;  %7603 = vmatpush3.bf16.msra.mxu0 %v8294_v11  ;;  %v8298_v32 = vld [vmem:[%s11233_s3 + $0xa0] sm:$0xff]   ;;  %v8307_v2 = vld [vmem:[%s11233_s3 + $0xf8] sm:$0xff]  }
 0x255   : > { %v2655_v24 = vmax.f32 %v2566_v17, %v2615_v10  ;;  %v7487_v21 = vpop.f32.mrb[175].mxu1  ;;  %v9997_v54 = vcombine.low %v9978_v30, %v9987_v61  ;;  %7604 = vmatprep.subr.bf16.mxu0 %v8505_v1  ;;  %7659 = vmatpush3.bf16.msra.mxu1 %v8302_v35  ;;  %v10008_v57 = vsel %vm898_vm4, %v2873_v60, %v2875_v43  ;;  %v8301_v60 = vld [vmem:[%s11233_s3 + $0xa8] sm:$0xff]  }
 0x256   : > { %v2617_v4 = vsel %vm898_vm4, %v2614_v63, %v2616_v34  ;;  %v2551_v46 = vadd.f32 %v9825_v62, %v2525_v33  ;;  %v2526_v18 = vadd.f32 %v2499_v23, %v2354_v36  ;;  %7660 = vmatprep.subr.bf16.mxu1 %v8505_v1  ;;  %7517 = vmatmul.mubr.bf16.gmra.mrb[188].mxu0 %v10008_v57  ;;  %v10029_v63 = vld [vmem:[#allocation2 + $0x1c] sm:$0xf] }
 0x257   : > { %v2673_v17 = vmax.f32 %v9725_v20, %v2655_v24  ;;  %v2656_v7 = vmax.f32 %v2567_v12, %v2617_v4  ;;  %7573 = vmatmul.mubr.bf16.gmra.mrb[192].mxu1 %v9980_v44  ;;  %7520 = vmatprep.mubr.msk.bf16.mxu0 %vm8506_vm0, %v8505_v1 }
 0x258   : > { %v2569_v16 = vmax.f32 %v2551_v46, 0.0  ;;  %v10012_v13 = vadd.f32 %v9825_v62, %v2526_v18  ;;  %7576 = vmatprep.mubr.msk.bf16.mxu1 %vm8506_vm0, %v8505_v1  ;;  %7605 = vmatpush3.bf16.msra.mxu0 %v8298_v32  ;;  %v8305_v32 = vld [vmem:[%s11233_s3 + $0xb0] sm:$0xff]  }
 0x259   : > { %v6610_v0 = vpack.c.bf16 %v2673_v17, %v2672_v38  ;;  %v2674_v20 = vmax.f32 %v9735_v42, %v2656_v7  ;;  %v2332_v12 = vpop.f32.mrb[176].mxu0  ;;  %7606 = vmatprep.subr.bf16.mxu0 %v8505_v1  ;;  %7661 = vmatpush3.bf16.msra.mxu1 %v8304_v27 }
 0x25a   : > { %v2618_v48 = vrot.slane %v2569_v16, 1  ;;  %v2570_v11 = vmax.f32 %v10012_v13, 0.0  ;;  %v2355_v38 = vadd.f32 %v2332_v12, %v9816_v6  ;;  %v2504_v35 = vpop.f32.mrb[176].mxu1  ;;  %v7442_v42 = vpop.f32.mrb[177].mxu0  ;;  %v10031_v25 = vld [vmem:[#allocation2 + $0x20] sm:$0xff]   ;;  %7662 = vmatprep.subr.bf16.mxu1 %v8505_v1 }
 0x25b   : > { %6626 = vst [vmem:[#allocation2 + $0x28] sm:$0xff] %v6610_v0   ;;  %v7490_v28 = vpop.f32.mrb[177].mxu1  ;;  %v2335_v47 = vpop.f32.mrb[178].mxu0  ;;  %v10036_v23 = vld [vmem:[#allocation2 + $0x20] sm:$0xf]  ;;  %v2877_v21 = vrot.slane %v10031_v25, 1 }
 0x25c   : > { %v2619_v56 = vsel %vm898_vm4, %v2616_v34, %v2618_v48  ;;  %v2620_v50 = vrot.slane %v2570_v11, 1  ;;  %v2527_v10 = vadd.f32 %v2504_v35, %v2355_v38  ;;  %v2356_v6 = vadd.f32 %v2335_v47, %v9819_v45  ;;  %v2507_v33 = vpop.f32.mrb[178].mxu1  ;;  %v7443_v36 = vpop.f32.mrb[179].mxu0  ;;  %7607 = vmatpush3.bf16.msra.mxu0 %v8301_v60  ;;  %v10070_v0 = vld [vmem:[#allocation2 + $0x24] sm:$0xf] }
 0x25d   : > { %v2657_v51 = vmax.f32 %v2568_v3, %v2619_v56  ;;  %v7491_v24 = vpop.f32.mrb[179].mxu1  ;;  %v10046_v34 = vcombine.low %v10029_v63, %v10036_v23  ;;  %7608 = vmatprep.subr.bf16.mxu0 %v8505_v1  ;;  %7663 = vmatpush3.bf16.msra.mxu1 %v8307_v2  ;;  %v10054_v18 = vsel %vm898_vm4, %v2875_v43, %v2877_v21 }
 0x25e   : > { %v2621_v45 = vsel %vm898_vm4, %v2618_v48, %v2620_v50  ;;  %v2553_v4 = vadd.f32 %v9825_v62, %v2527_v10  ;;  %v2528_v46 = vadd.f32 %v2507_v33, %v2356_v6  ;;  %7752 = vmatprep.subr.bf16.mxu1 %v8505_v1  ;;  %7521 = vmatmul.mubr.bf16.gmra.mrb[192].mxu0 %v10054_v18 }
 0x25f   : > { %v2675_v55 = vmax.f32 %v9743_v8, %v2657_v51  ;;  %v2658_v3 = vmax.f32 %v2569_v16, %v2621_v45  ;;  %7577 = vmatmul.mubr.bf16.gmra.mrb[196].mxu1 %v10031_v25  ;;  %7524 = vmatprep.mubr.msk.bf16.mxu0 %vm8506_vm0, %v8505_v1  ;;  %v8310_v8 = vld [vmem:[%s11233_s3 + $0xb8] sm:$0xff]   ;;  %v1704_v2 = vmax.f32 %v1614_v41, %v9759_v52 }
 0x260   : > { %v2571_v27 = vmax.f32 %v2553_v4, 0.0  ;;  %v2554_v17 = vadd.f32 %v9825_v62, %v2528_v46  ;;  %7580 = vmatprep.mubr.msk.bf16.mxu1 %vm8506_vm0, %v8505_v1  ;;  %7609 = vmatpush3.bf16.msra.mxu0 %v8305_v32 }
 0x261   : > { %v6615_v7 = vpack.c.bf16 %v2675_v55, %v2674_v20  ;;  %v2676_v13 = vmax.f32 %v9750_v9, %v2658_v3  ;;  %7610 = vmatprep.subr.bf16.mxu0 %v8505_v1 }
 0x262   : > { %v2622_v43 = vrot.slane %v2571_v27, 1  ;;  %v2572_v16 = vmax.f32 %v2554_v17, 0.0  ;;  %v10068_v62 = vld [vmem:[#allocation2 + $0x28] sm:$0xff]  }
 0x263   : > { %6627 = vst [vmem:[#allocation2 + $0x30] sm:$0xff] %v6615_v7   ;;  %v10072_v20 = vld [vmem:[#allocation2 + $0x28] sm:$0xf]  ;;  %v2879_v38 = vrot.slane %v10068_v62, 1  ;;  %v10098_v6 = vld [vmem:[#allocation2 + $0x2c] sm:$0xf] }
 0x264   : > { %v2623_v9 = vsel %vm898_vm4, %v2620_v50, %v2622_v43  ;;  %v2624_v12 = vrot.slane %v2572_v16, 1  ;;  %v10077_v60 = vcombine.low %v10070_v0, %v10072_v20  ;;  %7611 = vmatpush3.bf16.msra.mxu0 %v8310_v8 }
 0x265   : > { %v2659_v48 = vmax.f32 %v2570_v11, %v2623_v9  ;;  %7700 = vmatprep.subr.bf16.mxu0 %v8505_v1  ;;  %v10088_v56 = vsel %vm898_vm4, %v2877_v21, %v2879_v38  ;;  %v2772_v11 = vld [vmem:[#allocation2 + $0x44] sm:$0x3] }
 0x266   : > { %v2625_v35 = vsel %vm898_vm4, %v2622_v43, %v2624_v12  ;;  %v2661_v42 = vmax.f32 %v2572_v16, %v2624_v12  ;;  %7525 = vmatmul.mubr.bf16.gmra.mrb[196].mxu0 %v10088_v56  ;;  %v3435_v43 = vld [vmem:[#allocation2] sm:$0x8]  ;;  %v6329_v16 = vcombine.low %v9888_v53, %v9927_v39 }
 0x267   : > { %v2677_v28 = vmax.f32 %v9762_v19, %v2659_v48  ;;  %v2660_v47 = vmax.f32 %v2571_v27, %v2625_v35  ;;  %7581 = vmatmul.mubr.bf16.gmra.mrb[200].mxu1 %v10068_v62  ;;  %7528 = vmatprep.mubr.msk.bf16.mxu0 %vm8506_vm0, %v8505_v1  ;;  %v6328_v12 = vcombine.low %v3435_v43, %v9880_v40  ;;  %v8315_v53 = vld [vmem:[%s11233_s3 + $0x180] sm:$0xff]   ;;  %v3245_v43 = vrot.slane %v9980_v44, 2 }
 0x268   : > { %v2679_v59 = vmax.f32 %v1704_v2, %v2661_v42  ;;  %7584 = vmatprep.mubr.msk.bf16.mxu1 %vm8506_vm0, %v8505_v1  ;;  %v3517_v2 = vrot.slane %v6329_v16, 3  ;;  %v3215_v35 = vld [vmem:[#allocation2] sm:$0xc]  ;;  %v8319_v42 = vld [vmem:[%s11233_s3 + $0x188] sm:$0xff]  }
 0x269   : > { %v6620_v41 = vpack.c.bf16 %v2677_v28, %v2676_v13  ;;  %v2678_v52 = vmax.f32 %v9769_v15, %v2660_v47  ;;  %v3516_v48 = vrot.slane %v6328_v12, 3  ;;  %v6302_v40 = vcombine.low %v3215_v35, %v9853_v31  ;;  %v8314_v47 = vld [vmem:[%s11233_s3 + $0x100] sm:$0xff]  }
 0x26a   : > { %v6581_v19 = vpack.c.bf16 %v2679_v59, %v2679_v59  ;;  %v10096_v50 = vld [vmem:[#allocation2 + $0x30] sm:$0xff]   ;;  %v6331_v31 = vcombine.low %v9987_v61, %v10029_v63  ;;  %v8318_v61 = vld [vmem:[%s11233_s3 + $0x108] sm:$0xff]   ;;  %v8332_v16 = vld [vmem:[%s11233_s3 + $0x120] sm:$0xff]   ;;  %v3247_v35 = vrot.slane %v10031_v25, 2 }
 0x26b   : > { %6628 = vst [vmem:[#allocation2 + $0x38] sm:$0xff] %v6620_v41   ;;  %v6580_v10 = vpack.c.bf16 %v2678_v52, %v2678_v52  ;;  %v10100_v33 = vld [vmem:[#allocation2 + $0x30] sm:$0xf]  ;;  %v2881_v51 = vrot.slane %v10096_v50, 1  ;;  %v10118_v32 = vld [vmem:[#allocation2 + $0x34] sm:$0xf]  ;;  %v10165_v39 = vsel %vm3515_vm9, %v3516_v48, %v3517_v2 }
 0x26c   : > { %v2773_v36 = vsel %vm2771_vm8, %v6581_v19, %v2772_v11  ;;  %v10105_v15 = vcombine.low %v10098_v6, %v10100_v33  ;;  %v8325_v41 = vld [vmem:[%s11233_s3 + $0x190] sm:$0xff]   ;;  %v3521_v63 = vrot.slane %v6331_v31, 3  ;;  %v8329_v52 = vld [vmem:[%s11233_s3 + $0x198] sm:$0xff]   ;;  %v3243_v11 = vrot.slane %v9929_v22, 2 }
 0x26d   : > { %2768 = vst [vmem:[#allocation2 + $0x40] sm:$0xf] %v6580_v10  ;;  %2774 = vst [vmem:[#allocation2 + $0x44] sm:$0x3] %v2773_v36  ;;  %v10108_v24 = vsel %vm898_vm4, %v2879_v38, %v2881_v51  ;;  %v6330_v38 = vcombine.low %v9936_v26, %v9978_v30  ;;  %v3241_v26 = vrot.slane %v9882_v29, 2  ;;  %v3240_v30 = vrot.slane %v6302_v40, 2 }
 0x26e   : > { %7529 = vmatmul.mubr.bf16.gmra.mrb[200].mxu0 %v10108_v24  ;;  %v8322_v19 = vld [vmem:[%s11233_s3 + $0x110] sm:$0xff]   ;;  %v6332_v36 = vcombine.low %v10036_v23, %v10070_v0  ;;  %v8326_v23 = vld [vmem:[%s11233_s3 + $0x118] sm:$0xff]  }
 0x26f   : > { %7585 = vmatmul.mubr.bf16.gmra.mrb[204].mxu1 %v10096_v50  ;;  %7532 = vmatprep.mubr.msk.bf16.mxu0 %vm8506_vm0, %v8505_v1  ;;  %v3519_v28 = vrot.slane %v6330_v38, 3  ;;  %v10195_v29 = vsel %vm1368_vm5, %v3240_v30, %v3241_v26  ;;  %v8338_v48 = vld [vmem:[%s11233_s3 + $0x1b0] sm:$0xff]   ;;  %v8341_v38 = vld [vmem:[%s11233_s3 + $0x1b8] sm:$0xff]   ;;  %v3249_v30 = vrot.slane %v10068_v62, 2 }
 0x270   : > { %7588 = vmatprep.mubr.msk.bf16.mxu1 %vm8506_vm0, %v8505_v1  ;;  %v3523_v0 = vrot.slane %v6332_v36, 3  ;;  %v8339_v40 = vld [vmem:[%s11233_s3 + $0x130] sm:$0xff]  }
 0x271   : > { %v10185_v59 = vsel %vm3515_vm9, %v3517_v2, %v3519_v28  ;;  %v10215_v10 = vsel %vm3515_vm9, %v3519_v28, %v3521_v63  ;;  %v6333_v2 = vcombine.low %v10072_v20, %v10098_v6  ;;  %v8336_v20 = vld [vmem:[%s11233_s3 + $0x128] sm:$0xff]   ;;  %v6334_v28 = vcombine.low %v10100_v33, %v10118_v32  ;;  %v8342_v33 = vld [vmem:[%s11233_s3 + $0x138] sm:$0xff]  }
 0x272   : > { %v10116_v21 = vld [vmem:[#allocation2 + $0x38] sm:$0xff]   ;;  %v10246_v12 = vsel %vm3515_vm9, %v3521_v63, %v3523_v0  ;;  %v3251_v63 = vrot.slane %v10096_v50, 2 }
 0x273   : > { %v10120_v45 = vld [vmem:[#allocation2 + $0x38] sm:$0xf]  ;;  %v2883_v4 = vrot.slane %v10116_v21, 1  ;;  %v10130_v3 = vld [vmem:[#allocation2 + $0x3c] sm:$0xf]  ;;  %v3525_v6 = vrot.slane %v6333_v2, 3 }
 0x274   : > { %v10125_v46 = vcombine.low %v10118_v32, %v10120_v45  ;;  %v10132_v27 = vld [vmem:[#allocation2 + $0x40] sm:$0xf]  ;;  %v3527_v32 = vrot.slane %v6334_v28, 3  ;;  %v6335_v31 = vcombine.low %v10120_v45, %v10130_v3  ;;  %v3253_v36 = vrot.slane %v10116_v21, 2  ;;  %v8354_v28 = vld [vmem:[%s11233_s3 + $0x168] sm:$0xff]  }
 0x275   : > { %v10128_v55 = vsel %vm898_vm4, %v2881_v51, %v2883_v4  ;;  %v8306_v17 = vld [vmem:[#allocation2 + $0x40] ss:$0 sps:$4 sm:$0x77]   ;;  %v10137_v7 = vcombine.low %v10130_v3, %v10132_v27 }
 0x276   : > { %7533 = vmatmul.mubr.bf16.gmra.mrb[204].mxu0 %v10128_v55  ;;  %v10144_v13 = vrot.slane %v8306_v17, 1  ;;  %v10146_v8 = vld [vmem:[#allocation2 + $0x40] ss:$0 sps:$4 sm:$0x33]   ;;  %v8337_v17 = vld [vmem:[%s11233_s3 + $0x1a8] sm:$0xff]  }
 0x277   : > { %7589 = vmatmul.mubr.bf16.gmra.mrb[208].mxu1 %v10116_v21  ;;  %7536 = vmatprep.mubr.msk.bf16.mxu0 %vm8506_vm0, %v8505_v1  ;;  %v8333_v51 = vld [vmem:[%s11233_s3 + $0x1a0] sm:$0xff]  }
 0x278   : > { %7592 = vmatprep.mubr.msk.bf16.mxu1 %vm8506_vm0, %v8505_v1  ;;  %v10153_v9 = vsel %vm898_vm4, %v2883_v4, %v10144_v13  ;;  %v10225_v4 = vsel %vm1368_vm5, %v3241_v26, %v3243_v11  ;;  %v10284_v26 = vsel %vm1368_vm5, %v3245_v43, %v3247_v35  ;;  %v8344_v2 = vld [vmem:[%s11233_s3 + $0x140] sm:$0xff]  }
 0x27e   : > { %7537 = vmatmul.mubr.bf16.gmra.mrb[208].mxu0 %v10153_v9 }
 0x27f   : > { %7593 = vmatmul.mubr.bf16.gmra.mrb[212].mxu1 %v10146_v8  ;;  %7540 = vmatprep.mubr.msk.bf16.mxu0 %vm8506_vm0, %v8505_v1 }
 0x280   : > { %7664 = vmatprep.mubr.msk.bf16.mxu1 %vm8506_vm0, %v8505_v1 }
 0x286   : > { %7541 = vmatmul.mubr.bf16.gmra.mrb[212].mxu0 %v10144_v13 }
 0x287   : > { %7665 = vmatmul.mubr.bf16.vlgmr.msra.gmra.mrb[216].mxu1 %v10165_v39  ;;  %7612 = vmatprep.mubr.msk.bf16.mxu0 %vm8506_vm0, %v8505_v1 }
 0x288   : > { %7668 = vmatprep.mubr.msk.bf16.mxu1 %vm8506_vm0, %v8505_v1  ;;  %7753 = vmatpush3.bf16.msra.mxu1 %v8315_v53  ;;  %v10256_v53 = vsel %vm1368_vm5, %v3243_v11, %v3245_v43  ;;  %v10319_v11 = vsel %vm1368_vm5, %v3249_v30, %v3251_v63  ;;  %v8345_v43 = vld [vmem:[%s11233_s3 + $0x1c0] sm:$0xff]  }
 0x289   : > { %7754 = vmatprep.subr.bf16.mxu1 %v8505_v1 }
 0x28c   : > { %7755 = vmatpush3.bf16.msra.mxu1 %v8319_v42  ;;  %v10277_v42 = vsel %vm3515_vm9, %v3523_v0, %v3525_v6 }
 0x28d   : > { %7756 = vmatprep.subr.bf16.mxu1 %v8505_v1 }
 0x28e   : > { %7613 = vmatmul.mubr.bf16.vlgmr.msra.gmra.mrb[216].mxu0 %v10195_v29 }
 0x28f   : > { %7669 = vmatmul.mubr.bf16.gmra.mrb[220].mxu1 %v10185_v59  ;;  %7701 = vmatpush3.bf16.msra.mxu0 %v8314_v47  ;;  %v10298_v47 = vsel %vm3515_vm9, %v3525_v6, %v3527_v32  ;;  %v8353_v6 = vld [vmem:[%s11233_s3 + $0x1e0] sm:$0xff]  }
 0x290   : > { %7672 = vmatprep.mubr.msk.bf16.mxu1 %vm8506_vm0, %v8505_v1  ;;  %7616 = vmatprep.mubr.msk.bf16.mxu0 %vm8506_vm0, %v8505_v1 }
 0x291   : > { %7702 = vmatprep.subr.bf16.mxu0 %v8505_v1  ;;  %7757 = vmatpush3.bf16.msra.mxu1 %v8325_v41  ;;  %v10305_v41 = vsel %vm1368_vm5, %v3247_v35, %v3249_v30  ;;  %v8352_v35 = vld [vmem:[%s11233_s3 + $0x160] sm:$0xff]  }
 0x292   : > { %7758 = vmatprep.subr.bf16.mxu1 %v8505_v1  ;;  %v8362_v30 = vld [vmem:[%s11233_s3 + $0x240] sm:$0xff]  }
 0x293   : > { %7703 = vmatpush3.bf16.msra.mxu0 %v8318_v61  ;;  %v3529_v61 = vrot.slane %v6335_v31, 3  ;;  %v10475_v31 = vld [vmem:[#allocation2 + $0x44] ss:$0 sps:$4 sm:$0x33]  }
 0x294   : > { %7704 = vmatprep.subr.bf16.mxu0 %v8505_v1 }
 0x295   : > { %7759 = vmatpush3.bf16.msra.mxu1 %v8329_v52  ;;  %v3452_v52 = vld [vmem:[#allocation2 + $0x44] sm:$0x1]  ;;  %v10314_v45 = vsel %vm3515_vm9, %v3527_v32, %v3529_v61  ;;  %v8360_v32 = vld [vmem:[%s11233_s3 + $0x178] sm:$0xff]  }
 0x296   : > { %7760 = vmatprep.subr.bf16.mxu1 %v8505_v1  ;;  %7617 = vmatmul.mubr.bf16.gmra.mrb[220].mxu0 %v10225_v4  ;;  %v6336_v3 = vcombine.low %v10132_v27, %v3452_v52 }
 0x297   : > { %7673 = vmatmul.mubr.bf16.gmra.mrb[224].mxu1 %v10215_v10  ;;  %7620 = vmatprep.mubr.msk.bf16.mxu0 %vm8506_vm0, %v8505_v1 }
 0x298   : > { %7676 = vmatprep.mubr.msk.bf16.mxu1 %vm8506_vm0, %v8505_v1  ;;  %7705 = vmatpush3.bf16.msra.mxu0 %v8322_v19  ;;  %v10326_v19 = vrot.slane %v6336_v3, 3 }
 0x299   : > { %7706 = vmatprep.subr.bf16.mxu0 %v8505_v1  ;;  %7761 = vmatpush3.bf16.msra.mxu1 %v8333_v51  ;;  %v10335_v51 = vsel %vm1368_vm5, %v3251_v63, %v3253_v36 }
 0x29a   : > { %7762 = vmatprep.subr.bf16.mxu1 %v8505_v1  ;;  %v10331_v27 = vsel %vm3515_vm9, %v3529_v61, %v10326_v19 }
 0x29c   : > { %7707 = vmatpush3.bf16.msra.mxu0 %v8326_v23  ;;  %v8340_v23 = vld [vmem:[#allocation2 + $0x40] ss:$0 sps:$4 sm:$0xff]  }
 0x29d   : > { %7708 = vmatprep.subr.bf16.mxu0 %v8505_v1  ;;  %7763 = vmatpush3.bf16.msra.mxu1 %v8337_v17  ;;  %v10342_v0 = vrot.slane %v8340_v23, 2 }
 0x29e   : > { %7764 = vmatprep.subr.bf16.mxu1 %v8505_v1  ;;  %7621 = vmatmul.mubr.bf16.gmra.mrb[224].mxu0 %v10256_v53 }
 0x29f   : > { %7677 = vmatmul.mubr.bf16.gmra.mrb[228].mxu1 %v10246_v12  ;;  %7624 = vmatprep.mubr.msk.bf16.mxu0 %vm8506_vm0, %v8505_v1  ;;  %v10347_v17 = vsel %vm1368_vm5, %v3253_v36, %v10342_v0 }
 0x2a0   : > { %7680 = vmatprep.mubr.msk.bf16.mxu1 %vm8506_vm0, %v8505_v1  ;;  %7709 = vmatpush3.bf16.msra.mxu0 %v8332_v16  ;;  %v8347_v16 = vld [vmem:[%s11233_s3 + $0x1c8] sm:$0xff]  }
 0x2a1   : > { %7710 = vmatprep.subr.bf16.mxu0 %v8505_v1  ;;  %7765 = vmatpush3.bf16.msra.mxu1 %v8338_v48  ;;  %v8346_v48 = vld [vmem:[%s11233_s3 + $0x148] sm:$0xff]  }
 0x2a2   : > { %7766 = vmatprep.subr.bf16.mxu1 %v8505_v1 }
 0x2a4   : > { %7711 = vmatpush3.bf16.msra.mxu0 %v8336_v20  ;;  %v8348_v20 = vld [vmem:[%s11233_s3 + $0x150] sm:$0xff]  }
 0x2a5   : > { %7712 = vmatprep.subr.bf16.mxu0 %v8505_v1  ;;  %7767 = vmatpush3.bf16.msra.mxu1 %v8341_v38  ;;  %v8350_v38 = vld [vmem:[%s11233_s3 + $0x158] sm:$0xff]  }
 0x2a6   : > { %7856 = vmatprep.subr.bf16.mxu1 %v8505_v1  ;;  %7625 = vmatmul.mubr.bf16.gmra.mrb[228].mxu0 %v10284_v26 }
 0x2a7   : > { %7681 = vmatmul.mubr.bf16.gmra.mrb[232].mxu1 %v10277_v42  ;;  %7628 = vmatprep.mubr.msk.bf16.mxu0 %vm8506_vm0, %v8505_v1 }
 0x2a8   : > { %7684 = vmatprep.mubr.msk.bf16.mxu1 %vm8506_vm0, %v8505_v1  ;;  %7713 = vmatpush3.bf16.msra.mxu0 %v8339_v40  ;;  %v8356_v40 = vld [vmem:[%s11233_s3 + $0x1f0] sm:$0xff]  }
 0x2a9   : > { %7714 = vmatprep.subr.bf16.mxu0 %v8505_v1 }
 0x2ac   : > { %7715 = vmatpush3.bf16.msra.mxu0 %v8342_v33  ;;  %v8357_v33 = vld [vmem:[%s11233_s3 + $0x170] sm:$0xff]  }
 0x2ad   : > { %7804 = vmatprep.subr.bf16.mxu0 %v8505_v1 }
 0x2ae   : > { %7629 = vmatmul.mubr.bf16.gmra.mrb[232].mxu0 %v10305_v41 }
 0x2af   : > { %7685 = vmatmul.mubr.bf16.gmra.mrb[236].mxu1 %v10298_v47  ;;  %7632 = vmatprep.mubr.msk.bf16.mxu0 %vm8506_vm0, %v8505_v1 }
 0x2b0   : > { %7688 = vmatprep.mubr.msk.bf16.mxu1 %vm8506_vm0, %v8505_v1 }
 0x2b6   : > { %7633 = vmatmul.mubr.bf16.gmra.mrb[236].mxu0 %v10319_v11 }
 0x2b7   : > { %7689 = vmatmul.mubr.bf16.gmra.mrb[240].mxu1 %v10314_v45  ;;  %7636 = vmatprep.mubr.msk.bf16.mxu0 %vm8506_vm0, %v8505_v1 }
 0x2b8   : > { %7692 = vmatprep.mubr.msk.bf16.mxu1 %vm8506_vm0, %v8505_v1 }
 0x2be   : > { %7637 = vmatmul.mubr.bf16.gmra.mrb[240].mxu0 %v10335_v51 }
 0x2bf   : > { %7693 = vmatmul.mubr.bf16.gmra.mrb[244].mxu1 %v10331_v27  ;;  %7640 = vmatprep.mubr.msk.bf16.mxu0 %vm8506_vm0, %v8505_v1 }
 0x2c0   : > { %7696 = vmatprep.mubr.msk.bf16.mxu1 %vm8506_vm0, %v8505_v1 }
 0x2c6   : > { %7641 = vmatmul.mubr.bf16.gmra.mrb[244].mxu0 %v10347_v17 }
 0x2c7   : > { %7697 = vmatmul.mubr.bf16.gmra.mrb[248].mxu1 %v10326_v19  ;;  %7644 = vmatprep.mubr.msk.bf16.mxu0 %vm8506_vm0, %v8505_v1 }
 0x2c8   : > { %7768 = vmatprep.mubr.msk.bf16.mxu1 %vm8506_vm0, %v8505_v1 }
 0x2ce   : > { %7645 = vmatmul.mubr.bf16.gmra.mrb[248].mxu0 %v10342_v0 }
 0x2cf   : > { %7769 = vmatmul.mubr.bf16.vlgmr.msra.gmra.mrb[252].mxu1 %v9907_v49  ;;  %7716 = vmatprep.mubr.msk.bf16.mxu0 %vm8506_vm0, %v8505_v1  ;;  %v8349_v49 = vld [vmem:[%s11233_s3 + $0x1d0] sm:$0xff]  }
 0x2d0   : > { %7772 = vmatprep.mubr.msk.bf16.mxu1 %vm8506_vm0, %v8505_v1  ;;  %7857 = vmatpush3.bf16.msra.mxu1 %v8345_v43 }
 0x2d1   : > { %7858 = vmatprep.subr.bf16.mxu1 %v8505_v1 }
 0x2d4   : > { %7859 = vmatpush3.bf16.msra.mxu1 %v8347_v16  ;;  %v8361_v16 = vld [vmem:[%s11233_s3 + $0x200] sm:$0xff]  }
 0x2d5   : > { %7860 = vmatprep.subr.bf16.mxu1 %v8505_v1 }
 0x2d6   : > { %7717 = vmatmul.mubr.bf16.vlgmr.msra.gmra.mrb[252].mxu0 %v9897_v14 }
 0x2d7   : > { %7773 = vmatmul.mubr.bf16.gmra.mrb[0].mxu1 %v9957_v58  ;;  %7805 = vmatpush3.bf16.msra.mxu0 %v8344_v2  ;;  %v8351_v58 = vld [vmem:[%s11233_s3 + $0x1d8] sm:$0xff]  }
 0x2d8   : > { %7776 = vmatprep.mubr.msk.bf16.mxu1 %vm8506_vm0, %v8505_v1  ;;  %7720 = vmatprep.mubr.msk.bf16.mxu0 %vm8506_vm0, %v8505_v1 }
 0x2d9   : > { %7806 = vmatprep.subr.bf16.mxu0 %v8505_v1  ;;  %7861 = vmatpush3.bf16.msra.mxu1 %v8349_v49 }
 0x2da   : > { %7862 = vmatprep.subr.bf16.mxu1 %v8505_v1 }
 0x2db   : > { %7807 = vmatpush3.bf16.msra.mxu0 %v8346_v48  ;;  %v8366_v48 = vld [vmem:[%s11233_s3 + $0x250] sm:$0xff]  }
 0x2dc   : > { %7808 = vmatprep.subr.bf16.mxu0 %v8505_v1 }
 0x2dd   : > { %7863 = vmatpush3.bf16.msra.mxu1 %v8351_v58  ;;  %v8363_v58 = vld [vmem:[%s11233_s3 + $0x208] sm:$0xff]  }
 0x2de   : > { %7864 = vmatprep.subr.bf16.mxu1 %v8505_v1  ;;  %7721 = vmatmul.mubr.bf16.gmra.mrb[0].mxu0 %v9946_v5 }
 0x2df   : > { %7777 = vmatmul.mubr.bf16.gmra.mrb[4].mxu1 %v10008_v57  ;;  %7724 = vmatprep.mubr.msk.bf16.mxu0 %vm8506_vm0, %v8505_v1  ;;  %v8355_v57 = vld [vmem:[%s11233_s3 + $0x1e8] sm:$0xff]  }
 0x2e0   : > { %7780 = vmatprep.mubr.msk.bf16.mxu1 %vm8506_vm0, %v8505_v1  ;;  %7809 = vmatpush3.bf16.msra.mxu0 %v8348_v20 }
 0x2e1   : > { %7810 = vmatprep.subr.bf16.mxu0 %v8505_v1  ;;  %7865 = vmatpush3.bf16.msra.mxu1 %v8353_v6 }
 0x2e2   : > { %7866 = vmatprep.subr.bf16.mxu1 %v8505_v1 }
 0x2e4   : > { %7811 = vmatpush3.bf16.msra.mxu0 %v8350_v38 }
 0x2e5   : > { %7812 = vmatprep.subr.bf16.mxu0 %v8505_v1  ;;  %7867 = vmatpush3.bf16.msra.mxu1 %v8355_v57 }
 0x2e6   : > { %7868 = vmatprep.subr.bf16.mxu1 %v8505_v1  ;;  %7725 = vmatmul.mubr.bf16.gmra.mrb[4].mxu0 %v9997_v54 }
 0x2e7   : > { %7781 = vmatmul.mubr.bf16.gmra.mrb[8].mxu1 %v10054_v18  ;;  %7728 = vmatprep.mubr.msk.bf16.mxu0 %vm8506_vm0, %v8505_v1  ;;  %v8358_v18 = vld [vmem:[%s11233_s3 + $0x1f8] sm:$0xff]  }
 0x2e8   : > { %7784 = vmatprep.mubr.msk.bf16.mxu1 %vm8506_vm0, %v8505_v1  ;;  %7813 = vmatpush3.bf16.msra.mxu0 %v8352_v35 }
 0x2e9   : > { %7814 = vmatprep.subr.bf16.mxu0 %v8505_v1  ;;  %7869 = vmatpush3.bf16.msra.mxu1 %v8356_v40 }
 0x2ea   : > { %7870 = vmatprep.subr.bf16.mxu1 %v8505_v1 }
 0x2ec   : > { %7815 = vmatpush3.bf16.msra.mxu0 %v8354_v28 }
 0x2ed   : > { %7816 = vmatprep.subr.bf16.mxu0 %v8505_v1  ;;  %7871 = vmatpush3.bf16.msra.mxu1 %v8358_v18  ;;  %v8365_v18 = vld [vmem:[%s11233_s3 + $0x210] sm:$0xff]  }
 0x2ee   : > { %7960 = vmatprep.subr.bf16.mxu1 %v8505_v1  ;;  %7729 = vmatmul.mubr.bf16.gmra.mrb[8].mxu0 %v10046_v34 }
 0x2ef   : > { %7785 = vmatmul.mubr.bf16.gmra.mrb[12].mxu1 %v10088_v56  ;;  %7732 = vmatprep.mubr.msk.bf16.mxu0 %vm8506_vm0, %v8505_v1 }
 0x2f0   : > { %7788 = vmatprep.mubr.msk.bf16.mxu1 %vm8506_vm0, %v8505_v1  ;;  %7817 = vmatpush3.bf16.msra.mxu0 %v8357_v33 }
 0x2f1   : > { %7818 = vmatprep.subr.bf16.mxu0 %v8505_v1 }
 0x2f4   : > { %7819 = vmatpush3.bf16.msra.mxu0 %v8360_v32 }
 0x2f5   : > { %7908 = vmatprep.subr.bf16.mxu0 %v8505_v1 }
 0x2f6   : > { %7733 = vmatmul.mubr.bf16.gmra.mrb[12].mxu0 %v10077_v60 }
 0x2f7   : > { %7789 = vmatmul.mubr.bf16.gmra.mrb[16].mxu1 %v10108_v24  ;;  %7736 = vmatprep.mubr.msk.bf16.mxu0 %vm8506_vm0, %v8505_v1 }
 0x2f8   : > { %7792 = vmatprep.mubr.msk.bf16.mxu1 %vm8506_vm0, %v8505_v1 }
 0x2fe   : > { %7737 = vmatmul.mubr.bf16.gmra.mrb[16].mxu0 %v10105_v15 }
 0x2ff   : > { %7793 = vmatmul.mubr.bf16.gmra.mrb[20].mxu1 %v10128_v55  ;;  %7740 = vmatprep.mubr.msk.bf16.mxu0 %vm8506_vm0, %v8505_v1 }
 0x300   : > { %7796 = vmatprep.mubr.msk.bf16.mxu1 %vm8506_vm0, %v8505_v1 }
 0x306   : > { %7741 = vmatmul.mubr.bf16.gmra.mrb[20].mxu0 %v10125_v46 }
 0x307   : > { %7797 = vmatmul.mubr.bf16.gmra.mrb[24].mxu1 %v10153_v9  ;;  %7744 = vmatprep.mubr.msk.bf16.mxu0 %vm8506_vm0, %v8505_v1 }
 0x308   : > { %7800 = vmatprep.mubr.msk.bf16.mxu1 %vm8506_vm0, %v8505_v1 }
 0x30e   : > { %7745 = vmatmul.mubr.bf16.gmra.mrb[24].mxu0 %v10137_v7 }
 0x30f   : > { %7801 = vmatmul.mubr.bf16.gmra.mrb[28].mxu1 %v10144_v13  ;;  %7748 = vmatprep.mubr.msk.bf16.mxu0 %vm8506_vm0, %v8505_v1  ;;  %v8364_v13 = vld [vmem:[%s11233_s3 + $0x248] sm:$0xff]  }
 0x310   : > { %7872 = vmatprep.mubr.msk.bf16.mxu1 %vm8506_vm0, %v8505_v1 }
 0x312   : > { %v3145_v56 = vpop.f32.mrb[180].mxu1 }
 0x313   : > { %v7562_v24 = vpop.f32.mrb[181].mxu1 }
 0x314   : > { %v3148_v55 = vpop.f32.mrb[182].mxu1  ;;  %v8440_v24 = vld [vmem:[#allocation2 + $0x8] sm:$0xff]  }
 0x315   : > { %v7563_v9 = vpop.f32.mrb[183].mxu1 }
 0x316   : > { %7749 = vmatmul.mubr.bf16.gmra.mrb[28].mxu0 %v10475_v31 }
 0x317   : > { %7873 = vmatmul.mubr.bf16.vlgmr.msra.gmra.mrb[32].mxu1 %v10195_v29  ;;  %7820 = vmatprep.mubr.msk.bf16.mxu0 %vm8506_vm0, %v8505_v1 }
 0x318   : > { %7876 = vmatprep.mubr.msk.bf16.mxu1 %vm8506_vm0, %v8505_v1  ;;  %7961 = vmatpush3.bf16.msra.mxu1 %v8362_v30 }
 0x319   : > { %7962 = vmatprep.subr.bf16.mxu1 %v8505_v1  ;;  %v2978_v52 = vpop.f32.mrb[180].mxu0 }
 0x31a   : > { %v3153_v61 = vpop.f32.mrb[184].mxu1  ;;  %v10487_v29 = vadd.f32 %v3145_v56, %v2978_v52  ;;  %v7510_v36 = vpop.f32.mrb[181].mxu0  ;;  %v8370_v56 = vld [vmem:[%s11233_s3 + $0x260] sm:$0xff]  }
 0x31b   : > { %v7566_v63 = vpop.f32.mrb[185].mxu1  ;;  %v2981_v43 = vpop.f32.mrb[182].mxu0 }
 0x31c   : > { %v3156_v3 = vpop.f32.mrb[186].mxu1  ;;  %7963 = vmatpush3.bf16.msra.mxu1 %v8364_v13  ;;  %v10492_v2 = vadd.f32 %v3148_v55, %v2981_v43  ;;  %v7511_v49 = vpop.f32.mrb[183].mxu0  ;;  %v8367_v55 = vld [vmem:[%s11233_s3 + $0x218] sm:$0xff]  }
 0x31d   : > { %v7567_v23 = vpop.f32.mrb[187].mxu1  ;;  %7964 = vmatprep.subr.bf16.mxu1 %v8505_v1  ;;  %v8373_v49 = vld [vmem:[%s11233_s3 + $0x270] sm:$0xff]  }
 0x31e   : > { %7821 = vmatmul.mubr.bf16.vlgmr.msra.gmra.mrb[32].mxu0 %v9861_v37  ;;  %v8369_v23 = vld [vmem:[%s11233_s3 + $0x220] sm:$0xff]  }
 0x31f   : > { %7877 = vmatmul.mubr.bf16.gmra.mrb[36].mxu1 %v10225_v4  ;;  %7909 = vmatpush3.bf16.msra.mxu0 %v8361_v16  ;;  %v8368_v4 = vld [vmem:[%s11233_s3 + $0x258] sm:$0xff]  }
 0x320   : > { %7880 = vmatprep.mubr.msk.bf16.mxu1 %vm8506_vm0, %v8505_v1  ;;  %7824 = vmatprep.mubr.msk.bf16.mxu0 %vm8506_vm0, %v8505_v1 }
 0x321   : > { %7910 = vmatprep.subr.bf16.mxu0 %v8505_v1  ;;  %7965 = vmatpush3.bf16.msra.mxu1 %v8366_v48  ;;  %v2986_v6 = vpop.f32.mrb[184].mxu0  ;;  %v8371_v48 = vld [vmem:[%s11233_s3 + $0x228] sm:$0xff]  }
 0x322   : > { %v3161_v20 = vpop.f32.mrb[188].mxu1  ;;  %7966 = vmatprep.subr.bf16.mxu1 %v8505_v1  ;;  %v10512_v57 = vadd.f32 %v3153_v61, %v2986_v6  ;;  %v7514_v35 = vpop.f32.mrb[185].mxu0 }
 0x323   : > { %v7570_v37 = vpop.f32.mrb[189].mxu1  ;;  %v2989_v28 = vpop.f32.mrb[186].mxu0  ;;  %7911 = vmatpush3.bf16.msra.mxu0 %v8363_v58 }
 0x324   : > { %v3164_v38 = vpop.f32.mrb[190].mxu1  ;;  %v10517_v33 = vadd.f32 %v3156_v3, %v2989_v28  ;;  %v7515_v32 = vpop.f32.mrb[187].mxu0  ;;  %7912 = vmatprep.subr.bf16.mxu0 %v8505_v1 }
 0x325   : > { %v7571_v40 = vpop.f32.mrb[191].mxu1  ;;  %7967 = vmatpush3.bf16.msra.mxu1 %v8368_v4  ;;  %v8376_v32 = vld [vmem:[%s11233_s3 + $0x238] sm:$0xff]  }
 0x326   : > { %7968 = vmatprep.subr.bf16.mxu1 %v8505_v1  ;;  %7825 = vmatmul.mubr.bf16.gmra.mrb[36].mxu0 %v8440_v24  ;;  %v8374_v40 = vld [vmem:[%s11233_s3 + $0x230] sm:$0xff]  }
 0x327   : > { %7881 = vmatmul.mubr.bf16.gmra.mrb[40].mxu1 %v10256_v53  ;;  %7828 = vmatprep.mubr.msk.bf16.mxu0 %vm8506_vm0, %v8505_v1  ;;  %v8372_v53 = vld [vmem:[%s11233_s3 + $0x268] sm:$0xff]  }
 0x328   : > { %7884 = vmatprep.mubr.msk.bf16.mxu1 %vm8506_vm0, %v8505_v1  ;;  %7913 = vmatpush3.bf16.msra.mxu0 %v8365_v18 }
 0x329   : > { %7914 = vmatprep.subr.bf16.mxu0 %v8505_v1  ;;  %7969 = vmatpush3.bf16.msra.mxu1 %v8370_v56  ;;  %v2994_v13 = vpop.f32.mrb[188].mxu0 }
 0x32a   : > { %v3169_v9 = vpop.f32.mrb[192].mxu1  ;;  %7970 = vmatprep.subr.bf16.mxu1 %v8505_v1  ;;  %v10537_v63 = vadd.f32 %v3161_v20, %v2994_v13  ;;  %v7518_v52 = vpop.f32.mrb[189].mxu0 }
 0x32b   : > { %v7574_v30 = vpop.f32.mrb[193].mxu1  ;;  %v2997_v36 = vpop.f32.mrb[190].mxu0 }
 0x32c   : > { %v3172_v61 = vpop.f32.mrb[194].mxu1  ;;  %7915 = vmatpush3.bf16.msra.mxu0 %v8367_v55  ;;  %v10542_v43 = vadd.f32 %v3164_v38, %v2997_v36  ;;  %v7519_v16 = vpop.f32.mrb[191].mxu0 }
 0x32d   : > { %v7575_v3 = vpop.f32.mrb[195].mxu1  ;;  %7916 = vmatprep.subr.bf16.mxu0 %v8505_v1  ;;  %7971 = vmatpush3.bf16.msra.mxu1 %v8372_v53 }
 0x32e   : > { %7972 = vmatprep.subr.bf16.mxu1 %v8505_v1  ;;  %7829 = vmatmul.mubr.bf16.gmra.mrb[40].mxu0 %v9929_v22 }
 0x32f   : > { %7885 = vmatmul.mubr.bf16.gmra.mrb[44].mxu1 %v10284_v26  ;;  %7832 = vmatprep.mubr.msk.bf16.mxu0 %vm8506_vm0, %v8505_v1  ;;  %v8375_v26 = vld [vmem:[%s11233_s3 + $0x278] sm:$0xff]  }
 0x330   : > { %7888 = vmatprep.mubr.msk.bf16.mxu1 %vm8506_vm0, %v8505_v1  ;;  %7917 = vmatpush3.bf16.msra.mxu0 %v8369_v23 }
 0x331   : > { %7918 = vmatprep.subr.bf16.mxu0 %v8505_v1  ;;  %7973 = vmatpush3.bf16.msra.mxu1 %v8373_v49  ;;  %v3002_v20 = vpop.f32.mrb[192].mxu0 }
 0x332   : > { %v3177_v58 = vpop.f32.mrb[196].mxu1  ;;  %7974 = vmatprep.subr.bf16.mxu1 %v8505_v1  ;;  %v10563_v37 = vadd.f32 %v3169_v9, %v3002_v20  ;;  %v7522_v6 = vpop.f32.mrb[193].mxu0 }
 0x333   : > { %v7578_v22 = vpop.f32.mrb[197].mxu1  ;;  %v3005_v35 = vpop.f32.mrb[194].mxu0 }
 0x334   : > { %v3180_v4 = vpop.f32.mrb[198].mxu1  ;;  %7919 = vmatpush3.bf16.msra.mxu0 %v8371_v48  ;;  %v10568_v28 = vadd.f32 %v3172_v61, %v3005_v35  ;;  %v7523_v18 = vpop.f32.mrb[195].mxu0 }
 0x335   : > { %v7579_v38 = vpop.f32.mrb[199].mxu1  ;;  %7920 = vmatprep.subr.bf16.mxu0 %v8505_v1  ;;  %7975 = vmatpush3.bf16.msra.mxu1 %v8375_v26 }
 0x336   : > { %8032 = vmatprep.subr.bf16.mxu1 %v8505_v1  ;;  %7833 = vmatmul.mubr.bf16.gmra.mrb[44].mxu0 %v9980_v44 }
 0x337   : > { %7889 = vmatmul.mubr.bf16.gmra.mrb[48].mxu1 %v10305_v41  ;;  %7836 = vmatprep.mubr.msk.bf16.mxu0 %vm8506_vm0, %v8505_v1 }
 0x338   : > { %7892 = vmatprep.mubr.msk.bf16.mxu1 %vm8506_vm0, %v8505_v1  ;;  %7921 = vmatpush3.bf16.msra.mxu0 %v8374_v40 }
 0x339   : > { %7922 = vmatprep.subr.bf16.mxu0 %v8505_v1  ;;  %v3010_v41 = vpop.f32.mrb[196].mxu0 }
 0x33a   : > { %v3185_v56 = vpop.f32.mrb[200].mxu1  ;;  %v7526_v9 = vpop.f32.mrb[197].mxu0 }
 0x33b   : > { %v7582_v24 = vpop.f32.mrb[201].mxu1  ;;  %v3013_v44 = vpop.f32.mrb[198].mxu0 }
 0x33c   : > { %v3188_v55 = vpop.f32.mrb[202].mxu1  ;;  %7923 = vmatpush3.bf16.msra.mxu0 %v8376_v32  ;;  %v10582_v30 = vadd.f32 %v3180_v4, %v3013_v44  ;;  %v7527_v13 = vpop.f32.mrb[199].mxu0 }
 0x33d   : > { %v7583_v53 = vpop.f32.mrb[203].mxu1  ;;  %8012 = vmatprep.subr.bf16.mxu0 %v8505_v1 }
 0x33e   : > { %7837 = vmatmul.mubr.bf16.gmra.mrb[48].mxu0 %v10031_v25 }
 0x33f   : > { %7893 = vmatmul.mubr.bf16.gmra.mrb[52].mxu1 %v10319_v11  ;;  %7840 = vmatprep.mubr.msk.bf16.mxu0 %vm8506_vm0, %v8505_v1 }
 0x340   : > { %7896 = vmatprep.mubr.msk.bf16.mxu1 %vm8506_vm0, %v8505_v1 }
 0x341   : > { %v3018_v3 = vpop.f32.mrb[200].mxu0 }
 0x342   : > { %v3193_v61 = vpop.f32.mrb[204].mxu1  ;;  %v10591_v23 = vadd.f32 %v3185_v56, %v3018_v3  ;;  %v7530_v16 = vpop.f32.mrb[201].mxu0 }
 0x343   : > { %v7586_v52 = vpop.f32.mrb[205].mxu1  ;;  %v3021_v48 = vpop.f32.mrb[202].mxu0 }
 0x344   : > { %v3196_v36 = vpop.f32.mrb[206].mxu1  ;;  %v10593_v58 = vadd.f32 %v3188_v55, %v3021_v48  ;;  %v7531_v11 = vpop.f32.mrb[203].mxu0 }
 0x345   : > { %v7587_v49 = vpop.f32.mrb[207].mxu1 }
 0x346   : > { %7841 = vmatmul.mubr.bf16.gmra.mrb[52].mxu0 %v10068_v62 }
 0x347   : > { %7897 = vmatmul.mubr.bf16.gmra.mrb[56].mxu1 %v10335_v51  ;;  %7844 = vmatprep.mubr.msk.bf16.mxu0 %vm8506_vm0, %v8505_v1 }
 0x348   : > { %7900 = vmatprep.mubr.msk.bf16.mxu1 %vm8506_vm0, %v8505_v1 }
 0x349   : > { %v3026_v22 = vpop.f32.mrb[204].mxu0 }
 0x34a   : > { %v3201_v25 = vpop.f32.mrb[208].mxu1  ;;  %v10601_v4 = vadd.f32 %v3193_v61, %v3026_v22  ;;  %v7534_v6 = vpop.f32.mrb[205].mxu0 }
 0x34b   : > { %v7590_v26 = vpop.f32.mrb[209].mxu1  ;;  %v3029_v35 = vpop.f32.mrb[206].mxu0 }
 0x34c   : > { %v3204_v20 = vpop.f32.mrb[210].mxu1  ;;  %v10603_v40 = vadd.f32 %v3196_v36, %v3029_v35  ;;  %v7535_v51 = vpop.f32.mrb[207].mxu0 }
 0x34d   : > { %v7591_v38 = vpop.f32.mrb[211].mxu1 }
 0x34e   : > { %7845 = vmatmul.mubr.bf16.gmra.mrb[56].mxu0 %v10096_v50 }
 0x34f   : > { %7901 = vmatmul.mubr.bf16.gmra.mrb[60].mxu1 %v10347_v17  ;;  %7848 = vmatprep.mubr.msk.bf16.mxu0 %vm8506_vm0, %v8505_v1 }
 0x350   : > { %7904 = vmatprep.mubr.msk.bf16.mxu1 %vm8506_vm0, %v8505_v1 }
 0x351   : > { %v3034_v32 = vpop.f32.mrb[208].mxu0 }
 0x352   : > { %v3209_v62 = vpop.f32.mrb[212].mxu1  ;;  %v10611_v24 = vadd.f32 %v3201_v25, %v3034_v32  ;;  %v7538_v41 = vpop.f32.mrb[209].mxu0 }
 0x353   : > { %v7594_v18 = vpop.f32.mrb[213].mxu1  ;;  %v3037_v9 = vpop.f32.mrb[210].mxu0 }
 0x354   : > { %v3212_v56 = vpop.f32.mrb[214].mxu1  ;;  %v10613_v53 = vadd.f32 %v3204_v20, %v3037_v9  ;;  %v7539_v17 = vpop.f32.mrb[211].mxu0 }
 0x355   : > { %v7595_v55 = vpop.f32.mrb[215].mxu1 }
 0x356   : > { %7849 = vmatmul.mubr.bf16.gmra.mrb[60].mxu0 %v10116_v21 }
 0x357   : > { %7905 = vmatmul.mubr.bf16.gmra.mrb[64].mxu1 %v10342_v0  ;;  %7852 = vmatprep.mubr.msk.bf16.mxu0 %vm8506_vm0, %v8505_v1 }
 0x358   : > { %7976 = vmatprep.mubr.msk.bf16.mxu1 %vm8506_vm0, %v8505_v1 }
 0x359   : > { %v3042_v13 = vpop.f32.mrb[212].mxu0 }
 0x35a   : > { %v3624_v50 = vpop.f32.mrb[216].mxu1  ;;  %v10621_v52 = vadd.f32 %v3209_v62, %v3042_v13  ;;  %v7542_v3 = vpop.f32.mrb[213].mxu0 }
 0x35b   : > { %v7666_v44 = vpop.f32.mrb[217].mxu1  ;;  %v3045_v16 = vpop.f32.mrb[214].mxu0 }
 0x35c   : > { %v3627_v61 = vpop.f32.mrb[218].mxu1  ;;  %v7543_v49 = vpop.f32.mrb[215].mxu0 }
 0x35d   : > { %v7667_v36 = vpop.f32.mrb[219].mxu1 }
 0x35e   : > { %7853 = vmatmul.mubr.bf16.gmra.mrb[64].mxu0 %v10146_v8 }
 0x35f   : > { %7977 = vmatmul.mubr.bf16.vlgmr.msra.gmra.mrb[68].mxu1 %v9897_v14  ;;  %7924 = vmatprep.mubr.msk.bf16.mxu0 %vm8506_vm0, %v8505_v1 }
 0x360   : > { %7980 = vmatprep.mubr.msk.bf16.mxu1 %vm8506_vm0, %v8505_v1 }
 0x361   : > { %v3348_v48 = vpop.f32.mrb[216].mxu0 }
 0x362   : > { %v3632_v21 = vpop.f32.mrb[220].mxu1  ;;  %v3418_v25 = vadd.f32 %v3348_v48, %v10487_v29  ;;  %v7614_v26 = vpop.f32.mrb[217].mxu0 }
 0x363   : > { %v7670_v0 = vpop.f32.mrb[221].mxu1  ;;  %v3351_v20 = vpop.f32.mrb[218].mxu0 }
 0x364   : > { %v3635_v11 = vpop.f32.mrb[222].mxu1  ;;  %v3419_v6 = vadd.f32 %v3351_v20, %v10492_v2  ;;  %v7615_v14 = vpop.f32.mrb[219].mxu0  ;;  %v10631_v38 = vadd.f32 %v3624_v50, %v3418_v25 }
 0x365   : > { %v7671_v22 = vpop.f32.mrb[223].mxu1 }
 0x366   : > { %7925 = vmatmul.mubr.bf16.vlgmr.msra.gmra.mrb[68].mxu0 %v10165_v39  ;;  %v10637_v8 = vadd.f32 %v3627_v61, %v3419_v6 }
 0x367   : > { %7981 = vmatmul.mubr.bf16.gmra.mrb[72].mxu1 %v9946_v5  ;;  %7928 = vmatprep.mubr.msk.bf16.mxu0 %vm8506_vm0, %v8505_v1 }
 0x368   : > { %7984 = vmatprep.mubr.msk.bf16.mxu1 %vm8506_vm0, %v8505_v1 }
 0x369   : > { %v3356_v51 = vpop.f32.mrb[220].mxu0 }
 0x36a   : > { %v3640_v29 = vpop.f32.mrb[224].mxu1  ;;  %v3420_v2 = vadd.f32 %v3356_v51, %v10512_v57  ;;  %v7618_v18 = vpop.f32.mrb[221].mxu0 }
 0x36b   : > { %v7674_v35 = vpop.f32.mrb[225].mxu1  ;;  %v3359_v56 = vpop.f32.mrb[222].mxu0 }
 0x36c   : > { %v3643_v62 = vpop.f32.mrb[226].mxu1  ;;  %v3421_v5 = vadd.f32 %v3359_v56, %v10517_v33  ;;  %v7619_v39 = vpop.f32.mrb[223].mxu0  ;;  %v10643_v41 = vadd.f32 %v3632_v21, %v3420_v2 }
 0x36d   : > { %v7675_v32 = vpop.f32.mrb[227].mxu1 }
 0x36e   : > { %7929 = vmatmul.mubr.bf16.gmra.mrb[72].mxu0 %v10185_v59  ;;  %v10649_v55 = vadd.f32 %v3635_v11, %v3421_v5 }
 0x36f   : > { %7985 = vmatmul.mubr.bf16.gmra.mrb[76].mxu1 %v9997_v54  ;;  %7932 = vmatprep.mubr.msk.bf16.mxu0 %vm8506_vm0, %v8505_v1 }
 0x370   : > { %7988 = vmatprep.mubr.msk.bf16.mxu1 %vm8506_vm0, %v8505_v1 }
 0x371   : > { %v3364_v17 = vpop.f32.mrb[224].mxu0 }
 0x372   : > { %v3648_v57 = vpop.f32.mrb[228].mxu1  ;;  %v3422_v33 = vadd.f32 %v3364_v17, %v10537_v63  ;;  %v7622_v44 = vpop.f32.mrb[225].mxu0 }
 0x373   : > { %v7678_v9 = vpop.f32.mrb[229].mxu1  ;;  %v3367_v61 = vpop.f32.mrb[226].mxu0 }
 0x374   : > { %v3651_v50 = vpop.f32.mrb[230].mxu1  ;;  %v3423_v54 = vadd.f32 %v3367_v61, %v10542_v43  ;;  %v7623_v59 = vpop.f32.mrb[227].mxu0  ;;  %v10655_v3 = vadd.f32 %v3640_v29, %v3422_v33 }
 0x375   : > { %v7679_v13 = vpop.f32.mrb[231].mxu1 }
 0x376   : > { %7933 = vmatmul.mubr.bf16.gmra.mrb[76].mxu0 %v10215_v10  ;;  %v10661_v36 = vadd.f32 %v3643_v62, %v3423_v54 }
 0x377   : > { %7989 = vmatmul.mubr.bf16.gmra.mrb[80].mxu1 %v10046_v34  ;;  %7936 = vmatprep.mubr.msk.bf16.mxu0 %vm8506_vm0, %v8505_v1 }
 0x378   : > { %7992 = vmatprep.mubr.msk.bf16.mxu1 %vm8506_vm0, %v8505_v1 }
 0x379   : > { %v3372_v49 = vpop.f32.mrb[228].mxu0 }
 0x37a   : > { %v3656_v63 = vpop.f32.mrb[232].mxu1  ;;  %v3424_v43 = vadd.f32 %v3372_v49, %v10563_v37  ;;  %v7626_v0 = vpop.f32.mrb[229].mxu0 }
 0x37b   : > { %v7682_v16 = vpop.f32.mrb[233].mxu1  ;;  %v3375_v11 = vpop.f32.mrb[230].mxu0 }
 0x37c   : > { %v3659_v21 = vpop.f32.mrb[234].mxu1  ;;  %v3425_v34 = vadd.f32 %v3375_v11, %v10568_v28  ;;  %v7627_v10 = vpop.f32.mrb[231].mxu0  ;;  %v10667_v25 = vadd.f32 %v3648_v57, %v3424_v43 }
 0x37d   : > { %v7683_v48 = vpop.f32.mrb[235].mxu1 }
 0x37e   : > { %7937 = vmatmul.mubr.bf16.gmra.mrb[80].mxu0 %v10246_v12  ;;  %v10673_v26 = vadd.f32 %v3651_v50, %v3425_v34 }
 0x37f   : > { %7993 = vmatmul.mubr.bf16.gmra.mrb[84].mxu1 %v10077_v60  ;;  %7940 = vmatprep.mubr.msk.bf16.mxu0 %vm8506_vm0, %v8505_v1 }
 0x380   : > { %7996 = vmatprep.mubr.msk.bf16.mxu1 %vm8506_vm0, %v8505_v1 }
 0x381   : > { %v3380_v20 = vpop.f32.mrb[232].mxu0 }
 0x382   : > { %v3664_v37 = vpop.f32.mrb[236].mxu1  ;;  %v7630_v28 = vpop.f32.mrb[233].mxu0 }
 0x383   : > { %v7686_v22 = vpop.f32.mrb[237].mxu1  ;;  %v3383_v29 = vpop.f32.mrb[234].mxu0 }
 0x384   : > { %v3667_v6 = vpop.f32.mrb[238].mxu1  ;;  %v3427_v35 = vadd.f32 %v3383_v29, %v10582_v30  ;;  %v7631_v60 = vpop.f32.mrb[235].mxu0  ;;  %v10737_v29 = vld [vmem:[%s11234_s4] ss:$0 sm:$0xff] }
 0x385   : > { %v7687_v14 = vpop.f32.mrb[239].mxu1 }
 0x386   : > { %7941 = vmatmul.mubr.bf16.gmra.mrb[84].mxu0 %v10277_v42  ;;  %v10682_v12 = vadd.f32 %v3659_v21, %v3427_v35 }
 0x387   : > { %7997 = vmatmul.mubr.bf16.gmra.mrb[88].mxu1 %v10105_v15  ;;  %7944 = vmatprep.mubr.msk.bf16.mxu0 %vm8506_vm0, %v8505_v1 }
 0x388   : > { %8000 = vmatprep.mubr.msk.bf16.mxu1 %vm8506_vm0, %v8505_v1 }
 0x389   : > { %v3388_v2 = vpop.f32.mrb[236].mxu0 }
 0x38a   : > { %v3672_v51 = vpop.f32.mrb[240].mxu1  ;;  %v3428_v32 = vadd.f32 %v3388_v2, %v10591_v23  ;;  %v7634_v30 = vpop.f32.mrb[237].mxu0 }
 0x38b   : > { %v7690_v62 = vpop.f32.mrb[241].mxu1  ;;  %v3391_v5 = vpop.f32.mrb[238].mxu0 }
 0x38c   : > { %v3675_v18 = vpop.f32.mrb[242].mxu1  ;;  %v3429_v15 = vadd.f32 %v3391_v5, %v10593_v58  ;;  %v7635_v42 = vpop.f32.mrb[239].mxu0  ;;  %v10688_v39 = vadd.f32 %v3664_v37, %v3428_v32 }
 0x38d   : > { %v7691_v56 = vpop.f32.mrb[243].mxu1 }
 0x38e   : > { %7945 = vmatmul.mubr.bf16.gmra.mrb[88].mxu0 %v10298_v47  ;;  %v10694_v57 = vadd.f32 %v3667_v6, %v3429_v15 }
 0x38f   : > { %8001 = vmatmul.mubr.bf16.gmra.mrb[92].mxu1 %v10125_v46  ;;  %7948 = vmatprep.mubr.msk.bf16.mxu0 %vm8506_vm0, %v8505_v1 }
 0x390   : > { %8004 = vmatprep.mubr.msk.bf16.mxu1 %vm8506_vm0, %v8505_v1 }
 0x391   : > { %v3396_v17 = vpop.f32.mrb[240].mxu0 }
 0x392   : > { %v3680_v23 = vpop.f32.mrb[244].mxu1  ;;  %v3430_v58 = vadd.f32 %v3396_v17, %v10601_v4  ;;  %v7638_v33 = vpop.f32.mrb[241].mxu0 }
 0x393   : > { %v7694_v9 = vpop.f32.mrb[245].mxu1  ;;  %v3399_v13 = vpop.f32.mrb[242].mxu0 }
 0x394   : > { %v3683_v50 = vpop.f32.mrb[246].mxu1  ;;  %v3431_v46 = vadd.f32 %v3399_v13, %v10603_v40  ;;  %v7639_v47 = vpop.f32.mrb[243].mxu0  ;;  %v10700_v61 = vadd.f32 %v3672_v51, %v3430_v58 }
 0x395   : > { %v7695_v44 = vpop.f32.mrb[247].mxu1 }
 0x396   : > { %7949 = vmatmul.mubr.bf16.gmra.mrb[92].mxu0 %v10314_v45  ;;  %v10706_v54 = vadd.f32 %v3675_v18, %v3431_v46 }
 0x397   : > { %8005 = vmatmul.mubr.bf16.gmra.mrb[96].mxu1 %v10137_v7  ;;  %7952 = vmatprep.mubr.msk.bf16.mxu0 %vm8506_vm0, %v8505_v1 }
 0x398   : > { %8008 = vmatprep.mubr.msk.bf16.mxu1 %vm8506_vm0, %v8505_v1 }
 0x399   : > { %v3404_v63 = vpop.f32.mrb[244].mxu0 }
 0x39a   : > { %v3688_v4 = vpop.f32.mrb[248].mxu1  ;;  %v3432_v40 = vadd.f32 %v3404_v63, %v10611_v24  ;;  %v7642_v49 = vpop.f32.mrb[245].mxu0 }
 0x39b   : > { %v7698_v59 = vpop.f32.mrb[249].mxu1  ;;  %v3407_v43 = vpop.f32.mrb[246].mxu0 }
 0x39c   : > { %v3691_v16 = vpop.f32.mrb[250].mxu1  ;;  %v3433_v7 = vadd.f32 %v3407_v43, %v10613_v53  ;;  %v7643_v45 = vpop.f32.mrb[247].mxu0  ;;  %v10712_v0 = vadd.f32 %v3680_v23, %v3432_v40 }
 0x39d   : > { %v7699_v21 = vpop.f32.mrb[251].mxu1 }
 0x39e   : > { %7953 = vmatmul.mubr.bf16.gmra.mrb[96].mxu0 %v10331_v27  ;;  %v10716_v48 = vadd.f32 %v3683_v50, %v3433_v7 }
 0x39f   : > { %8009 = vmatmul.mubr.bf16.gmra.mrb[100].mxu1 %v10475_v31  ;;  %7956 = vmatprep.mubr.msk.bf16.mxu0 %vm8506_vm0, %v8505_v1 }
 0x3a0   : > { %8048 = vmatprep.mubr.msk.bf16.mxu1 %vm8506_vm0, %v8505_v1 }
 0x3a1   : > { %v3412_v34 = vpop.f32.mrb[248].mxu0 }
 0x3a2   : > { %v10722_v24 = vpop.f32.mrb[252].mxu1  ;;  %v3434_v10 = vadd.f32 %v3412_v34, %v10621_v52  ;;  %v7646_v37 = vpop.f32.mrb[249].mxu0 }
 0x3a3   : > { %v7770_v11 = vpop.f32.mrb[253].mxu1  ;;  %v3415_v22 = vpop.f32.mrb[250].mxu0 }
 0x3a4   : > { %v10724_v53 = vpop.f32.mrb[254].mxu1  ;;  %v7647_v27 = vpop.f32.mrb[251].mxu0  ;;  %v10727_v20 = vadd.f32 %v3688_v4, %v3434_v10 }
 0x3a5   : > { %v7771_v31 = vpop.f32.mrb[255].mxu1 }
 0x3a6   : > { %7957 = vmatmul.mubr.bf16.gmra.mrb[100].mxu0 %v10326_v19 }
 0x3a7   : > { %8028 = vmatprep.mubr.msk.bf16.mxu0 %vm8506_vm0, %v8505_v1 }
 0x3a9   : > { %v3831_v14 = vpop.f32.mrb[252].mxu0 }
 0x3aa   : > { %v10732_v6 = vpop.f32.mrb[0].mxu1  ;;  %v3901_v35 = vadd.f32 %v3831_v14, %v10631_v38  ;;  %v7718_v60 = vpop.f32.mrb[253].mxu0 }
 0x3ab   : > { %v7774_v28 = vpop.f32.mrb[1].mxu1  ;;  %v3834_v62 = vpop.f32.mrb[254].mxu0 }
 0x3ac   : > { %v10739_v52 = vpop.f32.mrb[2].mxu1  ;;  %v3925_v19 = vadd.f32 %v10737_v29, %v3901_v35  ;;  %v3902_v2 = vadd.f32 %v3834_v62, %v10637_v8  ;;  %v7719_v18 = vpop.f32.mrb[255].mxu0 }
 0x3ad   : > { %v7775_v51 = vpop.f32.mrb[3].mxu1 }
 0x3ae   : > { %v3942_v32 = vmax.f32 %v3925_v19, 0.0  ;;  %v3926_v30 = vadd.f32 %v10737_v29, %v3902_v2 }
 0x3b0   : > { %v3943_v56 = vmax.f32 %v3926_v30, 0.0  ;;  %v3977_v23 = vrot.slane %v3942_v32, 2 }
 0x3b1   : > { %v3839_v42 = vpop.f32.mrb[0].mxu0 }
 0x3b2   : > { %v10745_v5 = vpop.f32.mrb[4].mxu1  ;;  %v3978_v9 = vrot.slane %v3943_v56, 2  ;;  %v3903_v38 = vadd.f32 %v3839_v42, %v10643_v41  ;;  %v7722_v50 = vpop.f32.mrb[1].mxu0 }
 0x3b3   : > { %v7778_v15 = vpop.f32.mrb[5].mxu1  ;;  %v3842_v33 = vpop.f32.mrb[2].mxu0 }
 0x3b4   : > { %v10747_v17 = vpop.f32.mrb[6].mxu1  ;;  %v3979_v8 = vsel %vm1368_vm5, %v3977_v23, %v3978_v9  ;;  %v3927_v44 = vadd.f32 %v10737_v29, %v3903_v38  ;;  %v3904_v13 = vadd.f32 %v3842_v33, %v10649_v55  ;;  %v7723_v46 = vpop.f32.mrb[3].mxu0 }
 0x3b5   : > { %v7779_v58 = vpop.f32.mrb[7].mxu1  ;;  %v10753_v47 = vmax.f32 %v3942_v32, %v3979_v8 }
 0x3b6   : > { %v3944_v4 = vmax.f32 %v3927_v44, 0.0  ;;  %v3928_v59 = vadd.f32 %v10737_v29, %v3904_v13 }
 0x3b8   : > { %v3980_v63 = vrot.slane %v3944_v4, 2  ;;  %v3945_v16 = vmax.f32 %v3928_v59, 0.0 }
 0x3b9   : > { %v3847_v49 = vpop.f32.mrb[4].mxu0 }
 0x3ba   : > { %v10756_v40 = vpop.f32.mrb[8].mxu1  ;;  %v3981_v21 = vsel %vm1368_vm5, %v3978_v9, %v3980_v63  ;;  %v3982_v43 = vrot.slane %v3945_v16, 2  ;;  %v3905_v45 = vadd.f32 %v3847_v49, %v10655_v3  ;;  %v7726_v55 = vpop.f32.mrb[5].mxu0 }
 0x3bb   : > { %v7782_v41 = vpop.f32.mrb[9].mxu1  ;;  %v10762_v11 = vmax.f32 %v3943_v56, %v3981_v21  ;;  %v3850_v10 = vpop.f32.mrb[6].mxu0 }
 0x3bc   : > { %v10759_v7 = vpop.f32.mrb[10].mxu1  ;;  %v3983_v37 = vsel %vm1368_vm5, %v3980_v63, %v3982_v43  ;;  %v3929_v31 = vadd.f32 %v10737_v29, %v3905_v45  ;;  %v3906_v22 = vadd.f32 %v3850_v10, %v10661_v36  ;;  %v7727_v27 = vpop.f32.mrb[7].mxu0 }
 0x3bd   : > { %v7783_v34 = vpop.f32.mrb[11].mxu1  ;;  %v10767_v28 = vmax.f32 %v3944_v4, %v3983_v37 }
 0x3be   : > { %v3946_v14 = vmax.f32 %v3929_v31, 0.0  ;;  %v3930_v35 = vadd.f32 %v10737_v29, %v3906_v22 }
 0x3c0   : > { %v3984_v60 = vrot.slane %v3946_v14, 2  ;;  %v3947_v51 = vmax.f32 %v3930_v35, 0.0 }
 0x3c1   : > { %v3855_v19 = vpop.f32.mrb[8].mxu0 }
 0x3c2   : > { %v4192_v3 = vpop.f32.mrb[12].mxu1  ;;  %v3986_v2 = vrot.slane %v3947_v51, 2  ;;  %v3907_v32 = vadd.f32 %v3855_v19, %v10667_v25  ;;  %v7730_v30 = vpop.f32.mrb[9].mxu0 }
 0x3c3   : > { %v7786_v62 = vpop.f32.mrb[13].mxu1  ;;  %v3858_v15 = vpop.f32.mrb[10].mxu0 }
 0x3c4   : > { %v10770_v18 = vpop.f32.mrb[14].mxu1  ;;  %v3987_v36 = vsel %vm1368_vm5, %v3984_v60, %v3986_v2  ;;  %v3931_v42 = vadd.f32 %v10737_v29, %v3907_v32  ;;  %v3908_v23 = vadd.f32 %v3858_v15, %v10673_v26  ;;  %v7731_v9 = vpop.f32.mrb[11].mxu0 }
 0x3c5   : > { %v7787_v56 = vpop.f32.mrb[15].mxu1  ;;  %v10776_v38 = vmax.f32 %v3946_v14, %v3987_v36 }
 0x3c6   : > { %v3948_v50 = vmax.f32 %v3931_v42, 0.0  ;;  %v3932_v58 = vadd.f32 %v10737_v29, %v3908_v23 }
 0x3c8   : > { %v3988_v33 = vrot.slane %v3948_v50, 2  ;;  %v3949_v8 = vmax.f32 %v3932_v58, 0.0 }
 0x3c9   : > { %v3863_v13 = vpop.f32.mrb[12].mxu0 }
 0x3ca   : > { %v10779_v44 = vpop.f32.mrb[16].mxu1  ;;  %v3989_v46 = vsel %vm1368_vm5, %v3986_v2, %v3988_v33  ;;  %v3990_v4 = vrot.slane %v3949_v8, 2  ;;  %v7734_v63 = vpop.f32.mrb[13].mxu0 }
 0x3cb   : > { %v7790_v25 = vpop.f32.mrb[17].mxu1  ;;  %v10784_v16 = vmax.f32 %v3947_v51, %v3989_v46  ;;  %v3866_v41 = vpop.f32.mrb[14].mxu0 }
 0x3cc   : > { %v10782_v59 = vpop.f32.mrb[18].mxu1  ;;  %v3991_v49 = vsel %vm1368_vm5, %v3988_v33, %v3990_v4  ;;  %v3910_v21 = vadd.f32 %v3866_v41, %v10682_v12  ;;  %v7735_v43 = vpop.f32.mrb[15].mxu0  ;;  %v8377_v12 = vld [vmem:[%s11235_s5 + $0x40] sm:$0xff]   ;;  %v8378_v25 = vld [vmem:[%s11235_s5 + $0x48] sm:$0xff]  }
 0x3cd   : > { %v7791_v26 = vpop.f32.mrb[19].mxu1  ;;  %v10788_v45 = vmax.f32 %v3948_v50, %v3991_v49  ;;  %8013 = vmatpush3.bf16.msra.mxu0 %v8377_v12  ;;  %v8379_v12 = vld [vmem:[%s11235_s5 + $0x50] sm:$0xff]  }
 0x3ce   : > { %v3934_v55 = vadd.f32 %v10737_v29, %v3910_v21  ;;  %8014 = vmatprep.subr.bf16.mxu0 %v8505_v1 }
 0x3d0   : > { %v3951_v34 = vmax.f32 %v3934_v55, 0.0 }
 0x3d1   : > { %v3871_v31 = vpop.f32.mrb[16].mxu0  ;;  %8015 = vmatpush3.bf16.msra.mxu0 %v8378_v25 }
 0x3d2   : > { %v10791_v10 = vpop.f32.mrb[20].mxu1  ;;  %v3994_v22 = vrot.slane %v3951_v34, 2  ;;  %v3911_v14 = vadd.f32 %v3871_v31, %v10688_v39  ;;  %v7738_v35 = vpop.f32.mrb[17].mxu0  ;;  %8016 = vmatprep.subr.bf16.mxu0 %v8505_v1 }
 0x3d3   : > { %v7794_v37 = vpop.f32.mrb[21].mxu1  ;;  %v3874_v51 = vpop.f32.mrb[18].mxu0 }
 0x3d4   : > { %v10793_v27 = vpop.f32.mrb[22].mxu1  ;;  %v3935_v3 = vadd.f32 %v10737_v29, %v3911_v14  ;;  %v3912_v62 = vadd.f32 %v3874_v51, %v10694_v57  ;;  %v7739_v19 = vpop.f32.mrb[19].mxu0 }
 0x3d5   : > { %v7795_v60 = vpop.f32.mrb[23].mxu1  ;;  %8017 = vmatpush3.bf16.msra.mxu0 %v8379_v12 }
 0x3d6   : > { %v3952_v2 = vmax.f32 %v3935_v3, 0.0  ;;  %v3936_v32 = vadd.f32 %v10737_v29, %v3912_v62  ;;  %8018 = vmatprep.subr.bf16.mxu0 %v8505_v1 }
 0x3d8   : > { %v3996_v30 = vrot.slane %v3952_v2, 2  ;;  %v3953_v39 = vmax.f32 %v3936_v32, 0.0 }
 0x3d9   : > { %v3879_v36 = vpop.f32.mrb[20].mxu0 }
 0x3da   : > { %v10803_v56 = vpop.f32.mrb[24].mxu1  ;;  %v3997_v42 = vsel %vm1368_vm5, %v3994_v22, %v3996_v30  ;;  %v3998_v23 = vrot.slane %v3953_v39, 2  ;;  %v3913_v57 = vadd.f32 %v3879_v36, %v10700_v61  ;;  %v7742_v50 = vpop.f32.mrb[21].mxu0 }
 0x3db   : > { %v7798_v15 = vpop.f32.mrb[25].mxu1  ;;  %v10809_v58 = vmax.f32 %v3951_v34, %v3997_v42  ;;  %v3882_v8 = vpop.f32.mrb[22].mxu0 }
 0x3dc   : > { %v10806_v9 = vpop.f32.mrb[26].mxu1  ;;  %v3999_v13 = vsel %vm1368_vm5, %v3996_v30, %v3998_v23  ;;  %v3937_v46 = vadd.f32 %v10737_v29, %v3913_v57  ;;  %v3914_v4 = vadd.f32 %v3882_v8, %v10706_v54  ;;  %v7743_v63 = vpop.f32.mrb[23].mxu0 }
 0x3dd   : > { %v7799_v33 = vpop.f32.mrb[27].mxu1  ;;  %v10817_v26 = vmax.f32 %v3952_v2, %v3999_v13 }
 0x3de   : > { %v3954_v61 = vmax.f32 %v3937_v46, 0.0  ;;  %v3938_v41 = vadd.f32 %v10737_v29, %v3914_v4 }
 0x3e0   : > { %v4000_v49 = vrot.slane %v3954_v61, 2  ;;  %v3955_v21 = vmax.f32 %v3938_v41, 0.0  ;;  %v8381_v41 = vld [vmem:[%s11235_s5] sm:$0xff]  }
 0x3e1   : > { %v3887_v34 = vpop.f32.mrb[24].mxu0  ;;  %8033 = vmatpush3.bf16.msra.mxu1 %v8381_v41  ;;  %v8389_v41 = vld [vmem:[%s11235_s5 + $0x28] sm:$0xff]  }
 0x3e2   : > { %v10821_v43 = vpop.f32.mrb[28].mxu1  ;;  %v4001_v37 = vsel %vm1368_vm5, %v3998_v23, %v4000_v49  ;;  %v4002_v31 = vrot.slane %v3955_v21, 2  ;;  %v3915_v54 = vadd.f32 %v3887_v34, %v10712_v0  ;;  %v7746_v14 = vpop.f32.mrb[25].mxu0  ;;  %v8380_v34 = vld [vmem:[%s11235_s5 + $0x58] sm:$0xff]   ;;  %8034 = vmatprep.subr.bf16.mxu1 %v8505_v1 }
 0x3e3   : > { %v7802_v55 = vpop.f32.mrb[29].mxu1  ;;  %v10825_v35 = vmax.f32 %v3953_v39, %v4001_v37  ;;  %v3890_v51 = vpop.f32.mrb[26].mxu0  ;;  %8019 = vmatpush3.bf16.msra.mxu0 %v8380_v34 }
 0x3e4   : > { %v4227_v22 = vpop.f32.mrb[30].mxu1  ;;  %v3939_v3 = vadd.f32 %v10737_v29, %v3915_v54  ;;  %v3916_v62 = vadd.f32 %v3890_v51, %v10716_v48  ;;  %v7747_v19 = vpop.f32.mrb[27].mxu0  ;;  %v8383_v54 = vld [vmem:[%s11235_s5 + $0x8] sm:$0xff]   ;;  %8020 = vmatprep.subr.bf16.mxu0 %v8505_v1 }
 0x3e5   : > { %v7803_v60 = vpop.f32.mrb[31].mxu1  ;;  %8035 = vmatpush3.bf16.msra.mxu1 %v8383_v54  ;;  %v8385_v19 = vld [vmem:[%s11235_s5 + $0x10] sm:$0xff]  }
 0x3e6   : > { %v3956_v2 = vmax.f32 %v3939_v3, 0.0  ;;  %v3940_v32 = vadd.f32 %v10737_v29, %v3916_v62  ;;  %8036 = vmatprep.subr.bf16.mxu1 %v8505_v1 }
 0x3e8   : > { %v4004_v0 = vrot.slane %v3956_v2, 2  ;;  %v3957_v30 = vmax.f32 %v3940_v32, 0.0 }
 0x3e9   : > { %v3895_v36 = vpop.f32.mrb[28].mxu0  ;;  %8037 = vmatpush3.bf16.msra.mxu1 %v8385_v19  ;;  %v8391_v19 = vld [vmem:[%s11235_s5 + $0x78] sm:$0xff]  }
 0x3ea   : > { %v4481_v39 = vpop.f32.mrb[32].mxu1  ;;  %v4005_v42 = vsel %vm1368_vm5, %v4002_v31, %v4004_v0  ;;  %v4006_v23 = vrot.slane %v3957_v30, 2  ;;  %v3917_v50 = vadd.f32 %v3895_v36, %v10727_v20  ;;  %v7750_v33 = vpop.f32.mrb[29].mxu0  ;;  %8038 = vmatprep.subr.bf16.mxu1 %v8505_v1  ;;  %v8386_v36 = vld [vmem:[%s11235_s5 + $0x18] sm:$0xff]  }
 0x3eb   : > { %v7874_v15 = vpop.f32.mrb[33].mxu1  ;;  %v10836_v48 = vmax.f32 %v3955_v21, %v4005_v42  ;;  %v3898_v25 = vpop.f32.mrb[30].mxu0 }
 0x3ec   : > { %v4484_v57 = vpop.f32.mrb[34].mxu1  ;;  %v4007_v13 = vsel %vm1368_vm5, %v4004_v0, %v4006_v23  ;;  %v3941_v46 = vadd.f32 %v10737_v29, %v3917_v50  ;;  %v7751_v4 = vpop.f32.mrb[31].mxu0 }
 0x3ed   : > { %v7875_v8 = vpop.f32.mrb[35].mxu1  ;;  %v10840_v63 = vmax.f32 %v3956_v2, %v4007_v13  ;;  %8039 = vmatpush3.bf16.msra.mxu1 %v8386_v36 }
 0x3ee   : > { %v3958_v61 = vmax.f32 %v3941_v46, 0.0  ;;  %8040 = vmatprep.subr.bf16.mxu1 %v8505_v1 }
 0x3f0   : > { %v4008_v49 = vrot.slane %v3958_v61, 2 }
 0x3f1   : > { %v4312_v21 = vpop.f32.mrb[32].mxu0 }
 0x3f2   : > { %v4489_v55 = vpop.f32.mrb[36].mxu1  ;;  %v4009_v29 = vsel %vm1368_vm5, %v4006_v23, %v4008_v49  ;;  %v4313_v31 = vadd.f32 %v4312_v21, %v10722_v24  ;;  %v7822_v22 = vpop.f32.mrb[33].mxu0 }
 0x3f3   : > { %v7878_v20 = vpop.f32.mrb[37].mxu1  ;;  %v10854_v14 = vmax.f32 %v3957_v30, %v4009_v29  ;;  %v4315_v51 = vpop.f32.mrb[34].mxu0 }
 0x3f4   : > { %v4492_v37 = vpop.f32.mrb[38].mxu1  ;;  %v4316_v12 = vadd.f32 %v4315_v51, %v10724_v53  ;;  %v7823_v3 = vpop.f32.mrb[35].mxu0  ;;  %v10857_v62 = vadd.f32 %v4481_v39, %v4313_v31  ;;  %v8382_v53 = vld [vmem:[%s11235_s5 + $0x60] sm:$0xff]   ;;  %v8384_v20 = vld [vmem:[%s11235_s5 + $0x68] sm:$0xff]  }
 0x3f5   : > { %v7879_v60 = vpop.f32.mrb[39].mxu1  ;;  %8021 = vmatpush3.bf16.msra.mxu0 %v8382_v53 }
 0x3f6   : > { %v10861_v24 = vadd.f32 %v4484_v57, %v4316_v12  ;;  %8022 = vmatprep.subr.bf16.mxu0 %v8505_v1  ;;  %v8392_v60 = vld [vmem:[%s11235_s5 + $0x38] sm:$0xff]  }
 0x3f9   : > { %v4320_v0 = vpop.f32.mrb[36].mxu0  ;;  %8023 = vmatpush3.bf16.msra.mxu0 %v8384_v20 }
 0x3fa   : > { %v4497_v2 = vpop.f32.mrb[40].mxu1  ;;  %v4321_v39 = vadd.f32 %v4320_v0, %v10732_v6  ;;  %v7826_v15 = vpop.f32.mrb[37].mxu0  ;;  %v8387_v6 = vld [vmem:[%s11235_s5 + $0x20] sm:$0xff]   ;;  %8024 = vmatprep.subr.bf16.mxu0 %v8505_v1 }
 0x3fb   : > { %v7882_v32 = vpop.f32.mrb[41].mxu1  ;;  %v4323_v23 = vpop.f32.mrb[38].mxu0  ;;  %8041 = vmatpush3.bf16.msra.mxu1 %v8387_v6 }
 0x3fc   : > { %v4500_v30 = vpop.f32.mrb[42].mxu1  ;;  %v4324_v57 = vadd.f32 %v4323_v23, %v10739_v52  ;;  %v7827_v50 = vpop.f32.mrb[39].mxu0  ;;  %v10875_v33 = vadd.f32 %v4489_v55, %v4321_v39  ;;  %8042 = vmatprep.subr.bf16.mxu1 %v8505_v1 }
 0x3fd   : > { %v7883_v42 = vpop.f32.mrb[43].mxu1 }
 0x3fe   : > { %v10879_v8 = vadd.f32 %v4492_v37, %v4324_v57  ;;  %v8390_v37 = vld [vmem:[%s11235_s5 + $0x30] sm:$0xff]  }
 0x3ff   : > { %8043 = vmatpush3.bf16.msra.mxu1 %v8389_v41 }
 0x400   : > { %8044 = vmatprep.subr.bf16.mxu1 %v8505_v1 }
 0x401   : > { %v4328_v46 = vpop.f32.mrb[40].mxu0 }
 0x402   : > { %v4505_v25 = vpop.f32.mrb[44].mxu1  ;;  %v4329_v4 = vadd.f32 %v4328_v46, %v10745_v5  ;;  %v7830_v61 = vpop.f32.mrb[41].mxu0 }
 0x403   : > { %v7886_v13 = vpop.f32.mrb[45].mxu1  ;;  %v4331_v55 = vpop.f32.mrb[42].mxu0  ;;  %8045 = vmatpush3.bf16.msra.mxu1 %v8390_v37 }
 0x404   : > { %v4508_v52 = vpop.f32.mrb[46].mxu1  ;;  %v4332_v21 = vadd.f32 %v4331_v55, %v10747_v17  ;;  %v7831_v34 = vpop.f32.mrb[43].mxu0  ;;  %v10893_v29 = vadd.f32 %v4497_v2, %v4329_v4  ;;  %v8388_v17 = vld [vmem:[%s11235_s5 + $0x70] sm:$0xff]   ;;  %8046 = vmatprep.subr.bf16.mxu1 %v8505_v1 }
 0x405   : > { %v7887_v49 = vpop.f32.mrb[47].mxu1  ;;  %8025 = vmatpush3.bf16.msra.mxu0 %v8388_v17 }
 0x406   : > { %v10896_v5 = vadd.f32 %v4500_v30, %v4332_v21  ;;  %8026 = vmatprep.subr.bf16.mxu0 %v8505_v1 }
 0x407   : > { %8047 = vmatpush3.bf16.msra.mxu1 %v8392_v60 }
 0x408   : > { %8072 = vmatprep.subr.bf16.mxu1 %v8505_v1 }
 0x409   : > { %v4336_v54 = vpop.f32.mrb[44].mxu0  ;;  %8027 = vmatpush3.bf16.msra.mxu0 %v8391_v19 }
 0x40a   : > { %v4513_v31 = vpop.f32.mrb[48].mxu1  ;;  %v4337_v12 = vadd.f32 %v4336_v54, %v10756_v40  ;;  %v7834_v3 = vpop.f32.mrb[45].mxu0  ;;  %8052 = vmatprep.subr.bf16.mxu0 %v8505_v1 }
 0x40b   : > { %v7890_v22 = vpop.f32.mrb[49].mxu1  ;;  %v4339_v32 = vpop.f32.mrb[46].mxu0 }
 0x40c   : > { %v4516_v51 = vpop.f32.mrb[50].mxu1  ;;  %v4340_v0 = vadd.f32 %v4339_v32, %v10759_v7  ;;  %v7835_v53 = vpop.f32.mrb[47].mxu0  ;;  %v10915_v30 = vadd.f32 %v4505_v25, %v4337_v12 }
 0x40d   : > { %v7891_v2 = vpop.f32.mrb[51].mxu1 }
 0x40e   : > { %v10918_v39 = vadd.f32 %v4508_v52, %v4340_v0 }
 0x411   : > { %v4344_v36 = vpop.f32.mrb[48].mxu0 }
 0x412   : > { %v4521_v40 = vpop.f32.mrb[52].mxu1  ;;  %v7838_v23 = vpop.f32.mrb[49].mxu0 }
 0x413   : > { %v7894_v15 = vpop.f32.mrb[53].mxu1  ;;  %v4347_v50 = vpop.f32.mrb[50].mxu0 }
 0x414   : > { %v4524_v42 = vpop.f32.mrb[54].mxu1  ;;  %v4348_v7 = vadd.f32 %v4347_v50, %v10770_v18  ;;  %v7839_v6 = vpop.f32.mrb[51].mxu0 }
 0x415   : > { %v7895_v57 = vpop.f32.mrb[55].mxu1 }
 0x416   : > { %v10922_v25 = vadd.f32 %v4516_v51, %v4348_v7 }
 0x419   : > { %v4352_v4 = vpop.f32.mrb[52].mxu0 }
 0x41a   : > { %v4529_v13 = vpop.f32.mrb[56].mxu1  ;;  %v4353_v61 = vadd.f32 %v4352_v4, %v10779_v44  ;;  %v7842_v41 = vpop.f32.mrb[53].mxu0 }
 0x41b   : > { %v7898_v46 = vpop.f32.mrb[57].mxu1  ;;  %v4355_v55 = vpop.f32.mrb[54].mxu0 }
 0x41c   : > { %v4532_v52 = vpop.f32.mrb[58].mxu1  ;;  %v4356_v20 = vadd.f32 %v4355_v55, %v10782_v59  ;;  %v7843_v21 = vpop.f32.mrb[55].mxu0  ;;  %v10926_v34 = vadd.f32 %v4521_v40, %v4353_v61 }
 0x41d   : > { %v7899_v49 = vpop.f32.mrb[59].mxu1 }
 0x41e   : > { %v10928_v37 = vadd.f32 %v4524_v42, %v4356_v20 }
 0x421   : > { %v4360_v17 = vpop.f32.mrb[56].mxu0 }
 0x422   : > { %v4537_v18 = vpop.f32.mrb[60].mxu1  ;;  %v4361_v54 = vadd.f32 %v4360_v17, %v10791_v10  ;;  %v7846_v60 = vpop.f32.mrb[57].mxu0 }
 0x423   : > { %v7902_v31 = vpop.f32.mrb[61].mxu1  ;;  %v4363_v12 = vpop.f32.mrb[58].mxu0 }
 0x424   : > { %v4540_v22 = vpop.f32.mrb[62].mxu1  ;;  %v4364_v44 = vadd.f32 %v4363_v12, %v10793_v27  ;;  %v7847_v3 = vpop.f32.mrb[59].mxu0  ;;  %v10932_v19 = vadd.f32 %v4529_v13, %v4361_v54  ;;  %v10949_v31 = vld [vmem:[%s11234_s4 + $0x1] ss:$0 sm:$0xff] }
 0x425   : > { %v7903_v51 = vpop.f32.mrb[63].mxu1 }
 0x426   : > { %v10934_v59 = vadd.f32 %v4532_v52, %v4364_v44 }
 0x429   : > { %v4368_v0 = vpop.f32.mrb[60].mxu0 }
 0x42a   : > { %v4545_v2 = vpop.f32.mrb[64].mxu1  ;;  %v4369_v40 = vadd.f32 %v4368_v0, %v10803_v56  ;;  %v7850_v15 = vpop.f32.mrb[61].mxu0 }
 0x42b   : > { %v7906_v32 = vpop.f32.mrb[65].mxu1  ;;  %v4371_v42 = vpop.f32.mrb[62].mxu0 }
 0x42c   : > { %v4548_v53 = vpop.f32.mrb[66].mxu1  ;;  %v4372_v10 = vadd.f32 %v4371_v42, %v10806_v9  ;;  %v7851_v23 = vpop.f32.mrb[63].mxu0  ;;  %v10938_v57 = vadd.f32 %v4537_v18, %v4369_v40 }
 0x42d   : > { %v7907_v36 = vpop.f32.mrb[67].mxu1 }
 0x42e   : > { %v10940_v27 = vadd.f32 %v4540_v22, %v4372_v10 }
 0x431   : > { %v4376_v6 = vpop.f32.mrb[64].mxu0 }
 0x432   : > { %v4853_v50 = vpop.f32.mrb[68].mxu1  ;;  %v4377_v46 = vadd.f32 %v4376_v6, %v10821_v43  ;;  %v7854_v4 = vpop.f32.mrb[65].mxu0 }
 0x433   : > { %v7978_v7 = vpop.f32.mrb[69].mxu1  ;;  %v4379_v61 = vpop.f32.mrb[66].mxu0 }
 0x434   : > { %v4856_v13 = vpop.f32.mrb[70].mxu1  ;;  %v7855_v56 = vpop.f32.mrb[67].mxu0  ;;  %v10943_v41 = vadd.f32 %v4545_v2, %v4377_v46 }
 0x435   : > { %v7979_v52 = vpop.f32.mrb[71].mxu1 }
 0x439   : > { %v4667_v9 = vpop.f32.mrb[68].mxu0 }
 0x43a   : > { %v4861_v49 = vpop.f32.mrb[72].mxu1  ;;  %v4737_v21 = vadd.f32 %v4667_v9, %v10857_v62  ;;  %v7926_v18 = vpop.f32.mrb[69].mxu0 }
 0x43b   : > { %v7982_v55 = vpop.f32.mrb[73].mxu1  ;;  %v4670_v43 = vpop.f32.mrb[70].mxu0 }
 0x43c   : > { %v4864_v20 = vpop.f32.mrb[74].mxu1  ;;  %v4923_v22 = vadd.f32 %v4853_v50, %v4737_v21  ;;  %v4738_v54 = vadd.f32 %v4670_v43, %v10861_v24  ;;  %v7927_v60 = vpop.f32.mrb[71].mxu0 }
 0x43d   : > { %v7983_v17 = vpop.f32.mrb[75].mxu1 }
 0x43e   : > { %v4948_v51 = vadd.f32 %v10949_v31, %v4923_v22  ;;  %v4924_v12 = vadd.f32 %v4856_v13, %v4738_v54 }
 0x440   : > { %v4965_v44 = vmax.f32 %v4948_v51, 0.0  ;;  %v4949_v3 = vadd.f32 %v10949_v31, %v4924_v12 }
 0x441   : > { %v4675_v32 = vpop.f32.mrb[72].mxu0 }
 0x442   : > { %v4869_v2 = vpop.f32.mrb[76].mxu1  ;;  %v4966_v0 = vmax.f32 %v4949_v3, 0.0  ;;  %v4739_v40 = vadd.f32 %v4675_v32, %v10875_v33  ;;  %v7930_v15 = vpop.f32.mrb[73].mxu0  ;;  %v4999_v10 = vrot.slane %v4965_v44, 2 }
 0x443   : > { %v7986_v62 = vpop.f32.mrb[77].mxu1  ;;  %v4678_v42 = vpop.f32.mrb[74].mxu0 }
 0x444   : > { %v4872_v53 = vpop.f32.mrb[78].mxu1  ;;  %v5000_v23 = vrot.slane %v4966_v0, 2  ;;  %v4925_v24 = vadd.f32 %v4861_v49, %v4739_v40  ;;  %v4740_v50 = vadd.f32 %v4678_v42, %v10879_v8  ;;  %v7931_v7 = vpop.f32.mrb[75].mxu0 }
 0x445   : > { %v7987_v36 = vpop.f32.mrb[79].mxu1 }
 0x446   : > { %v5001_v6 = vsel %vm1368_vm5, %v4999_v10, %v5000_v23  ;;  %v4950_v13 = vadd.f32 %v10949_v31, %v4925_v24  ;;  %v4926_v46 = vadd.f32 %v4864_v20, %v4740_v50 }
 0x447   : > { %v5049_v4 = vmax.f32 %v4965_v44, %v5001_v6 }
 0x448   : > { %v4967_v52 = vmax.f32 %v4950_v13, 0.0  ;;  %v4951_v61 = vadd.f32 %v10949_v31, %v4926_v46 }
 0x449   : > { %v5066_v33 = vmax.f32 %v10753_v47, %v5049_v4  ;;  %v4683_v9 = vpop.f32.mrb[76].mxu0 }
 0x44a   : > { %v4877_v56 = vpop.f32.mrb[80].mxu1  ;;  %v5002_v21 = vrot.slane %v4967_v52, 2  ;;  %v4968_v18 = vmax.f32 %v4951_v61, 0.0  ;;  %v4741_v8 = vadd.f32 %v4683_v9, %v10893_v29  ;;  %v7934_v17 = vpop.f32.mrb[77].mxu0 }
 0x44b   : > { %v7990_v55 = vpop.f32.mrb[81].mxu1  ;;  %5083 = vst [vmem:[#allocation3] sm:$0xff] %v5066_v33  ;;  %v4686_v22 = vpop.f32.mrb[78].mxu0 }
 0x44c   : > { %v4880_v49 = vpop.f32.mrb[82].mxu1  ;;  %v5003_v20 = vsel %vm1368_vm5, %v5000_v23, %v5002_v21  ;;  %v5004_v54 = vrot.slane %v4968_v18, 2  ;;  %v4927_v60 = vadd.f32 %v4869_v2, %v4741_v8  ;;  %v4742_v51 = vadd.f32 %v4686_v22, %v10896_v5  ;;  %v7935_v12 = vpop.f32.mrb[79].mxu0 }
 0x44d   : > { %v7991_v43 = vpop.f32.mrb[83].mxu1  ;;  %v5050_v44 = vmax.f32 %v4966_v0, %v5003_v20 }
 0x44e   : > { %v5005_v47 = vsel %vm1368_vm5, %v5002_v21, %v5004_v54  ;;  %v4952_v3 = vadd.f32 %v10949_v31, %v4927_v60  ;;  %v4928_v62 = vadd.f32 %v4872_v53, %v4742_v51 }
 0x44f   : > { %v5067_v32 = vmax.f32 %v10762_v11, %v5050_v44  ;;  %v5051_v29 = vmax.f32 %v4967_v52, %v5005_v47 }
 0x450   : > { %v4969_v40 = vmax.f32 %v4952_v3, 0.0  ;;  %v4953_v15 = vadd.f32 %v10949_v31, %v4928_v62 }
 0x451   : > { %5084 = vst [vmem:[#allocation3 + $0x8] sm:$0xff] %v5067_v32  ;;  %v5068_v42 = vmax.f32 %v10767_v28, %v5051_v29  ;;  %v4691_v10 = vpop.f32.mrb[80].mxu0 }
 0x452   : > { %v4885_v36 = vpop.f32.mrb[84].mxu1  ;;  %v5006_v5 = vrot.slane %v4969_v40, 2  ;;  %v4970_v23 = vmax.f32 %v4953_v15, 0.0  ;;  %v4743_v24 = vadd.f32 %v4691_v10, %v10915_v30  ;;  %v7938_v50 = vpop.f32.mrb[81].mxu0 }
 0x453   : > { %v7994_v2 = vpop.f32.mrb[85].mxu1  ;;  %5085 = vst [vmem:[#allocation3 + $0x10] sm:$0xff] %v5068_v42  ;;  %v4694_v7 = vpop.f32.mrb[82].mxu0 }
 0x454   : > { %v4888_v0 = vpop.f32.mrb[86].mxu1  ;;  %v5008_v11 = vrot.slane %v4970_v23, 2  ;;  %v4929_v6 = vadd.f32 %v4877_v56, %v4743_v24  ;;  %v4744_v13 = vadd.f32 %v4694_v7, %v10918_v39  ;;  %v7939_v46 = vpop.f32.mrb[83].mxu0 }
 0x455   : > { %v7995_v53 = vpop.f32.mrb[87].mxu1 }
 0x456   : > { %v5009_v4 = vsel %vm1368_vm5, %v5006_v5, %v5008_v11  ;;  %v4954_v28 = vadd.f32 %v10949_v31, %v4929_v6  ;;  %v4930_v52 = vadd.f32 %v4880_v49, %v4744_v13 }
 0x457   : > { %v5053_v61 = vmax.f32 %v4969_v40, %v5009_v4 }
 0x458   : > { %v4971_v33 = vmax.f32 %v4954_v28, 0.0  ;;  %v4955_v55 = vadd.f32 %v10949_v31, %v4930_v52 }
 0x459   : > { %v5070_v30 = vmax.f32 %v10776_v38, %v5053_v61  ;;  %v4699_v18 = vpop.f32.mrb[84].mxu0 }
 0x45a   : > { %v4893_v9 = vpop.f32.mrb[88].mxu1  ;;  %v5010_v8 = vrot.slane %v4971_v33, 2  ;;  %v4972_v17 = vmax.f32 %v4955_v55, 0.0  ;;  %v7942_v43 = vpop.f32.mrb[85].mxu0 }
 0x45b   : > { %v7998_v21 = vpop.f32.mrb[89].mxu1  ;;  %5087 = vst [vmem:[#allocation3 + $0x20] sm:$0xff] %v5070_v30  ;;  %v4702_v22 = vpop.f32.mrb[86].mxu0 }
 0x45c   : > { %v4896_v56 = vpop.f32.mrb[90].mxu1  ;;  %v5011_v20 = vsel %vm1368_vm5, %v5008_v11, %v5010_v8  ;;  %v5012_v54 = vrot.slane %v4972_v17, 2  ;;  %v4746_v49 = vadd.f32 %v4702_v22, %v10922_v25  ;;  %v7943_v60 = vpop.f32.mrb[87].mxu0 }
 0x45d   : > { %v7999_v39 = vpop.f32.mrb[91].mxu1  ;;  %v5054_v51 = vmax.f32 %v4970_v23, %v5011_v20 }
 0x45e   : > { %v5013_v12 = vsel %vm1368_vm5, %v5010_v8, %v5012_v54  ;;  %v4932_v44 = vadd.f32 %v4888_v0, %v4746_v49 }
 0x45f   : > { %v5071_v38 = vmax.f32 %v10784_v16, %v5054_v51  ;;  %v5055_v47 = vmax.f32 %v4971_v33, %v5013_v12 }
 0x460   : > { %v4957_v3 = vadd.f32 %v10949_v31, %v4932_v44 }
 0x461   : > { %5088 = vst [vmem:[#allocation3 + $0x28] sm:$0xff] %v5071_v38  ;;  %v5072_v32 = vmax.f32 %v10788_v45, %v5055_v47  ;;  %v4707_v40 = vpop.f32.mrb[88].mxu0 }
 0x462   : > { %v4901_v62 = vpop.f32.mrb[92].mxu1  ;;  %v4974_v15 = vmax.f32 %v4957_v3, 0.0  ;;  %v4747_v25 = vadd.f32 %v4707_v40, %v10926_v34  ;;  %v7946_v42 = vpop.f32.mrb[89].mxu0 }
 0x463   : > { %v8002_v29 = vpop.f32.mrb[93].mxu1  ;;  %5089 = vst [vmem:[#allocation3 + $0x30] sm:$0xff] %v5072_v32  ;;  %v4710_v10 = vpop.f32.mrb[90].mxu0 }
 0x464   : > { %v4904_v36 = vpop.f32.mrb[94].mxu1  ;;  %v5016_v5 = vrot.slane %v4974_v15, 2  ;;  %v4933_v23 = vadd.f32 %v4893_v9, %v4747_v25  ;;  %v4748_v16 = vadd.f32 %v4710_v10, %v10928_v37  ;;  %v7947_v0 = vpop.f32.mrb[91].mxu0 }
 0x465   : > { %v8003_v2 = vpop.f32.mrb[95].mxu1 }
 0x466   : > { %v4958_v24 = vadd.f32 %v10949_v31, %v4933_v23  ;;  %v4934_v50 = vadd.f32 %v4896_v56, %v4748_v16 }
 0x468   : > { %v4975_v53 = vmax.f32 %v4958_v24, 0.0  ;;  %v4959_v45 = vadd.f32 %v10949_v31, %v4934_v50 }
 0x469   : > { %v4715_v6 = vpop.f32.mrb[92].mxu0 }
 0x46a   : > { %v4909_v7 = vpop.f32.mrb[96].mxu1  ;;  %v5018_v13 = vrot.slane %v4975_v53, 2  ;;  %v4976_v34 = vmax.f32 %v4959_v45, 0.0  ;;  %v4749_v4 = vadd.f32 %v4715_v6, %v10932_v19  ;;  %v7950_v28 = vpop.f32.mrb[93].mxu0 }
 0x46b   : > { %v8006_v11 = vpop.f32.mrb[97].mxu1  ;;  %v4718_v61 = vpop.f32.mrb[94].mxu0 }
 0x46c   : > { %v4912_v46 = vpop.f32.mrb[98].mxu1  ;;  %v5019_v37 = vsel %vm1368_vm5, %v5016_v5, %v5018_v13  ;;  %v5020_v33 = vrot.slane %v4976_v34, 2  ;;  %v4935_v55 = vadd.f32 %v4901_v62, %v4749_v4  ;;  %v4750_v9 = vadd.f32 %v4718_v61, %v10934_v59  ;;  %v7951_v30 = vpop.f32.mrb[95].mxu0  ;;  %v8394_v61 = vld [vmem:[%s11235_s5 + $0x80] sm:$0xff]  }
 0x46d   : > { %v8007_v52 = vpop.f32.mrb[99].mxu1  ;;  %v5058_v21 = vmax.f32 %v4974_v15, %v5019_v37  ;;  %v8395_v37 = vld [vmem:[%s11235_s5 + $0xc8] sm:$0xff]   ;;  %v8400_v30 = vld [vmem:[%s11235_s5 + $0x98] sm:$0xff]  }
 0x46e   : > { %v5021_v18 = vsel %vm1368_vm5, %v5018_v13, %v5020_v33  ;;  %v4960_v8 = vadd.f32 %v10949_v31, %v4935_v55  ;;  %v4936_v17 = vadd.f32 %v4904_v36, %v4750_v9  ;;  %v8393_v52 = vld [vmem:[%s11235_s5 + $0xc0] sm:$0xff]   ;;  %v8398_v55 = vld [vmem:[%s11235_s5 + $0x90] sm:$0xff]   ;;  %v8399_v9 = vld [vmem:[%s11235_s5 + $0xd8] sm:$0xff]  }
 0x46f   : > { %v5075_v56 = vmax.f32 %v10809_v58, %v5058_v21  ;;  %v5059_v43 = vmax.f32 %v4975_v53, %v5021_v18  ;;  %v8401_v21 = vld [vmem:[%s11235_s5 + $0xe0] sm:$0xff]  }
 0x470   : > { %v4977_v19 = vmax.f32 %v4960_v8, 0.0  ;;  %v4961_v39 = vadd.f32 %v10949_v31, %v4936_v17  ;;  %v8402_v18 = vld [vmem:[%s11235_s5 + $0xa0] sm:$0xff]   ;;  %v8403_v8 = vld [vmem:[%s11235_s5 + $0xe8] sm:$0xff]  }
 0x471   : > { %5092 = vst [vmem:[#allocation3 + $0x48] sm:$0xff] %v5075_v56  ;;  %v5076_v20 = vmax.f32 %v10817_v26, %v5059_v43  ;;  %v4723_v49 = vpop.f32.mrb[96].mxu0  ;;  %v8404_v17 = vld [vmem:[%s11235_s5 + $0xa8] sm:$0xff]   ;;  %v8405_v56 = vld [vmem:[%s11235_s5 + $0xf0] sm:$0xff]  }
 0x472   : > { %v4917_v22 = vpop.f32.mrb[100].mxu1  ;;  %v5022_v59 = vrot.slane %v4977_v19, 2  ;;  %v4978_v60 = vmax.f32 %v4961_v39, 0.0  ;;  %v4751_v12 = vadd.f32 %v4723_v49, %v10938_v57  ;;  %v7954_v44 = vpop.f32.mrb[97].mxu0  ;;  %v8406_v43 = vld [vmem:[%s11235_s5 + $0xb0] sm:$0xff]   ;;  %v8407_v19 = vld [vmem:[%s11235_s5 + $0xf8] sm:$0xff]  }
 0x473   : > { %v8010_v54 = vpop.f32.mrb[101].mxu1  ;;  %5093 = vst [vmem:[#allocation3 + $0x50] sm:$0xff] %v5076_v20  ;;  %v4726_v47 = vpop.f32.mrb[98].mxu0  ;;  %v8408_v39 = vld [vmem:[%s11235_s5 + $0xb8] sm:$0xff]   ;;  %v8409_v49 = vld [vmem:[%s11235_s5 + $0x100] sm:$0xff]  }
 0x474   : > { %v4920_v51 = vpop.f32.mrb[102].mxu1  ;;  %v5023_v58 = vsel %vm1368_vm5, %v5020_v33, %v5022_v59  ;;  %v5024_v3 = vrot.slane %v4978_v60, 2  ;;  %v4937_v62 = vadd.f32 %v4909_v7, %v4751_v12  ;;  %v4752_v32 = vadd.f32 %v4726_v47, %v10940_v27  ;;  %v7955_v29 = vpop.f32.mrb[99].mxu0  ;;  %v8397_v33 = vld [vmem:[%s11235_s5 + $0xd0] sm:$0xff]   ;;  %v8412_v12 = vld [vmem:[%s11235_s5 + $0x118] sm:$0xff]   ;;  %v8413_v44 = vld [vmem:[%s11235_s5 + $0x120] sm:$0xff]  }
 0x475   : > { %v8011_v38 = vpop.f32.mrb[103].mxu1  ;;  %v5060_v40 = vmax.f32 %v4976_v34, %v5023_v58  ;;  %v8411_v51 = vld [vmem:[%s11235_s5 + $0x110] sm:$0xff]   ;;  %v8416_v58 = vld [vmem:[%s11235_s5 + $0x138] sm:$0xff]   ;;  %v8418_v29 = vld [vmem:[%s11237_s7 + $0x8] sm:$0xff]  }
 0x476   : > { %v4962_v26 = vadd.f32 %v10949_v31, %v4937_v62  ;;  %v4938_v15 = vadd.f32 %v4912_v46, %v4752_v32  ;;  %v8414_v38 = vld [vmem:[%s11235_s5 + $0x128] sm:$0xff]   ;;  %v8415_v47 = vld [vmem:[%s11235_s5 + $0x130] sm:$0xff]   ;;  %v8417_v32 = vld [vmem:[%s11237_s7] sm:$0xff]  }
 0x477   : > { %v5077_v36 = vmax.f32 %v10825_v35, %v5060_v40  ;;  %v8419_v40 = vld [vmem:[%s11237_s7 + $0x10] sm:$0xff]  }
 0x478   : > { %v4979_v25 = vmax.f32 %v4962_v26, 0.0  ;;  %v4963_v57 = vadd.f32 %v10949_v31, %v4938_v15  ;;  %v8420_v26 = vld [vmem:[%s11237_s7 + $0x18] sm:$0xff]   ;;  %v8421_v15 = vld [vmem:[%s11237_s7 + $0x20] sm:$0xff]  }
 0x479   : > { %5094 = vst [vmem:[#allocation3 + $0x58] sm:$0xff] %v5077_v36  ;;  %v4731_v42 = vpop.f32.mrb[100].mxu0  ;;  %v8422_v36 = vld [vmem:[%s11237_s7 + $0x28] sm:$0xff]  }
 0x47a   : > { %v5026_v2 = vrot.slane %v4979_v25, 2  ;;  %v4980_v10 = vmax.f32 %v4963_v57, 0.0  ;;  %v4753_v5 = vadd.f32 %v4731_v42, %v10943_v41  ;;  %v7958_v23 = vpop.f32.mrb[101].mxu0  ;;  %v8424_v57 = vld [vmem:[%s11237_s7 + $0x38] sm:$0xff]   ;;  %v8425_v42 = vld [vmem:[%s11239_s9] sm:$0xff]  }
 0x47b   : > { %v4734_v16 = vpop.f32.mrb[102].mxu0  ;;  %v8429_v23 = vld [vmem:[%s11239_s9 + $0x20] sm:$0xff]  }
 0x47c   : > { %v5027_v27 = vsel %vm1368_vm5, %v5024_v3, %v5026_v2  ;;  %v5028_v0 = vrot.slane %v4980_v10, 2  ;;  %v4939_v24 = vadd.f32 %v4917_v22, %v4753_v5  ;;  %v7959_v50 = vpop.f32.mrb[103].mxu0  ;;  %v8428_v5 = vld [vmem:[%s11239_s9 + $0x18] sm:$0xff]   ;;  %v8430_v16 = vld [vmem:[%s11239_s9 + $0x28] sm:$0xff]  }
 0x47d   : > { %v5062_v53 = vmax.f32 %v4978_v60, %v5027_v27  ;;  %v8410_v60 = vld [vmem:[%s11235_s5 + $0x108] sm:$0xff]  }
 0x47e   : > { %v5029_v45 = vsel %vm1368_vm5, %v5026_v2, %v5028_v0  ;;  %v4964_v35 = vadd.f32 %v10949_v31, %v4939_v24  ;;  %v8426_v2 = vld [vmem:[%s11239_s9 + $0x8] sm:$0xff]  }
 0x47f   : > { %v5079_v7 = vmax.f32 %v10836_v48, %v5062_v53  ;;  %v5063_v11 = vmax.f32 %v4979_v25, %v5029_v45  ;;  %v8423_v25 = vld [vmem:[%s11237_s7 + $0x30] sm:$0xff]  }
 0x480   : > { %v4981_v6 = vmax.f32 %v4964_v35, 0.0 }
 0x481   : > { %5096 = vst [vmem:[#allocation3 + $0x68] sm:$0xff] %v5079_v7  ;;  %v5080_v13 = vmax.f32 %v10840_v63, %v5063_v11 }
 0x482   : > { %v5030_v41 = vrot.slane %v4981_v6, 2 }
 0x483   : > { %5097 = vst [vmem:[#allocation3 + $0x70] sm:$0xff] %v5080_v13 }
 0x484   : > { %v5031_v34 = vsel %vm1368_vm5, %v5028_v0, %v5030_v41 }
 0x485   : > { %v5064_v46 = vmax.f32 %v4980_v10, %v5031_v34  ;;  %v8427_v10 = vld [vmem:[%s11239_s9 + $0x10] sm:$0xff]  }
 0x487   : > { %v5081_v4 = vmax.f32 %v10854_v14, %v5064_v46  ;;  %v8396_v14 = vld [vmem:[%s11235_s5 + $0x88] sm:$0xff]  }
 0x488   : > { %v5100_v28 = vld [vmem:[#allocation3] ss:$36 sm:$0xf] }
 0x489   : > { %5098 = vst [vmem:[#allocation3 + $0x78] sm:$0xff] %v5081_v4  ;;  %v5101_v31 = vpack.c.bf16 %v5100_v28, %v5100_v28 }
 0x48a   : > { %v5119_v48 = vld [vmem:[#allocation3 + $0x4] ss:$36 sm:$0xf] }
 0x48b   : > { %8049 = vmatmul.mubr.bf16.vlgmr.msra.gmra.mrb[104].mxu1 %v5101_v31  ;;  %v5120_v63 = vpack.c.bf16 %v5119_v48, %v5119_v48  ;;  %v5314_v20 = vld [vmem:[#allocation3 + $0x8] ss:$36 sm:$0xf] }
 0x48c   : > { %8073 = vmatpush3.bf16.msra.mxu1 %v8393_v52  ;;  %8088 = vmatprep.mubr.msk.bf16.mxu1 %vm8506_vm0, %v8505_v1  ;;  %v5315_v59 = vpack.c.bf16 %v5314_v20, %v5314_v20 }
 0x48d   : > { %8029 = vmatmul.mubr.bf16.vlgmr.msra.gmra.mrb[104].mxu0 %v5120_v63  ;;  %8074 = vmatprep.subr.bf16.mxu1 %v8505_v1  ;;  %v6541_v63 = vld [vmem:[%s11236_s6] ss:$0 sm:$0xff] }
 0x48e   : > { %8053 = vmatpush3.bf16.msra.mxu0 %v8394_v61  ;;  %8068 = vmatprep.mubr.msk.bf16.mxu0 %vm8506_vm0, %v8505_v1 }
 0x48f   : > { %8054 = vmatprep.subr.bf16.mxu0 %v8505_v1 }
 0x490   : > { %8075 = vmatpush3.bf16.msra.mxu1 %v8395_v37  ;;  %v5422_v22 = vld [vmem:[#allocation3 + $0xc] ss:$36 sm:$0xf] }
 0x491   : > { %8076 = vmatprep.subr.bf16.mxu1 %v8505_v1  ;;  %v5423_v54 = vpack.c.bf16 %v5422_v22, %v5422_v22  ;;  %v5530_v3 = vld [vmem:[#allocation3 + $0x10] ss:$36 sm:$0xf] }
 0x492   : > { %8055 = vmatpush3.bf16.msra.mxu0 %v8396_v14  ;;  %v5531_v62 = vpack.c.bf16 %v5530_v3, %v5530_v3 }
 0x493   : > { %8056 = vmatprep.subr.bf16.mxu0 %v8505_v1 }
 0x494   : > { %8077 = vmatpush3.bf16.msra.mxu1 %v8397_v33 }
 0x495   : > { %8078 = vmatprep.subr.bf16.mxu1 %v8505_v1 }
 0x496   : > { %8057 = vmatpush3.bf16.msra.mxu0 %v8398_v55 }
 0x497   : > { %8058 = vmatprep.subr.bf16.mxu0 %v8505_v1 }
 0x498   : > { %8079 = vmatpush3.bf16.msra.mxu1 %v8399_v9 }
 0x499   : > { %8080 = vmatprep.subr.bf16.mxu1 %v8505_v1 }
 0x49a   : > { %8059 = vmatpush3.bf16.msra.mxu0 %v8400_v30 }
 0x49b   : > { %8060 = vmatprep.subr.bf16.mxu0 %v8505_v1 }
 0x49c   : > { %8081 = vmatpush3.bf16.msra.mxu1 %v8401_v21 }
 0x49d   : > { %8082 = vmatprep.subr.bf16.mxu1 %v8505_v1 }
 0x49e   : > { %8061 = vmatpush3.bf16.msra.mxu0 %v8402_v18  ;;  %v8431_v18 = vld [vmem:[%s11239_s9 + $0x30] sm:$0xff]  }
 0x49f   : > { %8062 = vmatprep.subr.bf16.mxu0 %v8505_v1 }
 0x4a0   : > { %8083 = vmatpush3.bf16.msra.mxu1 %v8403_v8  ;;  %v8432_v8 = vld [vmem:[%s11239_s9 + $0x38] sm:$0xff]  }
 0x4a1   : > { %8084 = vmatprep.subr.bf16.mxu1 %v8505_v1 }
 0x4a2   : > { %8063 = vmatpush3.bf16.msra.mxu0 %v8404_v17  ;;  %v6542_v17 = vld [vmem:[%s11238_s8] ss:$0 sm:$0xff] }
 0x4a3   : > { %8064 = vmatprep.subr.bf16.mxu0 %v8505_v1 }
 0x4a4   : > { %8085 = vmatpush3.bf16.msra.mxu1 %v8405_v56 }
 0x4a5   : > { %8086 = vmatprep.subr.bf16.mxu1 %v8505_v1 }
 0x4a6   : > { %8065 = vmatpush3.bf16.msra.mxu0 %v8406_v43 }
 0x4a7   : > { %8066 = vmatprep.subr.bf16.mxu0 %v8505_v1 }
 0x4a8   : > { %8087 = vmatpush3.bf16.msra.mxu1 %v8407_v19 }
 0x4a9   : > { %8112 = vmatprep.subr.bf16.mxu1 %v8505_v1 }
 0x4aa   : > { %8067 = vmatpush3.bf16.msra.mxu0 %v8408_v39 }
 0x4ab   : > { %8089 = vmatmul.mubr.bf16.vlgmr.msra.gmra.mrb[108].mxu1 %v5423_v54  ;;  %8092 = vmatprep.subr.bf16.mxu0 %v8505_v1 }
 0x4ac   : > { %8128 = vmatprep.mubr.msk.bf16.mxu1 %vm8506_vm0, %v8505_v1  ;;  %8113 = vmatpush3.bf16.msra.mxu1 %v8417_v32 }
 0x4ad   : > { %8069 = vmatmul.mubr.bf16.vlgmr.msra.gmra.mrb[108].mxu0 %v5315_v59  ;;  %8114 = vmatprep.subr.bf16.mxu1 %v8505_v1 }
 0x4ae   : > { %8093 = vmatpush3.bf16.msra.mxu0 %v8409_v49  ;;  %8108 = vmatprep.mubr.msk.bf16.mxu0 %vm8506_vm0, %v8505_v1 }
 0x4af   : > { %8094 = vmatprep.subr.bf16.mxu0 %v8505_v1 }
 0x4b0   : > { %8115 = vmatpush3.bf16.msra.mxu1 %v8418_v29 }
 0x4b1   : > { %8116 = vmatprep.subr.bf16.mxu1 %v8505_v1 }
 0x4b2   : > { %8095 = vmatpush3.bf16.msra.mxu0 %v8410_v60 }
 0x4b3   : > { %8096 = vmatprep.subr.bf16.mxu0 %v8505_v1 }
 0x4b4   : > { %8117 = vmatpush3.bf16.msra.mxu1 %v8419_v40 }
 0x4b5   : > { %8118 = vmatprep.subr.bf16.mxu1 %v8505_v1 }
 0x4b6   : > { %8097 = vmatpush3.bf16.msra.mxu0 %v8411_v51 }
 0x4b7   : > { %8098 = vmatprep.subr.bf16.mxu0 %v8505_v1 }
 0x4b8   : > { %8119 = vmatpush3.bf16.msra.mxu1 %v8420_v26 }
 0x4b9   : > { %8120 = vmatprep.subr.bf16.mxu1 %v8505_v1 }
 0x4ba   : > { %8099 = vmatpush3.bf16.msra.mxu0 %v8412_v12 }
 0x4bb   : > { %8100 = vmatprep.subr.bf16.mxu0 %v8505_v1 }
 0x4bc   : > { %8121 = vmatpush3.bf16.msra.mxu1 %v8421_v15 }
 0x4bd   : > { %8122 = vmatprep.subr.bf16.mxu1 %v8505_v1 }
 0x4be   : > { %8101 = vmatpush3.bf16.msra.mxu0 %v8413_v44 }
 0x4bf   : > { %8102 = vmatprep.subr.bf16.mxu0 %v8505_v1 }
 0x4c0   : > { %8123 = vmatpush3.bf16.msra.mxu1 %v8422_v36 }
 0x4c1   : > { %8124 = vmatprep.subr.bf16.mxu1 %v8505_v1 }
 0x4c2   : > { %8103 = vmatpush3.bf16.msra.mxu0 %v8414_v38 }
 0x4c3   : > { %8104 = vmatprep.subr.bf16.mxu0 %v8505_v1 }
 0x4c4   : > { %8125 = vmatpush3.bf16.msra.mxu1 %v8423_v25 }
 0x4c5   : > { %8126 = vmatprep.subr.bf16.mxu1 %v8505_v1 }
 0x4c6   : > { %8105 = vmatpush3.bf16.msra.mxu0 %v8415_v47 }
 0x4c7   : > { %8106 = vmatprep.subr.bf16.mxu0 %v8505_v1 }
 0x4c8   : > { %8127 = vmatpush3.bf16.msra.mxu1 %v8424_v57 }
 0x4ca   : > { %8107 = vmatpush3.bf16.msra.mxu0 %v8416_v58 }
 0x4cb   : > { %8132 = vmatprep.subr.bf16.mxu0 %v8505_v1 }
 0x4cd   : > { %8109 = vmatmul.mubr.bf16.vlgmr.msra.gmra.mrb[112].mxu0 %v5531_v62 }
 0x4ce   : > { %8148 = vmatprep.mubr.msk.bf16.mxu0 %vm8506_vm0, %v8505_v1  ;;  %8133 = vmatpush3.bf16.msra.mxu0 %v8425_v42 }
 0x4cf   : > { %8134 = vmatprep.subr.bf16.mxu0 %v8505_v1 }
 0x4d2   : > { %8135 = vmatpush3.bf16.msra.mxu0 %v8426_v2 }
 0x4d3   : > { %8136 = vmatprep.subr.bf16.mxu0 %v8505_v1 }
 0x4d6   : > { %8137 = vmatpush3.bf16.msra.mxu0 %v8427_v10 }
 0x4d7   : > { %8138 = vmatprep.subr.bf16.mxu0 %v8505_v1 }
 0x4da   : > { %8139 = vmatpush3.bf16.msra.mxu0 %v8428_v5 }
 0x4db   : > { %8140 = vmatprep.subr.bf16.mxu0 %v8505_v1 }
 0x4de   : > { %8141 = vmatpush3.bf16.msra.mxu0 %v8429_v23 }
 0x4df   : > { %8142 = vmatprep.subr.bf16.mxu0 %v8505_v1 }
 0x4e2   : > { %8143 = vmatpush3.bf16.msra.mxu0 %v8430_v16 }
 0x4e3   : > { %8144 = vmatprep.subr.bf16.mxu0 %v8505_v1 }
 0x4e6   : > { %8145 = vmatpush3.bf16.msra.mxu0 %v8431_v18 }
 0x4e7   : > { %8146 = vmatprep.subr.bf16.mxu0 %v8505_v1  ;;  %v6551_v1 = vld [vmem:[%s11240_s10] ss:$0 sm:$0xff] }
 0x4ea   : > { %8147 = vmatpush3.bf16.msra.mxu0 %v8432_v8 }
 0x55e   : > { %v5307_v27 = vpop.f32.mrb[104].mxu1 }
 0x55f   : > { %v8050_v0 = vpop.f32.mrb[105].mxu1 }
 0x560   : > { %v5219_v24 = vpop.f32.mrb[104].mxu0  ;;  %v5310_v50 = vpop.f32.mrb[106].mxu1 }
 0x561   : > { %v5308_v53 = vadd.f32 %v5307_v27, %v5219_v24  ;;  %v8030_v45 = vpop.f32.mrb[105].mxu0  ;;  %v8051_v35 = vpop.f32.mrb[107].mxu1 }
 0x562   : > { %v5222_v7 = vpop.f32.mrb[106].mxu0 }
 0x563   : > { %v8031_v11 = vpop.f32.mrb[107].mxu0 }
 0x57e   : > { %v5522_v6 = vpop.f32.mrb[108].mxu1 }
 0x57f   : > { %v8090_v13 = vpop.f32.mrb[109].mxu1 }
 0x580   : > { %v5414_v41 = vpop.f32.mrb[108].mxu0  ;;  %v5525_v34 = vpop.f32.mrb[110].mxu1 }
 0x581   : > { %v5420_v46 = vadd.f32 %v5414_v41, %v5308_v53  ;;  %v8070_v4 = vpop.f32.mrb[109].mxu0  ;;  %v8091_v28 = vpop.f32.mrb[111].mxu1 }
 0x582   : > { %v5417_v52 = vpop.f32.mrb[110].mxu0 }
 0x583   : > { %v8071_v31 = vpop.f32.mrb[111].mxu0  ;;  %v5528_v48 = vadd.f32 %v5522_v6, %v5420_v46 }
 0x5a0   : > { %v5630_v61 = vpop.f32.mrb[112].mxu0 }
 0x5a1   : > { %v5636_v37 = vadd.f32 %v5630_v61, %v5528_v48  ;;  %v8110_v14 = vpop.f32.mrb[113].mxu0 }
 0x5a2   : > { %v5633_v33 = vpop.f32.mrb[114].mxu0 }
 0x5a3   : > { %v5644_v55 = vadd.f32 %v6541_v63, %v5636_v37  ;;  %v8111_v9 = vpop.f32.mrb[115].mxu0 }
 0x5a5   : > { %v5645_v30 = vmax.f32 %v5644_v55, 0.0 }
 0x5a7   : > { %v5646_v21 = vpack.c.bf16 %v5645_v30, %v5645_v30 }
 0x5a9   : > { %8129 = vmatmul.mubr.bf16.vlgmr.msra.gmra.mrb[112].mxu1 %v5646_v21 }
 0x67c   : > { %v5752_v56 = vpop.f32.mrb[112].mxu1 }
 0x67d   : > { %v5753_v43 = vadd.f32 %v6542_v17, %v5752_v56  ;;  %v8130_v19 = vpop.f32.mrb[113].mxu1 }
 0x67e   : > { %v5755_v39 = vpop.f32.mrb[114].mxu1 }
 0x67f   : > { %v5758_v22 = vmax.f32 %v5753_v43, 0.0  ;;  %v8131_v20 = vpop.f32.mrb[115].mxu1 }
 0x681   : > { %v5759_v54 = vpack.c.bf16 %v5758_v22, %v5758_v22 }
 0x683   : > { %8149 = vmatmul.mubr.bf16.vlgmr.msra.gmra.mrb[116].mxu0 %v5759_v54 }
 0x756   : > { %v5865_v49 = vpop.f32.mrb[116].mxu0 }
 0x757   : > { %v5866_v59 = vadd.f32 %v6551_v1, %v5865_v49  ;;  %v8150_v60 = vpop.f32.mrb[117].mxu0 }
 0x758   : > { %v5868_v51 = vpop.f32.mrb[118].mxu0 }
 0x759   : > { %5871 = vst [vmem:[%s380_s12] sm:$0xf] %v5866_v59  ;;  %v8151_v12 = vpop.f32.mrb[119].mxu0 }
 0x75a   : > { %8454 = shalt.err (!%p8451_p3)
}
 0x75b   : > { %s8455_s25 = scalar_lea.hbm %s11188_s24, 64  ;;  %s8459_s15 = scalar_lea.hbm %s11241_s11, 128 }
 0x75c   : > { %p8456_p4 = scmp.ne.s32.totalorder %s11188_s24, %s8455_s25  ;;  %p8460_p9 = scmp.lt.u32.totalorder %s11188_s24, %s11241_s11 }
 0x75d   : > { %p8461_p10 = scmp.lt.u32.totalorder %s8459_s15, %s8455_s25  ;;  %p8463_p12 = scmp.lt.u32.totalorder %s8455_s25, %s11188_s24 }
 0x75e   : > { %p8457_p7 = pnand %p8456_p4, %p8606_p5 }
 0x75f   : > { %p8462_p11 = por %p8461_p10, %p8460_p9 }
 0x760   : > { %p8458_p8 = pneg %p8457_p7 }
 0x761   : > { %p8464_p13 = por %p8463_p12, %p8462_p11 }
 0x763   : > { %p8465_p0 = pnand %p8464_p13, %p8458_p8 }
 0x765   : > { %8468 = shalt.err (!%p8465_p0)
}
 0x766   : > { %8152 = dma.vmem_to_hbm [thread:$0]  (%p8606_p5), %s11190_s13, 64, %s11188_s24, %s5873_s22  }
 0x767 PF: > { %p8158_p1 = scmp.ge.s32.totalorder %s8503_s20, 2  ;;  %s5898_s21 = sand.u32 1, %s8491_s17  }
 0x768   : > { %s5899_s14 = scalar_lea.sflag [#allocation5], %s5898_s21 }
 0x769   : > { %p8155_p2 = pnand %p8158_p1, %p8610_p6 }
 0x76b   : > { %8486 = dma.done.wait (!%p8155_p2), %s5899_s14, 64  }
 0x76c   : > { %8488 = vsyncadd (!%p8155_p2), %s5899_s14, 4294967232  ;;  %p21_p3 = scmp.ge.s32.totalorder %s8593_s23, 4   ;;  %s11244_s17 = smov %s8495_s18 }
 0x76d   : > { %s11245_s18 = smov %s8499_s19  ;;  %s11246_s19 = smov %s8604_s26 }
 0x76e   : > { %s11247_s20 = smov %s8593_s23  ;;  %23 = sbr.rel (!%p21_p3) target bundleno = 3 (0x3), region = 123 }
 0x775   :  { %5904 = vsyncpa [#allocation5], 1 }
 0x776   :  { %5906 = vsyncpa [#allocation5 + $0x1], 1 }

</bundles_post_ra>
